<compile_context>
chip_gen: v6e
topology: v6e:2x2x1
jax: 0.10.0
libtpu: 0.0.40
codegen_flags: <defaults>
</compile_context>

<pallas_src>
import jax
import jax.numpy as jnp
import numpy as np
from jax.experimental import pallas as pl
from jax.experimental.pallas import tpu as pltpu

D_IO = 768  # fixed input/output feature dim of DiffusionFC


def _make_kernel(num_mid_layers: int):
    """Kernel: in-proj (+temb), num_mid_layers x (Linear+ReLU), out-proj."""

    def kernel(x_ref, temb_ref, *refs):
        # refs = (w_in, b_in, [w_mid_l, b_mid_l]*L, w_out, b_out, o_ref)
        o_ref = refs[-1]
        w_in, b_in = refs[0], refs[1]
        w_out, b_out = refs[-3], refs[-2]

        # Input projection: bf16 x bf16 -> f32 accumulation on the MXU.
        h = jnp.dot(x_ref[...], w_in[...], preferred_element_type=jnp.float32)
        # Bias + time-embedding add in f32 on the VPU.
        h = h + b_in[...] + temb_ref[...]

        # MidFC: num_mid_layers x (Linear + ReLU). Cast to bf16 only for the
        # matmul operand; keep the running activation in f32.
        for l in range(num_mid_layers):
            w = refs[2 + 2 * l]
            b = refs[3 + 2 * l]
            h = jnp.dot(h.astype(jnp.bfloat16), w[...],
                        preferred_element_type=jnp.float32) + b[...]
            h = jnp.maximum(h, 0.0)

        # Output projection.
        out = jnp.dot(h.astype(jnp.bfloat16), w_out[...],
                      preferred_element_type=jnp.float32) + b_out[...]
        o_ref[...] = out.astype(o_ref.dtype)

    return kernel


def diffusion_fc_forward(x, t, params, *, block_b=256):
    """x: [B, 768] float32, t: [B] int32 -> [B, 768] float32."""
    B = x.shape[0]
    H = params["w_in"].shape[1]
    assert block_b % 8 == 0, "batch tile must be sublane (8) aligned"

    # Arbitrary batch sizes: pad up to a multiple of the batch tile.
    grid_b = pl.cdiv(B, block_b)
    b_pad = grid_b * block_b
    if b_pad != B:
        x = jnp.pad(x, ((0, b_pad - B), (0, 0)))
        t = jnp.pad(t, (0, b_pad - B))  # padded rows use index 0 (valid)

    # Embedding lookup stays as cheap JAX glue (XLA gather), added in-kernel.
    # TODO(synk): could be fused via scalar-prefetched t + VMEM-resident table.
    temb = params["time_embed"][t].astype(jnp.float32)  # [b_pad, H]

    # bf16 matmul operands (native MXU dtype, halves weight/x DMA bytes);
    # biases stay f32 for the VPU adds.
    x_bf = x.astype(jnp.bfloat16)
    weight_args = [params["w_in"].astype(jnp.bfloat16),
                   params["b_in"].astype(jnp.float32)]
    for (w, b) in params["mid"]:
        weight_args += [w.astype(jnp.bfloat16), b.astype(jnp.float32)]
    weight_args += [params["w_out"].astype(jnp.bfloat16),
                    params["b_out"].astype(jnp.float32)]

    kernel = _make_kernel(len(params["mid"]))

    in_specs = [
        pl.BlockSpec((block_b, D_IO), lambda i: (i, 0)),  # x tile (bf16)
        pl.BlockSpec((block_b, H), lambda i: (i, 0)),     # t_embed tile (f32)
    ]
    # Weights/biases are small (~1 MB bf16 total): keep the full tensors
    # resident with a constant index_map (never re-fetched across grid steps).
    for w in weight_args:
        in_specs.append(pl.BlockSpec(w.shape, lambda i: (0, 0)))

    out_spec = pl.BlockSpec((block_b, D_IO), lambda i: (i, 0))

    out = pl.pallas_call(
        kernel,
        out_shape=jax.ShapeDtypeStruct((b_pad, D_IO), jnp.float32),
        grid_spec=pltpu.PrefetchScalarGridSpec(
            num_scalar_prefetch=0,
            grid=(grid_b,),
            in_specs=in_specs,
            out_specs=out_spec,
        ),
        compiler_params=pltpu.CompilerParams(
            dimension_semantics=("parallel",),   # shard batch tiles across TCs
            vmem_limit_bytes=32 * 1024 * 1024,
        ),
    )(x_bf, temb, *weight_args)

    return out[:B]


def init_params(key, intermediate_dim=256, num_fc_layers=2,
                denoising_time_steps=100):
    """Deterministic synthetic parameters (shapes match DiffusionFC.__init__)."""
    n_keys = 2 + 2 * num_fc_layers + 2 + 1
    keys = jax.random.split(key, n_keys)
    ki = iter(range(n_keys))
    s = 0.02

    def nrm(k, shape):
        return (s * jax.random.normal(keys[k], shape)).astype(jnp.float32)

    params = {
        "time_embed": nrm(next(ki), (denoising_time_steps, intermediate_dim)),
        "w_in": nrm(next(ki), (D_IO, intermediate_dim)),
        "b_in": nrm(next(ki), (1, intermediate_dim)),
        "mid": [],
        "w_out": nrm(next(ki), (intermediate_dim, D_IO)),
        "b_out": nrm(next(ki), (1, D_IO)),
    }
    for _ in range(num_fc_layers):
        w = nrm(next(ki), (intermediate_dim, intermediate_dim))
        b = nrm(next(ki), (1, intermediate_dim))
        params["mid"].append((w, b))
    return params


def reference_forward(x, t, params):
    """Pure-JAX reference of the same math (bf16 operands, f32 accumulation)."""
    bf = lambda a: a.astype(jnp.bfloat16)
    h = jnp.dot(bf(x), bf(params["w_in"]), preferred_element_type=jnp.float32)
    h = h + params["b_in"] + params["time_embed"][t]
    for (w, b) in params["mid"]:
        h = jnp.dot(bf(h), bf(w), preferred_element_type=jnp.float32) + b
        h = jnp.maximum(h, 0.0)
    return jnp.dot(bf(h), bf(params["w_out"]),
                   preferred_element_type=jnp.float32) + params["b_out"]


if __name__ == "__main__":
    key = jax.random.PRNGKey(0)
    k_param, k_x, k_t = jax.random.split(key, 3)

    B = 300               # non-multiple of the tile: exercises padding path
    H = 256               # intermediate_dim (lane-aligned, small for the demo)
    NUM_FC_LAYERS = 2
    T_STEPS = 100

    params = init_params(k_param, intermediate_dim=H,
                         num_fc_layers=NUM_FC_LAYERS,
                         denoising_time_steps=T_STEPS)

    x = jax.random.normal(k_x, (B, D_IO), dtype=jnp.float32)
    t = jax.random.randint(k_t, (B,), 0, T_STEPS, dtype=jnp.int32)

    # Default block_b=256 -> padded batch 512, grid=(2,) (pipelining + both
    # TCs on v7x get work).
    out = jax.block_until_ready(diffusion_fc_forward(x, t, params))
    ref = jax.block_until_ready(reference_forward(x, t, params))

    assert out.shape == (B, D_IO)
    np.testing.assert_allclose(np.asarray(out), np.asarray(ref),
                               rtol=2e-2, atol=2e-2)

    print("KERNEL_OK")
</pallas_src>

<mosaic_0001>
module attributes {stable_mosaic.version = 11 : i64} {
  func.func @kernel(%arg0: i32, %arg1: memref<256x768xbf16, #tpu.memory_space<vmem>>, %arg2: memref<256x256xf32, #tpu.memory_space<vmem>>, %arg3: memref<768x256xbf16, #tpu.memory_space<vmem>>, %arg4: memref<1x256xf32, #tpu.memory_space<vmem>>, %arg5: memref<256x256xbf16, #tpu.memory_space<vmem>>, %arg6: memref<1x256xf32, #tpu.memory_space<vmem>>, %arg7: memref<256x256xbf16, #tpu.memory_space<vmem>>, %arg8: memref<1x256xf32, #tpu.memory_space<vmem>>, %arg9: memref<256x768xbf16, #tpu.memory_space<vmem>>, %arg10: memref<1x768xf32, #tpu.memory_space<vmem>>, %arg11: memref<256x768xf32, #tpu.memory_space<vmem>>) attributes {dimension_semantics = [#tpu.dimension_semantics<parallel>], iteration_bounds = array<i64: 2>, scalar_prefetch = 0 : i64, scratch_operands = 0 : i64, tpu.core_type = #tpu.core_type<tc>, window_params = [{transform_indices = @transform_0, window_bounds = array<i64: 256, 768>}, {transform_indices = @transform_1, window_bounds = array<i64: 256, 256>}, {pipeline_mode = #tpu.pipeline_mode<synchronous>, transform_indices = @transform_2, window_bounds = array<i64: 768, 256>}, {pipeline_mode = #tpu.pipeline_mode<synchronous>, transform_indices = @transform_3, window_bounds = array<i64: 1, 256>}, {pipeline_mode = #tpu.pipeline_mode<synchronous>, transform_indices = @transform_4, window_bounds = array<i64: 256, 256>}, {pipeline_mode = #tpu.pipeline_mode<synchronous>, transform_indices = @transform_5, window_bounds = array<i64: 1, 256>}, {pipeline_mode = #tpu.pipeline_mode<synchronous>, transform_indices = @transform_6, window_bounds = array<i64: 256, 256>}, {pipeline_mode = #tpu.pipeline_mode<synchronous>, transform_indices = @transform_7, window_bounds = array<i64: 1, 256>}, {pipeline_mode = #tpu.pipeline_mode<synchronous>, transform_indices = @transform_8, window_bounds = array<i64: 256, 768>}, {pipeline_mode = #tpu.pipeline_mode<synchronous>, transform_indices = @transform_9, window_bounds = array<i64: 1, 768>}, {transform_indices = @transform_10, window_bounds = array<i64: 256, 768>}]} {
    %c0 = arith.constant 0 : index
    %c0_0 = arith.constant 0 : index
    %0 = vector.load %arg1[%c0, %c0_0] : memref<256x768xbf16, #tpu.memory_space<vmem>>, vector<256x768xbf16>
    %c0_1 = arith.constant 0 : index
    %c0_2 = arith.constant 0 : index
    %1 = vector.load %arg3[%c0_1, %c0_2] : memref<768x256xbf16, #tpu.memory_space<vmem>>, vector<768x256xbf16>
    %cst = arith.constant dense<0.000000e+00> : vector<256x256xf32>
    %2 = tpu.matmul %0, %1, %cst {dimension_numbers = #tpu.dot_dimension_numbers<[1], [0], [0], [1], [0, 0, 1, 1], [], []>} : vector<256x768xbf16>, vector<768x256xbf16>, vector<256x256xf32> -> vector<256x256xf32>
    %c0_3 = arith.constant 0 : index
    %c0_4 = arith.constant 0 : index
    %3 = vector.load %arg4[%c0_3, %c0_4] : memref<1x256xf32, #tpu.memory_space<vmem>>, vector<1x256xf32>
    %4 = vector.broadcast %3 : vector<1x256xf32> to vector<256x256xf32>
    %5 = arith.addf %2, %4 : vector<256x256xf32>
    %c0_5 = arith.constant 0 : index
    %c0_6 = arith.constant 0 : index
    %6 = vector.load %arg2[%c0_5, %c0_6] : memref<256x256xf32, #tpu.memory_space<vmem>>, vector<256x256xf32>
    %7 = arith.addf %5, %6 : vector<256x256xf32>
    %8 = arith.truncf %7 : vector<256x256xf32> to vector<256x256xbf16>
    %c0_7 = arith.constant 0 : index
    %c0_8 = arith.constant 0 : index
    %9 = vector.load %arg5[%c0_7, %c0_8] : memref<256x256xbf16, #tpu.memory_space<vmem>>, vector<256x256xbf16>
    %cst_9 = arith.constant dense<0.000000e+00> : vector<256x256xf32>
    %10 = tpu.matmul %8, %9, %cst_9 {dimension_numbers = #tpu.dot_dimension_numbers<[1], [0], [0], [1], [0, 0, 1, 1], [], []>} : vector<256x256xbf16>, vector<256x256xbf16>, vector<256x256xf32> -> vector<256x256xf32>
    %c0_10 = arith.constant 0 : index
    %c0_11 = arith.constant 0 : index
    %11 = vector.load %arg6[%c0_10, %c0_11] : memref<1x256xf32, #tpu.memory_space<vmem>>, vector<1x256xf32>
    %12 = vector.broadcast %11 : vector<1x256xf32> to vector<256x256xf32>
    %13 = arith.addf %10, %12 : vector<256x256xf32>
    %cst_12 = arith.constant 0.000000e+00 : f32
    %14 = vector.broadcast %cst_12 : f32 to vector<256x256xf32>
    %15 = arith.maximumf %13, %14 : vector<256x256xf32>
    %16 = arith.truncf %15 : vector<256x256xf32> to vector<256x256xbf16>
    %c0_13 = arith.constant 0 : index
    %c0_14 = arith.constant 0 : index
    %17 = vector.load %arg7[%c0_13, %c0_14] : memref<256x256xbf16, #tpu.memory_space<vmem>>, vector<256x256xbf16>
    %cst_15 = arith.constant dense<0.000000e+00> : vector<256x256xf32>
    %18 = tpu.matmul %16, %17, %cst_15 {dimension_numbers = #tpu.dot_dimension_numbers<[1], [0], [0], [1], [0, 0, 1, 1], [], []>} : vector<256x256xbf16>, vector<256x256xbf16>, vector<256x256xf32> -> vector<256x256xf32>
    %c0_16 = arith.constant 0 : index
    %c0_17 = arith.constant 0 : index
    %19 = vector.load %arg8[%c0_16, %c0_17] : memref<1x256xf32, #tpu.memory_space<vmem>>, vector<1x256xf32>
    %20 = vector.broadcast %19 : vector<1x256xf32> to vector<256x256xf32>
    %21 = arith.addf %18, %20 : vector<256x256xf32>
    %cst_18 = arith.constant 0.000000e+00 : f32
    %22 = vector.broadcast %cst_18 : f32 to vector<256x256xf32>
    %23 = arith.maximumf %21, %22 : vector<256x256xf32>
    %24 = arith.truncf %23 : vector<256x256xf32> to vector<256x256xbf16>
    %c0_19 = arith.constant 0 : index
    %c0_20 = arith.constant 0 : index
    %25 = vector.load %arg9[%c0_19, %c0_20] : memref<256x768xbf16, #tpu.memory_space<vmem>>, vector<256x768xbf16>
    %cst_21 = arith.constant dense<0.000000e+00> : vector<256x768xf32>
    %26 = tpu.matmul %24, %25, %cst_21 {dimension_numbers = #tpu.dot_dimension_numbers<[1], [0], [0], [1], [0, 0, 1, 1], [], []>} : vector<256x256xbf16>, vector<256x768xbf16>, vector<256x768xf32> -> vector<256x768xf32>
    %c0_22 = arith.constant 0 : index
    %c0_23 = arith.constant 0 : index
    %27 = vector.load %arg10[%c0_22, %c0_23] : memref<1x768xf32, #tpu.memory_space<vmem>>, vector<1x768xf32>
    %28 = vector.broadcast %27 : vector<1x768xf32> to vector<256x768xf32>
    %29 = arith.addf %26, %28 : vector<256x768xf32>
    %c0_24 = arith.constant 0 : index
    %c0_25 = arith.constant 0 : index
    %30 = vector.load %arg11[%c0_24, %c0_25] : memref<256x768xf32, #tpu.memory_space<vmem>>, vector<256x768xf32>
    tpu.vector_store %arg11[%c0_24, %c0_25], %29 {strides = array<i32>} : memref<256x768xf32, #tpu.memory_space<vmem>>, vector<256x768xf32>,
    return
  }
  func.func @transform_0(%arg0: i32) -> (i32, i32) {
    %c0_i32 = arith.constant 0 : i32
    %c0_i32_0 = arith.constant 0 : i32
    return %arg0, %c0_i32 : i32, i32
  }
  func.func @transform_1(%arg0: i32) -> (i32, i32) {
    %c0_i32 = arith.constant 0 : i32
    %c0_i32_0 = arith.constant 0 : i32
    return %arg0, %c0_i32 : i32, i32
  }
  func.func @transform_2(%arg0: i32) -> (i32, i32) {
    %c0_i32 = arith.constant 0 : i32
    %c0_i32_0 = arith.constant 0 : i32
    %c0_i32_1 = arith.constant 0 : i32
    return %c0_i32, %c0_i32_0 : i32, i32
  }
  func.func @transform_3(%arg0: i32) -> (i32, i32) {
    %c0_i32 = arith.constant 0 : i32
    %c0_i32_0 = arith.constant 0 : i32
    %c0_i32_1 = arith.constant 0 : i32
    return %c0_i32, %c0_i32_0 : i32, i32
  }
  func.func @transform_4(%arg0: i32) -> (i32, i32) {
    %c0_i32 = arith.constant 0 : i32
    %c0_i32_0 = arith.constant 0 : i32
    %c0_i32_1 = arith.constant 0 : i32
    return %c0_i32, %c0_i32_0 : i32, i32
  }
  func.func @transform_5(%arg0: i32) -> (i32, i32) {
    %c0_i32 = arith.constant 0 : i32
    %c0_i32_0 = arith.constant 0 : i32
    %c0_i32_1 = arith.constant 0 : i32
    return %c0_i32, %c0_i32_0 : i32, i32
  }
  func.func @transform_6(%arg0: i32) -> (i32, i32) {
    %c0_i32 = arith.constant 0 : i32
    %c0_i32_0 = arith.constant 0 : i32
    %c0_i32_1 = arith.constant 0 : i32
    return %c0_i32, %c0_i32_0 : i32, i32
  }
  func.func @transform_7(%arg0: i32) -> (i32, i32) {
    %c0_i32 = arith.constant 0 : i32
    %c0_i32_0 = arith.constant 0 : i32
    %c0_i32_1 = arith.constant 0 : i32
    return %c0_i32, %c0_i32_0 : i32, i32
  }
  func.func @transform_8(%arg0: i32) -> (i32, i32) {
    %c0_i32 = arith.constant 0 : i32
    %c0_i32_0 = arith.constant 0 : i32
    %c0_i32_1 = arith.constant 0 : i32
    return %c0_i32, %c0_i32_0 : i32, i32
  }
  func.func @transform_9(%arg0: i32) -> (i32, i32) {
    %c0_i32 = arith.constant 0 : i32
    %c0_i32_0 = arith.constant 0 : i32
    %c0_i32_1 = arith.constant 0 : i32
    return %c0_i32, %c0_i32_0 : i32, i32
  }
  func.func @transform_10(%arg0: i32) -> (i32, i32) {
    %c0_i32 = arith.constant 0 : i32
    %c0_i32_0 = arith.constant 0 : i32
    return %arg0, %c0_i32 : i32, i32
  }
}

</mosaic_0001>

<bundles_post_ra>
// kernel: tpu_custom_call.1
= control target key start
LH: loop header
LB: loop body
LE: loop exit
PB: predicated region body
PF: predicated region fallthrough
CT: control target
= control target key end

     0   :  { %s8113_s0 = inlined_call_operand.hbm [shape: bf16[512,768], index: 0, kind: input, shape index: {}]   ;;  %s8114_s1 = inlined_call_operand.hbm [shape: f32[512,256], index: 1, kind: input, shape index: {}]   ;;  %s8115_s2 = inlined_call_operand.hbm [shape: bf16[768,256], index: 2, kind: input, shape index: {}]   ;;  %s8116_s3 = inlined_call_operand.hbm [shape: f32[1,256], index: 3, kind: input, shape index: {}]   ;;  %s8117_s4 = inlined_call_operand.hbm [shape: bf16[256,256], index: 4, kind: input, shape index: {}]   ;;  %s8118_s5 = inlined_call_operand.hbm [shape: f32[1,256], index: 5, kind: input, shape index: {}]   ;;  %s8119_s6 = inlined_call_operand.hbm [shape: bf16[256,256], index: 6, kind: input, shape index: {}]   ;;  %s8120_s7 = inlined_call_operand.hbm [shape: f32[1,256], index: 7, kind: input, shape index: {}]   ;;  %s8121_s8 = inlined_call_operand.hbm [shape: bf16[256,768], index: 8, kind: input, shape index: {}]   ;;  %s8122_s9 = inlined_call_operand.hbm [shape: f32[1,768], index: 9, kind: input, shape index: {}]   ;;  %s8123_s10 = inlined_call_operand.hbm [shape: f32[512,768], index: 10, kind: output, shape index: {}]  }
   0x1   :  { %8135 = sst [smem:[#allocation84_spill]] %s8113_s0 }
   0x2   :  { %8136 = sst [smem:[#allocation85_spill]] %s8115_s2 }
   0x3   :  { %8137 = sst [smem:[#allocation86_spill]] %s8116_s3 }
   0x4   :  { %8138 = sst [smem:[#allocation87_spill]] %s8117_s4 }
   0x5   :  { %8139 = sst [smem:[#allocation88_spill]] %s8118_s5 }
   0x6   :  { %8140 = sst [smem:[#allocation89_spill]] %s8119_s6 }
   0x7   :  { %8141 = sst [smem:[#allocation90_spill]] %s8120_s7 }
   0x8   :  { %8142 = sst [smem:[#allocation91_spill]] %s8121_s8 }
   0x9   :  { %15 = vsyncpa [#allocation3], 0 }
   0xa   :  { %17 = vsyncpa [#allocation3 + $0x1], 0 }
   0xb   :  { %18 = vsyncpa [#allocation6], 0 }
   0xc   :  { %20 = vsyncpa [#allocation6 + $0x1], 0 }
   0xd   :  { %21 = vsyncpa [#allocation9], 0 }
   0xe   :  { %22 = vsyncpa [#allocation12], 0 }
   0xf   :  { %23 = vsyncpa [#allocation15], 0 }
  0x10   :  { %24 = vsyncpa [#allocation18], 0 }
  0x11   :  { %25 = vsyncpa [#allocation4], 0 }
  0x12   :  { %27 = vsyncpa [#allocation4 + $0x1], 0  ;;  %s6474_s13 = smov 0   ;;  %s6476_s14 = smov 0  }
  0x13   :  { %s6478_s15 = smov 0   ;;  %s6480_s16 = smov 0  }
  0x14 LB: > { %s6400_s17 = smov [#allocation7]   ;;  %s6495_s19 = sadd.s32 4294967295, %s6398_s16   ;;  %s6398_s16 = sphi %s6480_s16, %s8291_s16   ;;  %s6394_s15 = sphi %s6478_s15, %s8290_s15   ;;  %s6390_s14 = sphi %s6476_s14, %s8289_s14   ;;  %s6386_s13 = sphi %s6474_s13, %s8288_s13  }
  0x15   : > { %s296_s18 = sshll.u32 %s6400_s17, 4  ;;  %p4987_p0 = scmp.ge.s32.totalorder %s6398_s16, 1  ;;  %s297_s18 = int_to_ptr.vmem [resolvable:$true] %s296_s18 }
  0x16   : > { %p8124_p1 = scmp.eq.s32.totalorder %s6495_s19, 0  ;;  %p284_p2 = scmp.lt.s32.totalorder %s6398_s16, 3 }
  0x17   : > { %s6401_s21 = smov [#allocation8]   ;;  %s6402_s24 = smov [#allocation11]  }
  0x18   : > { %p6500_p3 = pnand %p4987_p0, %p284_p2  ;;  %s310_s22 = sshll.u32 %s6401_s21, 4  ;;  %s311_s22 = int_to_ptr.vmem [resolvable:$true] %s310_s22 }
  0x19   : > { %s334_s25 = sshll.u32 %s6402_s24, 4  ;;  %s6057_s27 = scalar_lea.vmem %s297_s18, 12288  ;;  %s6513_s25 = int_to_ptr.vmem [resolvable:$true] %s334_s25 }
  0x1a   : > { %s8143_s20 = scalar_select %p6500_p3, 1, 0 }
  0x1b   : > { %p5416_p5 = pneg %p6500_p3  ;;  %p6058_p8 = scmp.ne.s32.totalorder %s297_s18, %s6057_s27 }
  0x1c   : > { %p6065_p11 = scmp.lt.s32.totalorder %s297_s18, %s297_s18  ;;  %p6066_p12 = scmp.lt.s32.totalorder %s6057_s27, %s6057_s27 }
  0x1d   : > { %p6509_p6 = pnand %p5416_p5, %p8124_p1 }
  0x1e   : > { %p6067_p13 = por %p6066_p12, %p6065_p11 }
  0x1f   : > { %p6517_p7 = pneg %p6509_p6 }
  0x21   : > { %p6060_p9 = pnand %p6058_p8, %p6517_p7 }
  0x23   : > { %p6061_p10 = pneg %p6060_p9 }
  0x25   : > { %p6068_p0 = pnand %p6067_p13, %p6061_p10 }
  0x27   : > { %6071 = shalt.err (!%p6068_p0)
}
  0x28   : > { %s6403_s28 = smov 128   ;;  %s6404_s29 = smov 8  }
  0x29   : > { %s8146_s2 = sld [smem:[#allocation85_spill]]  ;;  %s6083_s12 = scalar_lea.vmem %s311_s22, 32 }
  0x2a   : > { %p6084_p2 = scmp.ne.s32.totalorder %s311_s22, %s6083_s12  ;;  %p6091_p9 = scmp.lt.s32.totalorder %s311_s22, %s311_s22 }
  0x2b   : > { %p6092_p10 = scmp.lt.s32.totalorder %s6083_s12, %s6083_s12 }
  0x2c   : > { %p6086_p5 = pnand %p6084_p2, %p6517_p7 }
  0x2d   : > { %p6093_p11 = por %p6092_p10, %p6091_p9 }
  0x2e   : > { %p6087_p8 = pneg %p6086_p5 }
  0x2f   : > { %5419 = dma.hbm_to_vmem [thread:$0]  (!%p6509_p6), %s8146_s2, 12288, %s297_s18, [#allocation6], %s6403_s28, %s6403_s28, %s6404_s29  }
  0x30   : > { %p6094_p12 = pnand %p6093_p11, %p6087_p8 }
  0x32   : > { %6097 = shalt.err (!%p6094_p12)
}
  0x33   : > { %s8147_s3 = sld [smem:[#allocation86_spill]]  ;;  %s6109_s18 = scalar_lea.vmem %s6513_s25, 32 }
  0x34   : > { %p6110_p13 = scmp.ne.s32.totalorder %s6513_s25, %s6109_s18  ;;  %p6117_p5 = scmp.lt.s32.totalorder %s6513_s25, %s6513_s25 }
  0x35   : > { %p6118_p9 = scmp.lt.s32.totalorder %s6109_s18, %s6109_s18 }
  0x36   : > { %p6112_p0 = pnand %p6110_p13, %p6517_p7 }
  0x37   : > { %p6119_p8 = por %p6118_p9, %p6117_p5 }
  0x38   : > { %p6113_p2 = pneg %p6112_p0 }
  0x39   : > { %5422 = dma.hbm_to_vmem [thread:$0]  (!%p6509_p6), %s8147_s3, 32, %s311_s22, [#allocation9]  }
  0x3a   : > { %p6120_p10 = pnand %p6119_p8, %p6113_p2 }
  0x3c   : > { %6123 = shalt.err (!%p6120_p10)
}
  0x3d   : > { %s8148_s5 = sld [smem:[#allocation88_spill]]  ;;  %s6405_s22 = smov [#allocation14]  }
  0x3e   : > { %s358_s30 = sshll.u32 %s6405_s22, 4  ;;  %s6406_s11 = smov [#allocation10]   ;;  %s359_s30 = int_to_ptr.vmem [resolvable:$true] %s358_s30 }
  0x3f   : > { %s320_s12 = sshll.u32 %s6406_s11, 4  ;;  %s6135_s17 = scalar_lea.vmem %s359_s30, 32  ;;  %s321_s12 = int_to_ptr.vmem [resolvable:$true] %s320_s12 }
  0x40   : > { %p6136_p11 = scmp.ne.s32.totalorder %s359_s30, %s6135_s17  ;;  %p6143_p0 = scmp.lt.s32.totalorder %s359_s30, %s359_s30 }
  0x41   : > { %p6144_p2 = scmp.lt.s32.totalorder %s6135_s17, %s6135_s17 }
  0x42   : > { %p6138_p12 = pnand %p6136_p11, %p6517_p7 }
  0x43   : > { %5428 = dma.hbm_to_vmem [thread:$0]  (!%p6509_p6), %s8148_s5, 32, %s6513_s25, [#allocation12]  }
  0x44   : > { %p6139_p13 = pneg %p6138_p12  ;;  %p6145_p5 = por %p6144_p2, %p6143_p0 }
  0x46   : > { %p6146_p9 = pnand %p6145_p5, %p6139_p13 }
  0x48   : > { %6149 = shalt.err (!%p6146_p9)
}
  0x49   : > { %s8149_s7 = sld [smem:[#allocation90_spill]]  ;;  %s6161_s25 = scalar_lea.vmem %s321_s12, 4096 }
  0x4a   : > { %p6162_p8 = scmp.ne.s32.totalorder %s321_s12, %s6161_s25  ;;  %p6169_p11 = scmp.lt.s32.totalorder %s321_s12, %s321_s12 }
  0x4b   : > { %p6170_p12 = scmp.lt.s32.totalorder %s6161_s25, %s6161_s25 }
  0x4c   : > { %p6164_p10 = pnand %p6162_p8, %p6517_p7 }
  0x4d   : > { %p6171_p1 = por %p6170_p12, %p6169_p11 }
  0x4e   : > { %p6165_p4 = pneg %p6164_p10 }
  0x4f   : > { %5434 = dma.hbm_to_vmem [thread:$0]  (!%p6509_p6), %s8149_s7, 32, %s359_s30, [#allocation15]  }
  0x50   : > { %p6172_p3 = pnand %p6171_p1, %p6165_p4 }
  0x52   : > { %6175 = shalt.err (!%p6172_p3)
}
  0x53   : > { %s8150_s4 = sld [smem:[#allocation87_spill]]  ;;  %s6407_s22 = smov [#allocation13]  }
  0x54   : > { %s344_s30 = sshll.u32 %s6407_s22, 4  ;;  %s6408_s11 = smov [#allocation16]   ;;  %s345_s30 = int_to_ptr.vmem [resolvable:$true] %s344_s30 }
  0x55   : > { %s368_s17 = sshll.u32 %s6408_s11, 4  ;;  %s6187_s21 = scalar_lea.vmem %s345_s30, 4096  ;;  %s369_s17 = int_to_ptr.vmem [resolvable:$true] %s368_s17 }
  0x56   : > { %p6188_p13 = scmp.ne.s32.totalorder %s345_s30, %s6187_s21  ;;  %p6195_p4 = scmp.lt.s32.totalorder %s345_s30, %s345_s30 }
  0x57   : > { %p6196_p0 = scmp.lt.s32.totalorder %s6187_s21, %s6187_s21 }
  0x58   : > { %p6190_p1 = pnand %p6188_p13, %p6517_p7 }
  0x59   : > { %5425 = dma.hbm_to_vmem [thread:$0]  (!%p6509_p6), %s8150_s4, 4096, %s321_s12, [#allocation9], %s6403_s28, %s6403_s28, %s6404_s29  }
  0x5a   : > { %p6191_p3 = pneg %p6190_p1  ;;  %p6197_p2 = por %p6196_p0, %p6195_p4 }
  0x5c   : > { %p6198_p5 = pnand %p6197_p2, %p6191_p3 }
  0x5e   : > { %6201 = shalt.err (!%p6198_p5)
}
  0x5f   : > { %s8151_s6 = sld [smem:[#allocation89_spill]]  ;;  %s6213_s25 = scalar_lea.vmem %s369_s17, 12288 }
  0x60   : > { %p6214_p9 = scmp.ne.s32.totalorder %s369_s17, %s6213_s25  ;;  %p6221_p11 = scmp.lt.s32.totalorder %s369_s17, %s369_s17 }
  0x61   : > { %p6222_p12 = scmp.lt.s32.totalorder %s6213_s25, %s6213_s25 }
  0x62   : > { %p6216_p8 = pnand %p6214_p9, %p6517_p7 }
  0x63   : > { %p6223_p13 = por %p6222_p12, %p6221_p11 }
  0x64   : > { %p6217_p10 = pneg %p6216_p8 }
  0x65   : > { %5431 = dma.hbm_to_vmem [thread:$0]  (!%p6509_p6), %s8151_s6, 4096, %s345_s30, [#allocation12], %s6403_s28, %s6403_s28, %s6404_s29  }
  0x66   : > { %p6224_p1 = pnand %p6223_p13, %p6217_p10 }
  0x68   : > { %6227 = shalt.err (!%p6224_p1)
}
  0x69   : > { %s8126_s24 = smov 384   ;;  %s8127_s27 = smov 24  }
  0x6a   : > { %s8152_s8 = sld [smem:[#allocation91_spill]]  ;;  %s6411_s22 = smov [#allocation17]  }
  0x6b   : > { %s382_s30 = sshll.u32 %s6411_s22, 4  ;;  %s383_s30 = int_to_ptr.vmem [resolvable:$true] %s382_s30 }
  0x6c   : > { %s6239_s11 = scalar_lea.vmem %s383_s30, 96  ;;  %p6247_p2 = scmp.lt.s32.totalorder %s383_s30, %s383_s30 }
  0x6d   : > { %p6240_p3 = scmp.ne.s32.totalorder %s383_s30, %s6239_s11  ;;  %p6248_p5 = scmp.lt.s32.totalorder %s6239_s11, %s6239_s11 }
  0x6f   : > { %p6242_p4 = pnand %p6240_p3, %p6517_p7  ;;  %p6249_p9 = por %p6248_p5, %p6247_p2 }
  0x70   : > { %5437 = dma.hbm_to_vmem [thread:$0]  (!%p6509_p6), %s8152_s8, 12288, %s369_s17, [#allocation15], %s8126_s24, %s8126_s24, %s8127_s27  }
  0x71   : > { %p6243_p0 = pneg %p6242_p4 }
  0x73   : > { %p6250_p8 = pnand %p6249_p9, %p6243_p0 }
  0x75   : > { %6253 = shalt.err (!%p6250_p8)
}
  0x76   : > { %5440 = dma.hbm_to_vmem [thread:$0]  (!%p6509_p6), %s8122_s9, 96, %s383_s30, [#allocation18]  }
  0x77   : > { %s4986_s26 = sadd.s32 4294967294, %s6398_s16   ;;  %s6596_s23 = sadd.s32 1, %s6398_s16  }
  0x78   : > { %s37_s17 = ssub.s32 %s6398_s16, %s6596_s23  ;;  %s40_s18 = sadd.s32 1, %s6394_s15 }
  0x79   : > { %p38_p7 = scmp.eq.s32.totalorder %s37_s17, 0  ;;  %p47_p10 = scmp.ne.s32.totalorder %s6394_s15, %s6390_s14 }
  0x7a   : > { %p48_p11 = scmp.eq.s32.totalorder %s6398_s16, 0  ;;  %p53_p12 = scmp.ne.s32.totalorder %s6390_s14, %s6386_s13 }
  0x7b   : > { %s6607_s25 = scalar_select %p38_p7, %s6394_s15, %s40_s18  }
  0x7c   : > { %p49_p13 = por %p48_p11, %p47_p10  ;;  %p8153_p1 = scmp.eq.s32.totalorder %s6495_s19, 0 }
  0x7d   : > { %p271_p6 = scmp.eq.s32.totalorder %s6495_s19, 1  ;;  %p277_p4 = scmp.eq.s32.totalorder %s4986_s26, 1 }
  0x7e   : > { %p6611_p3 = por %p8153_p1, %p53_p12  ;;  %p5460_p0 = scmp.lt.s32.totalorder %s6398_s16, 2 }
  0x7f   : > { %s6618_s29 = sand.u32 1, %s6394_s15   ;;  %p6620_p2 = por %p271_p6, %p47_p10 }
  0x80   : > { %p6624_p5 = por %p277_p4, %p53_p12  ;;  %s5373_s11 = smul.u32 768, %s6618_s29 }
  0x81   : > { %s8155_s22 = scalar_select %p6620_p2, 1, 0 }
  0x82   : > { %s8156_s30 = scalar_select %p6624_p5, 1, 0 }
  0x83   : > { %s5374_s21 = smul.u32 12288, %s6398_s16  ;;  %p6630_p9 = pnand %p5460_p0, %p49_p13 }
  0x84   : > { %s8158_s0 = sld [smem:[#allocation84_spill]]  ;;  %s397_s27 = scalar_lea.vmem [#allocation2], %s5373_s11 }
  0x85   : > { %s405_s2 = sshll.u32 %s397_s27, 4  ;;  %s394_s3 = scalar_lea.sflag [#allocation3], %s6618_s29  ;;  %s6640_s2 = int_to_ptr.vmem [resolvable:$true] %s405_s2 }
  0x86   : > { %p6256_p7 = pneg %p6630_p9 }
  0x8a   : > { %s6638_s24 = scalar_lea.hbm %s8158_s0, %s5374_s21  ;;  %s6259_s21 = scalar_lea.hbm %s8158_s0, 24576 }
  0x8b   : > { %s6254_s4 = scalar_lea.hbm %s6638_s24, 12288  ;;  %p6260_p12 = scmp.lt.s32.totalorder %s6638_s24, %s8158_s0 }
  0x8c   : > { %p6255_p8 = scmp.ne.s32.totalorder %s6638_s24, %s6254_s4  ;;  %p6261_p13 = scmp.lt.s32.totalorder %s6259_s21, %s6254_s4 }
  0x8e   : > { %p6257_p10 = pnand %p6256_p7, %p6255_p8  ;;  %p6262_p1 = por %p6261_p13, %p6260_p12 }
  0x90   : > { %p6258_p11 = pneg %p6257_p10 }
  0x92   : > { %p6263_p6 = pnand %p6262_p1, %p6258_p11 }
  0x94   : > { %6266 = shalt.err (!%p6263_p6)
}
  0x95   : > { %s6267_s27 = scalar_lea.vmem %s6640_s2, 12288  ;;  %s6412_s11 = smov [#allocation2]  }
  0x96   : > { %p6268_p4 = scmp.ne.s32.totalorder %s6640_s2, %s6267_s27  ;;  %s6272_s26 = sshll.u32 %s6412_s11, 4  ;;  %s6273_s26 = int_to_ptr.vmem [resolvable:$false] %s6272_s26 }
  0x97   : > { %s6274_s17 = scalar_lea.vmem %s6273_s26, 24576  ;;  %p6275_p10 = scmp.lt.s32.totalorder %s6640_s2, %s6273_s26 }
  0x98   : > { %p6270_p0 = pnand %p6268_p4, %p6256_p7  ;;  %p6276_p5 = scmp.lt.s32.totalorder %s6274_s17, %s6267_s27 }
  0x9a   : > { %p6271_p8 = pneg %p6270_p0  ;;  %p6277_p2 = por %p6276_p5, %p6275_p10 }
  0x9c   : > { %p6278_p12 = pnand %p6277_p2, %p6271_p8 }
  0x9e   : > { %6281 = shalt.err (!%p6278_p12)
}
  0x9f   : > { %s8159_s4 = smov 24   ;;  %s8160_s5 = smov 384  }
  0xa0   : > { %5444 = dma.hbm_to_vmem [thread:$0]  (!%p6630_p9), %s6638_s24, 12288, %s6640_s2, %s394_s3, %s8160_s5, %s8160_s5, %s8159_s4  }
  0xa1   : > { %s5000_s21 = sshll.u32 %s6618_s29, 9  ;;  %s5372_s18 = sshll.u32 %s6398_s16, 13 }
  0xa2   : > { %s6677_s26 = scalar_lea.hbm %s8114_s1, %s5372_s18  ;;  %s419_s17 = scalar_lea.vmem [#allocation5], %s5000_s21 }
  0xa3   : > { %s427_s0 = sshll.u32 %s419_s17, 4  ;;  %s8161_s6 = sand.u32 1, %s6398_s16   ;;  %s6679_s0 = int_to_ptr.vmem [resolvable:$true] %s427_s0 }
  0xa4   : > { %s6683_s7 = scalar_lea.sflag [#allocation6], %s8161_s6  ;;  %s6282_s8 = scalar_lea.hbm %s6677_s26, 8192 }
  0xa5   : > { %p6283_p2 = scmp.ne.s32.totalorder %s6677_s26, %s6282_s8  ;;  %s6287_s24 = scalar_lea.hbm %s8114_s1, 16384 }
  0xa6   : > { %p6288_p13 = scmp.lt.s32.totalorder %s6677_s26, %s8114_s1  ;;  %p6289_p1 = scmp.lt.s32.totalorder %s6287_s24, %s6282_s8 }
  0xa7   : > { %p6285_p5 = pnand %p6283_p2, %p6256_p7 }
  0xa8   : > { %p6290_p6 = por %p6289_p1, %p6288_p13 }
  0xa9   : > { %p6286_p11 = pneg %p6285_p5 }
  0xab   : > { %p6291_p4 = pnand %p6290_p6, %p6286_p11 }
  0xad   : > { %6294 = shalt.err (!%p6291_p4)
}
  0xae   : > { %s6295_s6 = scalar_lea.vmem %s6679_s0, 8192  ;;  %s6413_s5 = smov [#allocation5]  }
  0xaf   : > { %p6296_p0 = scmp.ne.s32.totalorder %s6679_s0, %s6295_s6  ;;  %s6300_s21 = sshll.u32 %s6413_s5, 4  ;;  %s6301_s21 = int_to_ptr.vmem [resolvable:$false] %s6300_s21 }
  0xb0   : > { %s6302_s18 = scalar_lea.vmem %s6301_s21, 16384  ;;  %p6303_p12 = scmp.lt.s32.totalorder %s6679_s0, %s6301_s21 }
  0xb1   : > { %p6298_p8 = pnand %p6296_p0, %p6256_p7  ;;  %p6304_p2 = scmp.lt.s32.totalorder %s6302_s18, %s6295_s6 }
  0xb3   : > { %p6299_p10 = pneg %p6298_p8  ;;  %p6305_p5 = por %p6304_p2, %p6303_p12 }
  0xb5   : > { %p6306_p13 = pnand %p6305_p5, %p6299_p10 }
  0xb7   : > { %6309 = shalt.err (!%p6306_p13)
}
  0xb8   : > { %s6414_s8 = smov 256   ;;  %s6415_s27 = smov 16  }
  0xb9   : > { %5447 = dma.hbm_to_vmem [thread:$0]  (!%p6630_p9), %s6677_s26, 8192, %s6679_s0, %s6683_s7, %s6414_s8, %s6414_s8, %s6415_s27  }
  0xba   : > { %p8162_p7 = scmp.ne.s32.totalorder %s8143_s20, 0 }
  0xbc   : > { %439 = sbr.rel (%p8162_p7) target bundleno = 1491 (0x5d3), region = 60 }
  0xc1   : > { %s6711_s11 = sand.u32 1, %s6390_s14  }
  0xc2   : > { %s5375_s17 = smul.u32 768, %s6711_s11  ;;  %s442_s2 = scalar_lea.sflag [#allocation3], %s6711_s11 }
  0xc4   : > { %s6715_s3 = scalar_lea.vmem [#allocation2], %s5375_s17 }
  0xc5   : > { %6353 = dma.done.wait (%p6611_p3), %s442_s2, 12288  }
  0xc6   : > { %6355 = vsyncadd (%p6611_p3), %s442_s2, 4294955008  ;;  %s450_s0 = sand.u32 1, %s6495_s19   ;;  %s5005_s7 = sshll.u32 %s6711_s11, 9 }
  0xc7   : > { %s451_s20 = scalar_lea.sflag [#allocation6], %s450_s0  ;;  %s6723_s12 = scalar_lea.vmem [#allocation5], %s5005_s7 }
  0xc8   : > { %6357 = dma.done.wait (%p6611_p3), %s451_s20, 8192  }
  0xc9   : > { %6359 = vsyncadd (%p6611_p3), %s451_s20, 4294959104  ;;  %p8163_p9 = scmp.eq.s32.totalorder %s6495_s19, 0 }
  0xcb   : > { %6361 = dma.done.wait (%p8163_p9), [#allocation6], 12288   ;;  %p8164_p11 = pmov %p8163_p9 }
  0xcc   : > { %p8165_p1 = pmov %p8163_p9 }
  0xcd   : > { %6363 = vsyncadd (%p8164_p11), [#allocation6], 4294955008 }
  0xce   : > { %6365 = dma.done.wait (%p8165_p1), [#allocation9], 4128   ;;  %p8166_p6 = pmov %p8165_p1 }
  0xcf   : > { %p8167_p4 = pmov %p8165_p1 }
  0xd0   : > { %6367 = vsyncadd (%p8166_p6), [#allocation9], 4294963168 }
  0xd1   : > { %6369 = dma.done.wait (%p8167_p4), [#allocation12], 4128   ;;  %p8168_p0 = pmov %p8165_p1 }
  0xd3   : > { %6371 = vsyncadd (%p8168_p0), [#allocation12], 4294963168  ;;  %p8169_p3 = pmov %p8168_p0 }
  0xd4   : > { %p8170_p8 = pmov %p8168_p0 }
  0xd5   : > { %6373 = dma.done.wait (%p8169_p3), [#allocation15], 12320  }
  0xd6   : > { %6375 = vsyncadd (%p8170_p8), [#allocation15], 4294954976  ;;  %p8171_p10 = pmov %p8168_p0 }
  0xd7   : > { %p8172_p12 = pmov %p8168_p0 }
  0xd8   : > { %6377 = dma.done.wait (%p8171_p10), [#allocation18], 96  }
  0xd9   : > { %6379 = vsyncadd (%p8172_p12), [#allocation18], 4294967200  ;;  %v5518_v0 = vld [vmem:[#allocation7 + $0x74] ss:$8 sps:$4 sm:$0xff]   ;;  %v5520_v1 = vld [vmem:[#allocation7 + $0x70] ss:$8 sps:$4 sm:$0xff]  }
  0xda   : > { %1695 = vmatprep.subr.bf16.mxu0 %v5518_v0  ;;  %v5521_v2 = vld [vmem:[#allocation7 + $0x174] ss:$8 sps:$4 sm:$0xff]   ;;  %v5523_v3 = vld [vmem:[#allocation7 + $0x170] ss:$8 sps:$4 sm:$0xff]   ;;  %v5524_v4 = vld [vmem:[#allocation7 + $0x64] ss:$8 sps:$4 sm:$0xff]  }
  0xdb   : > { %1696 = vmatpush1.bf16.msra.mxu0 %v5520_v1  ;;  %v5526_v5 = vld [vmem:[#allocation7 + $0x60] ss:$8 sps:$4 sm:$0xff]   ;;  %1888 = vmatprep.subr.bf16.mxu1 %v5521_v2  ;;  %v5527_v6 = vld [vmem:[#allocation7 + $0x164] ss:$8 sps:$4 sm:$0xff]   ;;  %v5530_v8 = vld [vmem:[#allocation7 + $0x54] ss:$8 sps:$4 sm:$0xff]  }
  0xdc   : > { %1889 = vmatpush1.bf16.msra.mxu1 %v5523_v3  ;;  %1697 = vmatprep.subr.bf16.mxu0 %v5524_v4  ;;  %v5529_v7 = vld [vmem:[#allocation7 + $0x160] ss:$8 sps:$4 sm:$0xff]   ;;  %v5532_v9 = vld [vmem:[#allocation7 + $0x50] ss:$8 sps:$4 sm:$0xff]   ;;  %v5533_v10 = vld [vmem:[#allocation7 + $0x154] ss:$8 sps:$4 sm:$0xff]  }
  0xdd   : > { %1890 = vmatprep.subr.bf16.mxu1 %v5527_v6  ;;  %v5536_v11 = vld [vmem:[#allocation7 + $0x44] ss:$8 sps:$4 sm:$0xff]   ;;  %v5535_v12 = vld [vmem:[#allocation7 + $0x150] ss:$8 sps:$4 sm:$0xff]   ;;  %v5538_v14 = vld [vmem:[#allocation7 + $0x40] ss:$8 sps:$4 sm:$0xff]  }
  0xde   : > { %v5539_v13 = vld [vmem:[#allocation7 + $0x144] ss:$8 sps:$4 sm:$0xff]   ;;  %v5542_v15 = vld [vmem:[#allocation7 + $0x34] ss:$8 sps:$4 sm:$0xff]   ;;  %v5541_v16 = vld [vmem:[#allocation7 + $0x140] ss:$8 sps:$4 sm:$0xff]  }
  0xdf   : > { %1698 = vmatpush1.bf16.msra.mxu0 %v5526_v5  ;;  %v5545_v17 = vld [vmem:[#allocation7 + $0x134] ss:$8 sps:$4 sm:$0xff]   ;;  %v5544_v18 = vld [vmem:[#allocation7 + $0x30] ss:$8 sps:$4 sm:$0xff]   ;;  %v5548_v19 = vld [vmem:[#allocation7 + $0x24] ss:$8 sps:$4 sm:$0xff]  }
  0xe0   : > { %1699 = vmatprep.subr.bf16.mxu0 %v5530_v8  ;;  %1891 = vmatpush1.bf16.msra.mxu1 %v5529_v7  ;;  %v5547_v20 = vld [vmem:[#allocation7 + $0x130] ss:$8 sps:$4 sm:$0xff]   ;;  %v5551_v21 = vld [vmem:[#allocation7 + $0x124] ss:$8 sps:$4 sm:$0xff]   ;;  %v5550_v22 = vld [vmem:[#allocation7 + $0x20] ss:$8 sps:$4 sm:$0xff]  }
  0xe1   : > { %1892 = vmatprep.subr.bf16.mxu1 %v5533_v10  ;;  %v5554_v23 = vld [vmem:[#allocation7 + $0x14] ss:$8 sps:$4 sm:$0xff]   ;;  %v5553_v24 = vld [vmem:[#allocation7 + $0x120] ss:$8 sps:$4 sm:$0xff]   ;;  %v5556_v26 = vld [vmem:[#allocation7 + $0x10] ss:$8 sps:$4 sm:$0xff]  }
  0xe2   : > { %v5557_v25 = vld [vmem:[#allocation7 + $0x114] ss:$8 sps:$4 sm:$0xff]   ;;  %v5560_v27 = vld [vmem:[#allocation7 + $0x4] ss:$8 sps:$4 sm:$0xff]   ;;  %v5559_v28 = vld [vmem:[#allocation7 + $0x110] ss:$8 sps:$4 sm:$0xff]  }
  0xe3   : > { %1700 = vmatpush1.bf16.msra.mxu0 %v5532_v9  ;;  %v5563_v29 = vld [vmem:[#allocation7 + $0x104] ss:$8 sps:$4 sm:$0xff]   ;;  %v5562_v30 = vld [vmem:[#allocation7] ss:$8 sps:$4 sm:$0xff]   ;;  %v5566_v31 = vld [vmem:[#allocation7 + $0xf4] ss:$8 sps:$4 sm:$0xff]  }
  0xe4   : > { %1701 = vmatprep.subr.bf16.mxu0 %v5536_v11  ;;  %1893 = vmatpush1.bf16.msra.mxu1 %v5535_v12  ;;  %v5565_v32 = vld [vmem:[#allocation7 + $0x100] ss:$8 sps:$4 sm:$0xff]   ;;  %v5569_v33 = vld [vmem:[#allocation7 + $0x1f4] ss:$8 sps:$4 sm:$0xff]   ;;  %v5568_v34 = vld [vmem:[#allocation7 + $0xf0] ss:$8 sps:$4 sm:$0xff]  }
  0xe5   : > { %1894 = vmatprep.subr.bf16.mxu1 %v5539_v13  ;;  %v5572_v35 = vld [vmem:[#allocation7 + $0xe4] ss:$8 sps:$4 sm:$0xff]   ;;  %v5571_v36 = vld [vmem:[#allocation7 + $0x1f0] ss:$8 sps:$4 sm:$0xff]   ;;  %v5574_v38 = vld [vmem:[#allocation7 + $0xe0] ss:$8 sps:$4 sm:$0xff]  }
  0xe6   : > { %v5575_v37 = vld [vmem:[#allocation7 + $0x1e4] ss:$8 sps:$4 sm:$0xff]   ;;  %v5578_v39 = vld [vmem:[#allocation7 + $0xd4] ss:$8 sps:$4 sm:$0xff]   ;;  %v5577_v40 = vld [vmem:[#allocation7 + $0x1e0] ss:$8 sps:$4 sm:$0xff]  }
  0xe7   : > { %1702 = vmatpush1.bf16.msra.mxu0 %v5538_v14  ;;  %v5581_v41 = vld [vmem:[#allocation7 + $0x1d4] ss:$8 sps:$4 sm:$0xff]   ;;  %v5580_v42 = vld [vmem:[#allocation7 + $0xd0] ss:$8 sps:$4 sm:$0xff]   ;;  %v5584_v43 = vld [vmem:[#allocation7 + $0xc4] ss:$8 sps:$4 sm:$0xff]  }
  0xe8   : > { %1703 = vmatprep.subr.bf16.mxu0 %v5542_v15  ;;  %1895 = vmatpush1.bf16.msra.mxu1 %v5541_v16  ;;  %v5583_v44 = vld [vmem:[#allocation7 + $0x1d0] ss:$8 sps:$4 sm:$0xff]   ;;  %v5587_v45 = vld [vmem:[#allocation7 + $0x1c4] ss:$8 sps:$4 sm:$0xff]   ;;  %v5586_v46 = vld [vmem:[#allocation7 + $0xc0] ss:$8 sps:$4 sm:$0xff]  }
  0xe9   : > { %1896 = vmatprep.subr.bf16.mxu1 %v5545_v17  ;;  %v5615_v47 = vld [vmem:[%s6715_s3 + $0x4] ss:$24 sps:$4 sm:$0xff]   ;;  %v5589_v49 = vld [vmem:[#allocation7 + $0x1c0] ss:$8 sps:$4 sm:$0xff]   ;;  %v5592_v52 = vld [vmem:[#allocation7 + $0xb0] ss:$8 sps:$4 sm:$0xff]  }
  0xea   : > { %v5590_v48 = vld [vmem:[#allocation7 + $0xb4] ss:$8 sps:$4 sm:$0xff]   ;;  %1727 = vmatprep.mubr.bf16.mxu0 %v5615_v47  ;;  %v5622_v51 = vld [vmem:[%s6715_s3 + $0xc] ss:$24 sps:$4 sm:$0xff]   ;;  %v5595_v54 = vld [vmem:[#allocation7 + $0x1b0] ss:$8 sps:$4 sm:$0xff]  }
  0xeb   : > { %1704 = vmatpush1.bf16.msra.mxu0 %v5544_v18  ;;  %v5593_v50 = vld [vmem:[#allocation7 + $0x1b4] ss:$8 sps:$4 sm:$0xff]   ;;  %v5596_v53 = vld [vmem:[#allocation7 + $0xa4] ss:$8 sps:$4 sm:$0xff]   ;;  %1920 = vmatprep.mubr.bf16.mxu1 %v5622_v51  ;;  %v5598_v56 = vld [vmem:[#allocation7 + $0xa0] ss:$8 sps:$4 sm:$0xff]  }
  0xec   : > { %1705 = vmatprep.subr.bf16.mxu0 %v5548_v19  ;;  %1897 = vmatpush1.bf16.msra.mxu1 %v5547_v20  ;;  %v5599_v55 = vld [vmem:[#allocation7 + $0x1a4] ss:$8 sps:$4 sm:$0xff]   ;;  %v5602_v57 = vld [vmem:[#allocation7 + $0x94] ss:$8 sps:$4 sm:$0xff]   ;;  %v5601_v58 = vld [vmem:[#allocation7 + $0x1a0] ss:$8 sps:$4 sm:$0xff]  }
  0xed   : > { %1898 = vmatprep.subr.bf16.mxu1 %v5551_v21  ;;  %v5605_v59 = vld [vmem:[#allocation7 + $0x194] ss:$8 sps:$4 sm:$0xff]   ;;  %v5604_v60 = vld [vmem:[#allocation7 + $0x90] ss:$8 sps:$4 sm:$0xff]   ;;  %v5608_v61 = vld [vmem:[#allocation7 + $0x84] ss:$8 sps:$4 sm:$0xff]  }
  0xee   : > { %v5607_v62 = vld [vmem:[#allocation7 + $0x190] ss:$8 sps:$4 sm:$0xff]   ;;  %v5611_v63 = vld [vmem:[#allocation7 + $0x184] ss:$8 sps:$4 sm:$0xff]   ;;  %v5610_v0 = vld [vmem:[#allocation7 + $0x80] ss:$8 sps:$4 sm:$0xff]  }
  0xef   : > { %1706 = vmatpush1.bf16.msra.mxu0 %v5550_v22  ;;  %v5619_v1 = vld [vmem:[#allocation7 + $0x274] ss:$8 sps:$4 sm:$0xff]   ;;  %v5616_v2 = vld [vmem:[#allocation7 + $0x180] ss:$8 sps:$4 sm:$0xff]   ;;  %v5617_v4 = vld [vmem:[#allocation7 + $0x270] ss:$8 sps:$4 sm:$0xff]  }
  0xf0   : > { %1707 = vmatprep.subr.bf16.mxu0 %v5554_v23  ;;  %1899 = vmatpush1.bf16.msra.mxu1 %v5553_v24  ;;  %v5613_v3 = vld [vmem:[%s6715_s3] ss:$24 sps:$4 sm:$0xff]   ;;  %v5623_v6 = vld [vmem:[%s6715_s3 + $0x34] ss:$24 sps:$4 sm:$0xff]   ;;  %v5625_v11 = vld [vmem:[%s6715_s3 + $0x30] ss:$24 sps:$4 sm:$0xff]  }
  0xf1   : > { %1900 = vmatprep.subr.bf16.mxu1 %v5557_v25  ;;  %v5620_v5 = vld [vmem:[%s6715_s3 + $0x8] ss:$24 sps:$4 sm:$0xff]   ;;  %v5628_v7 = vld [vmem:[#allocation7 + $0x264] ss:$8 sps:$4 sm:$0xff]   ;;  %v5629_v8 = vld [vmem:[%s6715_s3 + $0x3c] ss:$24 sps:$4 sm:$0xff]  }
  0xf2   : > { %v5626_v9 = vld [vmem:[#allocation7 + $0x260] ss:$8 sps:$4 sm:$0xff]   ;;  %v5637_v10 = vld [vmem:[#allocation7 + $0x254] ss:$8 sps:$4 sm:$0xff]   ;;  %v5631_v12 = vld [vmem:[%s6715_s3 + $0x38] ss:$24 sps:$4 sm:$0xff]  }
  0xf3   : > { %1708 = vmatpush1.bf16.msra.mxu0 %v5556_v26  ;;  %v5632_v13 = vld [vmem:[%s6715_s3 + $0x64] ss:$24 sps:$4 sm:$0xff]   ;;  %v5635_v14 = vld [vmem:[#allocation7 + $0x250] ss:$8 sps:$4 sm:$0xff]   ;;  %v5644_v17 = vld [vmem:[#allocation7 + $0x240] ss:$8 sps:$4 sm:$0xff]  }
  0xf4   : > { %1709 = vmatprep.subr.bf16.mxu0 %v5560_v27  ;;  %1901 = vmatpush1.bf16.msra.mxu1 %v5559_v28  ;;  %v5646_v15 = vld [vmem:[#allocation7 + $0x244] ss:$8 sps:$4 sm:$0xff]   ;;  %v5655_v18 = vld [vmem:[#allocation7 + $0x234] ss:$8 sps:$4 sm:$0xff]   ;;  %v5634_v19 = vld [vmem:[%s6715_s3 + $0x60] ss:$24 sps:$4 sm:$0xff]  }
  0xf5   : > { %1902 = vmatprep.subr.bf16.mxu1 %v5563_v29  ;;  %v5638_v16 = vld [vmem:[%s6715_s3 + $0x6c] ss:$24 sps:$4 sm:$0xff]   ;;  %v5640_v20 = vld [vmem:[%s6715_s3 + $0x68] ss:$24 sps:$4 sm:$0xff]   ;;  %v5653_v22 = vld [vmem:[#allocation7 + $0x230] ss:$8 sps:$4 sm:$0xff]  }
  0xf6   : > { %v5641_v21 = vld [vmem:[%s6715_s3 + $0x94] ss:$24 sps:$4 sm:$0xff]   ;;  %v5662_v25 = vld [vmem:[#allocation7 + $0x220] ss:$8 sps:$4 sm:$0xff]   ;;  %v5649_v28 = vld [vmem:[%s6715_s3 + $0x98] ss:$24 sps:$4 sm:$0xff]  }
  0xf7   : > { %1710 = vmatpush1.bf16.msra.mxu0 %v5562_v30  ;;  %v5664_v23 = vld [vmem:[#allocation7 + $0x224] ss:$8 sps:$4 sm:$0xff]   ;;  %v5647_v24 = vld [vmem:[%s6715_s3 + $0x9c] ss:$24 sps:$4 sm:$0xff]   ;;  %v5643_v27 = vld [vmem:[%s6715_s3 + $0x90] ss:$24 sps:$4 sm:$0xff]  }
  0xf8   : > { %1711 = vmatprep.subr.bf16.mxu0 %v5566_v31  ;;  %1903 = vmatpush1.bf16.msra.mxu1 %v5565_v32  ;;  %v5673_v26 = vld [vmem:[#allocation7 + $0x214] ss:$8 sps:$4 sm:$0xff]   ;;  %v5671_v30 = vld [vmem:[#allocation7 + $0x210] ss:$8 sps:$4 sm:$0xff]   ;;  %v5682_v31 = vld [vmem:[#allocation7 + $0x204] ss:$8 sps:$4 sm:$0xff]  }
  0xf9   : > { %1904 = vmatprep.subr.bf16.mxu1 %v5569_v33  ;;  %v5650_v29 = vld [vmem:[%s6715_s3 + $0xc4] ss:$24 sps:$4 sm:$0xff]   ;;  %v5680_v33 = vld [vmem:[#allocation7 + $0x200] ss:$8 sps:$4 sm:$0xff]   ;;  %s5376_s28 = smul.u32 1536, %s6711_s11  ;;  %p8285_p5 = scmp.ne.s32.totalorder %s8155_s22, 0 }
  0xfa   : > { %v5656_v32 = vld [vmem:[%s6715_s3 + $0xcc] ss:$24 sps:$4 sm:$0xff]   ;;  %v5670_v51 = vld [vmem:[%s6715_s3 + $0x120] ss:$24 sps:$4 sm:$0xff]   ;;  %s5377_s24 = smul.u32 24576, %s6495_s19  ;;  %s4800_s19 = scalar_lea.sflag [#allocation4], %s6711_s11 }
  0xfb   : > { %1712 = vmatpush2.bf16.msra.mxu0 %v5568_v34  ;;  %v5691_v34 = vld [vmem:[#allocation7 + $0x2f4] ss:$8 sps:$4 sm:$0xff]   ;;  %v5718_v47 = vld [vmem:[#allocation7 + $0x2c4] ss:$8 sps:$4 sm:$0xff]   ;;  %s7658_s26 = scalar_lea.vmem [#allocation19], %s5376_s28  ;;  %s6416_s18 = smov [#allocation19]  }
  0xfc   : > { %1713 = vmatprep.subr.bf16.mxu0 %v5572_v35  ;;  %1905 = vmatpush2.bf16.msra.mxu1 %v5571_v36  ;;  %v5652_v35 = vld [vmem:[%s6715_s3 + $0xc0] ss:$24 sps:$4 sm:$0xff]   ;;  %s4814_s29 = sshll.u32 %s7658_s26, 4  ;;  %s8065_s5 = scalar_lea.hbm %s8123_s10, %s5377_s24  ;;  %s8067_s29 = int_to_ptr.vmem [resolvable:$true] %s4814_s29 }
  0xfd   : > { %1906 = vmatprep.subr.bf16.mxu1 %v5575_v37  ;;  %v5658_v36 = vld [vmem:[%s6715_s3 + $0xc8] ss:$24 sps:$4 sm:$0xff]   ;;  %v5659_v37 = vld [vmem:[%s6715_s3 + $0xf4] ss:$24 sps:$4 sm:$0xff]   ;;  %s6310_s21 = scalar_lea.vmem %s8067_s29, 24576  ;;  %s6314_s8 = sshll.u32 %s6416_s18, 4  ;;  %s6315_s8 = int_to_ptr.vmem [resolvable:$false] %s6314_s8 }
  0xfe   : > { %p6311_p2 = scmp.ne.s32.totalorder %s8067_s29, %s6310_s21  ;;  %s6316_s27 = scalar_lea.vmem %s6315_s8, 49152 }
  0xff   : > { %1714 = vmatpush2.bf16.msra.mxu0 %v5574_v38  ;;  %v5689_v38 = vld [vmem:[#allocation7 + $0x2f0] ss:$8 sps:$4 sm:$0xff]   ;;  %p6317_p9 = scmp.lt.s32.totalorder %s8067_s29, %s6315_s8  ;;  %p6318_p11 = scmp.lt.s32.totalorder %s6316_s27, %s6310_s21 }
 0x100   : > { %1715 = vmatprep.subr.bf16.mxu0 %v5578_v39  ;;  %1907 = vmatpush2.bf16.msra.mxu1 %v5577_v40  ;;  %v5700_v39 = vld [vmem:[#allocation7 + $0x2e4] ss:$8 sps:$4 sm:$0xff]   ;;  %v5665_v40 = vld [vmem:[%s6715_s3 + $0xfc] ss:$24 sps:$4 sm:$0xff]   ;;  %p6312_p13 = pnand %p6311_p2, %p8285_p5 }
 0x101   : > { %1908 = vmatprep.subr.bf16.mxu1 %v5581_v41  ;;  %v5698_v41 = vld [vmem:[#allocation7 + $0x2e0] ss:$8 sps:$4 sm:$0xff]   ;;  %p6319_p1 = por %p6318_p11, %p6317_p9 }
 0x102   : > { %p6313_p7 = pneg %p6312_p13 }
 0x103   : > { %1716 = vmatpush2.bf16.msra.mxu0 %v5580_v42  ;;  %v5709_v42 = vld [vmem:[#allocation7 + $0x2d4] ss:$8 sps:$4 sm:$0xff]  }
 0x104   : > { %1717 = vmatprep.subr.bf16.mxu0 %v5584_v43  ;;  %1909 = vmatpush2.bf16.msra.mxu1 %v5583_v44  ;;  %v5661_v43 = vld [vmem:[%s6715_s3 + $0xf0] ss:$24 sps:$4 sm:$0xff]   ;;  %p6320_p6 = pnand %p6319_p1, %p6313_p7 }
 0x105   : > { %1910 = vmatprep.subr.bf16.mxu1 %v5587_v45  ;;  %v5667_v44 = vld [vmem:[%s6715_s3 + $0xf8] ss:$24 sps:$4 sm:$0xff]   ;;  %v5668_v45 = vld [vmem:[%s6715_s3 + $0x124] ss:$24 sps:$4 sm:$0xff]  }
 0x107   : > { %1718 = vmatpush2.bf16.msra.mxu0 %v5586_v46  ;;  %v5707_v46 = vld [vmem:[#allocation7 + $0x2d0] ss:$8 sps:$4 sm:$0xff]  }
 0x108   : > { %1719 = vmatprep.subr.bf16.mxu0 %v5590_v48  ;;  %1911 = vmatpush2.bf16.msra.mxu1 %v5589_v49  ;;  %v5674_v48 = vld [vmem:[%s6715_s3 + $0x12c] ss:$24 sps:$4 sm:$0xff]   ;;  %v5716_v49 = vld [vmem:[#allocation7 + $0x2c0] ss:$8 sps:$4 sm:$0xff]  }
 0x109   : > { %1912 = vmatprep.subr.bf16.mxu1 %v5593_v50  ;;  %v5727_v50 = vld [vmem:[#allocation7 + $0x2b4] ss:$8 sps:$4 sm:$0xff]  }
 0x10b   : > { %1720 = vmatpush2.bf16.msra.mxu0 %v5592_v52  ;;  %v5676_v52 = vld [vmem:[%s6715_s3 + $0x128] ss:$24 sps:$4 sm:$0xff]  }
 0x10c   : > { %1721 = vmatprep.subr.bf16.mxu0 %v5596_v53  ;;  %1913 = vmatpush2.bf16.msra.mxu1 %v5595_v54  ;;  %v5677_v53 = vld [vmem:[%s6715_s3 + $0x154] ss:$24 sps:$4 sm:$0xff]   ;;  %v5725_v54 = vld [vmem:[#allocation7 + $0x2b0] ss:$8 sps:$4 sm:$0xff]  }
 0x10d   : > { %1914 = vmatprep.subr.bf16.mxu1 %v5599_v55  ;;  %v5736_v55 = vld [vmem:[#allocation7 + $0x2a4] ss:$8 sps:$4 sm:$0xff]  }
 0x10f   : > { %1722 = vmatpush2.bf16.msra.mxu0 %v5598_v56  ;;  %v5683_v56 = vld [vmem:[%s6715_s3 + $0x15c] ss:$24 sps:$4 sm:$0xff]  }
 0x110   : > { %1723 = vmatprep.subr.bf16.mxu0 %v5602_v57  ;;  %1915 = vmatpush2.bf16.msra.mxu1 %v5601_v58  ;;  %v5734_v57 = vld [vmem:[#allocation7 + $0x2a0] ss:$8 sps:$4 sm:$0xff]  }
 0x111   : > { %1916 = vmatprep.subr.bf16.mxu1 %v5605_v59  ;;  %v5679_v58 = vld [vmem:[%s6715_s3 + $0x150] ss:$24 sps:$4 sm:$0xff]   ;;  %v5745_v59 = vld [vmem:[#allocation7 + $0x294] ss:$8 sps:$4 sm:$0xff]  }
 0x113   : > { %1724 = vmatpush2.bf16.msra.mxu0 %v5604_v60  ;;  %v5686_v60 = vld [vmem:[%s6715_s3 + $0x184] ss:$24 sps:$4 sm:$0xff]  }
 0x114   : > { %1725 = vmatprep.subr.bf16.mxu0 %v5608_v61  ;;  %1917 = vmatpush2.bf16.msra.mxu1 %v5607_v62  ;;  %v5743_v61 = vld [vmem:[#allocation7 + $0x290] ss:$8 sps:$4 sm:$0xff]  }
 0x115   : > { %1918 = vmatprep.subr.bf16.mxu1 %v5611_v63  ;;  %v5685_v62 = vld [vmem:[%s6715_s3 + $0x158] ss:$24 sps:$4 sm:$0xff]   ;;  %v5754_v63 = vld [vmem:[#allocation7 + $0x284] ss:$8 sps:$4 sm:$0xff]  }
 0x117   : > { %1726 = vmatpush2.bf16.msra.mxu0 %v5610_v0  ;;  %v5692_v0 = vld [vmem:[%s6715_s3 + $0x18c] ss:$24 sps:$4 sm:$0xff]  }
 0x118   : > { %2081 = vmatprep.subr.bf16.mxu0 %v5619_v1  ;;  %1919 = vmatpush2.bf16.msra.mxu1 %v5616_v2  ;;  %v5752_v1 = vld [vmem:[#allocation7 + $0x280] ss:$8 sps:$4 sm:$0xff]  }
 0x119   : > { %v5688_v2 = vld [vmem:[%s6715_s3 + $0x180] ss:$24 sps:$4 sm:$0xff]  }
 0x11a   : > { %1728 = vmatmul.mubr.bf16.vlgmr.msra.gmra.mxu0 %v5613_v3  ;;  %v5695_v3 = vld [vmem:[%s6715_s3 + $0x1b4] ss:$24 sps:$4 sm:$0xff]  }
 0x11b   : > { %2082 = vmatpush1.bf16.msra.mxu0 %v5617_v4  ;;  %1737 = vmatprep.mubr.bf16.mxu0 %v5623_v6  ;;  %v5694_v4 = vld [vmem:[%s6715_s3 + $0x188] ss:$24 sps:$4 sm:$0xff]  }
 0x11c   : > { %1921 = vmatmul.mubr.bf16.vlgmr.msra.gmra.mxu1 %v5620_v5  ;;  %2083 = vmatprep.subr.bf16.mxu0 %v5628_v7  ;;  %v5701_v5 = vld [vmem:[%s6715_s3 + $0x1bc] ss:$24 sps:$4 sm:$0xff]   ;;  %v5697_v6 = vld [vmem:[%s6715_s3 + $0x1b0] ss:$24 sps:$4 sm:$0xff]  }
 0x11d   : > { %1930 = vmatprep.mubr.bf16.mxu1 %v5629_v8  ;;  %v5703_v7 = vld [vmem:[%s6715_s3 + $0x1b8] ss:$24 sps:$4 sm:$0xff]   ;;  %v5704_v8 = vld [vmem:[%s6715_s3 + $0x1e4] ss:$24 sps:$4 sm:$0xff]  }
 0x11f   : > { %2084 = vmatpush1.bf16.msra.mxu0 %v5626_v9  ;;  %v5710_v9 = vld [vmem:[%s6715_s3 + $0x1ec] ss:$24 sps:$4 sm:$0xff]  }
 0x120   : > { %2085 = vmatprep.subr.bf16.mxu0 %v5637_v10  ;;  %v5706_v10 = vld [vmem:[%s6715_s3 + $0x1e0] ss:$24 sps:$4 sm:$0xff]  }
 0x122   : > { %1738 = vmatmul.mubr.bf16.gmra.mxu0 %v5625_v11  ;;  %v5712_v11 = vld [vmem:[%s6715_s3 + $0x1e8] ss:$24 sps:$4 sm:$0xff]  }
 0x123   : > { %1747 = vmatprep.mubr.bf16.mxu0 %v5632_v13  ;;  %2086 = vmatpush1.bf16.msra.mxu0 %v5635_v14  ;;  %v5719_v13 = vld [vmem:[%s6715_s3 + $0x21c] ss:$24 sps:$4 sm:$0xff]  }
 0x124   : > { %1931 = vmatmul.mubr.bf16.gmra.mxu1 %v5631_v12  ;;  %2087 = vmatprep.subr.bf16.mxu0 %v5646_v15  ;;  %v5713_v12 = vld [vmem:[%s6715_s3 + $0x214] ss:$24 sps:$4 sm:$0xff]  }
 0x125   : > { %1940 = vmatprep.mubr.bf16.mxu1 %v5638_v16  ;;  %v5788_v14 = vld [vmem:[#allocation10 + $0x70] ss:$8 sps:$4 sm:$0xff]   ;;  %v5790_v15 = vld [vmem:[#allocation10 + $0x74] ss:$8 sps:$4 sm:$0xff]  }
 0x126   : > { %2638 = vmatprep.subr.bf16.mxu1 %v5790_v15  ;;  %v5715_v16 = vld [vmem:[%s6715_s3 + $0x210] ss:$24 sps:$4 sm:$0xff]  }
 0x127   : > { %2088 = vmatpush1.bf16.msra.mxu0 %v5644_v17  ;;  %2639 = vmatpush1.bf16.msra.mxu1 %v5788_v14  ;;  %v5721_v17 = vld [vmem:[%s6715_s3 + $0x218] ss:$24 sps:$4 sm:$0xff]   ;;  %v5785_v14 = vld [vmem:[%s6715_s3 + $0x1c4] ss:$24 sps:$4 sm:$0xff]  }
 0x128   : > { %2089 = vmatprep.subr.bf16.mxu0 %v5655_v18  ;;  %v5722_v18 = vld [vmem:[%s6715_s3 + $0x244] ss:$24 sps:$4 sm:$0xff]  }
 0x129   : > { %v5848_v15 = vld [vmem:[#allocation10 + $0x90] ss:$8 sps:$4 sm:$0xff]  }
 0x12a   : > { %1748 = vmatmul.mubr.bf16.gmra.mxu0 %v5634_v19  ;;  %v5728_v19 = vld [vmem:[%s6715_s3 + $0x24c] ss:$24 sps:$4 sm:$0xff]  }
 0x12b   : > { %1757 = vmatprep.mubr.bf16.mxu0 %v5641_v21  ;;  %2090 = vmatpush1.bf16.msra.mxu0 %v5653_v22  ;;  %v5796_v21 = vld [vmem:[#allocation10 + $0x64] ss:$8 sps:$4 sm:$0xff]   ;;  %v5724_v22 = vld [vmem:[%s6715_s3 + $0x240] ss:$24 sps:$4 sm:$0xff]  }
 0x12c   : > { %1941 = vmatmul.mubr.bf16.gmra.mxu1 %v5640_v20  ;;  %2091 = vmatprep.subr.bf16.mxu0 %v5664_v23  ;;  %v5794_v20 = vld [vmem:[#allocation10 + $0x60] ss:$8 sps:$4 sm:$0xff]  }
 0x12d   : > { %1950 = vmatprep.mubr.bf16.mxu1 %v5647_v24  ;;  %2640 = vmatprep.subr.bf16.mxu1 %v5796_v21  ;;  %v5730_v23 = vld [vmem:[%s6715_s3 + $0x248] ss:$24 sps:$4 sm:$0xff]   ;;  %v5731_v24 = vld [vmem:[%s6715_s3 + $0x274] ss:$24 sps:$4 sm:$0xff]  }
 0x12e   : > { %2641 = vmatpush1.bf16.msra.mxu1 %v5794_v20 }
 0x12f   : > { %2092 = vmatpush1.bf16.msra.mxu0 %v5662_v25  ;;  %v5737_v25 = vld [vmem:[%s6715_s3 + $0x27c] ss:$24 sps:$4 sm:$0xff]  }
 0x130   : > { %2093 = vmatprep.subr.bf16.mxu0 %v5673_v26  ;;  %v5800_v26 = vld [vmem:[#allocation10 + $0x50] ss:$8 sps:$4 sm:$0xff]  }
 0x132   : > { %1758 = vmatmul.mubr.bf16.gmra.mxu0 %v5643_v27  ;;  %v5802_v27 = vld [vmem:[#allocation10 + $0x54] ss:$8 sps:$4 sm:$0xff]  }
 0x133   : > { %1767 = vmatprep.mubr.bf16.mxu0 %v5650_v29  ;;  %2094 = vmatpush1.bf16.msra.mxu0 %v5671_v30  ;;  %v5739_v29 = vld [vmem:[%s6715_s3 + $0x278] ss:$24 sps:$4 sm:$0xff]   ;;  %v5740_v30 = vld [vmem:[%s6715_s3 + $0x2a4] ss:$24 sps:$4 sm:$0xff]  }
 0x134   : > { %1951 = vmatmul.mubr.bf16.gmra.mxu1 %v5649_v28  ;;  %2095 = vmatprep.subr.bf16.mxu0 %v5682_v31  ;;  %v5733_v28 = vld [vmem:[%s6715_s3 + $0x270] ss:$24 sps:$4 sm:$0xff]   ;;  %v5746_v31 = vld [vmem:[%s6715_s3 + $0x2ac] ss:$24 sps:$4 sm:$0xff]  }
 0x135   : > { %1960 = vmatprep.mubr.bf16.mxu1 %v5656_v32  ;;  %2642 = vmatprep.subr.bf16.mxu1 %v5802_v27  ;;  %v5806_v32 = vld [vmem:[#allocation10 + $0x40] ss:$8 sps:$4 sm:$0xff]   ;;  %v5853_v27 = vld [vmem:[#allocation10 + $0x84] ss:$8 sps:$4 sm:$0xff]  }
 0x136   : > { %2643 = vmatpush1.bf16.msra.mxu1 %v5800_v26 }
 0x137   : > { %2096 = vmatpush1.bf16.msra.mxu0 %v5680_v33  ;;  %v5808_v33 = vld [vmem:[#allocation10 + $0x44] ss:$8 sps:$4 sm:$0xff]  }
 0x138   : > { %2097 = vmatprep.subr.bf16.mxu0 %v5691_v34  ;;  %2644 = vmatprep.subr.bf16.mxu1 %v5808_v33  ;;  %v5742_v34 = vld [vmem:[%s6715_s3 + $0x2a0] ss:$24 sps:$4 sm:$0xff]   ;;  %v5797_v33 = vld [vmem:[%s6715_s3 + $0x224] ss:$24 sps:$4 sm:$0xff]  }
 0x13a   : > { %1768 = vmatmul.mubr.bf16.gmra.mxu0 %v5652_v35  ;;  %2645 = vmatpush1.bf16.msra.mxu1 %v5806_v32  ;;  %v5748_v35 = vld [vmem:[%s6715_s3 + $0x2a8] ss:$24 sps:$4 sm:$0xff]  }
 0x13b   : > { %1777 = vmatprep.mubr.bf16.mxu0 %v5659_v37  ;;  %2098 = vmatpush2.bf16.msra.mxu0 %v5689_v38  ;;  %v5755_v37 = vld [vmem:[%s6715_s3 + $0x2dc] ss:$24 sps:$4 sm:$0xff]   ;;  %v5793_v32 = vld [vmem:[%s6715_s3 + $0x1f0] ss:$24 sps:$4 sm:$0xff]  }
 0x13c   : > { %1961 = vmatmul.mubr.bf16.gmra.mxu1 %v5658_v36  ;;  %2099 = vmatprep.subr.bf16.mxu0 %v5700_v39  ;;  %v5749_v36 = vld [vmem:[%s6715_s3 + $0x2d4] ss:$24 sps:$4 sm:$0xff]  }
 0x13d   : > { %1970 = vmatprep.mubr.bf16.mxu1 %v5665_v40  ;;  %v5812_v38 = vld [vmem:[#allocation10 + $0x30] ss:$8 sps:$4 sm:$0xff]   ;;  %v5814_v39 = vld [vmem:[#allocation10 + $0x34] ss:$8 sps:$4 sm:$0xff]  }
 0x13e   : > { %2646 = vmatprep.subr.bf16.mxu1 %v5814_v39  ;;  %v5751_v40 = vld [vmem:[%s6715_s3 + $0x2d0] ss:$24 sps:$4 sm:$0xff]  }
 0x13f   : > { %2100 = vmatpush2.bf16.msra.mxu0 %v5698_v41  ;;  %2647 = vmatpush1.bf16.msra.mxu1 %v5812_v38  ;;  %v5760_v41 = vld [vmem:[%s6715_s3 + $0x14] ss:$24 sps:$4 sm:$0xff]  }
 0x140   : > { %2101 = vmatprep.subr.bf16.mxu0 %v5709_v42  ;;  %v5757_v42 = vld [vmem:[%s6715_s3 + $0x2d8] ss:$24 sps:$4 sm:$0xff]  }
 0x142   : > { %1778 = vmatmul.mubr.bf16.gmra.mxu0 %v5661_v43  ;;  %v5818_v43 = vld [vmem:[#allocation10 + $0x20] ss:$8 sps:$4 sm:$0xff]  }
 0x143   : > { %1787 = vmatprep.mubr.bf16.mxu0 %v5668_v45  ;;  %2102 = vmatpush2.bf16.msra.mxu0 %v5707_v46  ;;  %v5758_v45 = vld [vmem:[%s6715_s3 + $0x10] ss:$24 sps:$4 sm:$0xff]   ;;  %v5761_v46 = vld [vmem:[%s6715_s3 + $0x44] ss:$24 sps:$4 sm:$0xff]  }
 0x144   : > { %1971 = vmatmul.mubr.bf16.gmra.mxu1 %v5667_v44  ;;  %2103 = vmatprep.subr.bf16.mxu0 %v5718_v47  ;;  %v5820_v44 = vld [vmem:[#allocation10 + $0x24] ss:$8 sps:$4 sm:$0xff]   ;;  %v5824_v47 = vld [vmem:[#allocation10 + $0x10] ss:$8 sps:$4 sm:$0xff]  }
 0x145   : > { %1980 = vmatprep.mubr.bf16.mxu1 %v5674_v48  ;;  %2648 = vmatprep.subr.bf16.mxu1 %v5820_v44  ;;  %v5826_v48 = vld [vmem:[#allocation10 + $0x14] ss:$8 sps:$4 sm:$0xff]  }
 0x146   : > { %2649 = vmatpush1.bf16.msra.mxu1 %v5818_v43 }
 0x147   : > { %2104 = vmatpush2.bf16.msra.mxu0 %v5716_v49  ;;  %2650 = vmatprep.subr.bf16.mxu1 %v5826_v48  ;;  %v5763_v49 = vld [vmem:[%s6715_s3 + $0x40] ss:$24 sps:$4 sm:$0xff]   ;;  %v5803_v48 = vld [vmem:[%s6715_s3 + $0x250] ss:$24 sps:$4 sm:$0xff]  }
 0x148   : > { %2105 = vmatprep.subr.bf16.mxu0 %v5727_v50  ;;  %v5764_v50 = vld [vmem:[%s6715_s3 + $0x74] ss:$24 sps:$4 sm:$0xff]  }
 0x14a   : > { %1788 = vmatmul.mubr.bf16.gmra.mxu0 %v5670_v51  ;;  %2651 = vmatpush1.bf16.msra.mxu1 %v5824_v47  ;;  %v5827_v51 = vld [vmem:[#allocation10] ss:$8 sps:$4 sm:$0xff]  }
 0x14b   : > { %1797 = vmatprep.mubr.bf16.mxu0 %v5677_v53  ;;  %2106 = vmatpush2.bf16.msra.mxu0 %v5725_v54  ;;  %v5766_v53 = vld [vmem:[%s6715_s3 + $0x70] ss:$24 sps:$4 sm:$0xff]   ;;  %v5767_v54 = vld [vmem:[%s6715_s3 + $0xa4] ss:$24 sps:$4 sm:$0xff]  }
 0x14c   : > { %1981 = vmatmul.mubr.bf16.gmra.mxu1 %v5676_v52  ;;  %2107 = vmatprep.subr.bf16.mxu0 %v5736_v55  ;;  %v5829_v52 = vld [vmem:[#allocation10 + $0x4] ss:$8 sps:$4 sm:$0xff]   ;;  %v5830_v55 = vld [vmem:[#allocation10 + $0xf0] ss:$8 sps:$4 sm:$0xff]  }
 0x14d   : > { %1990 = vmatprep.mubr.bf16.mxu1 %v5683_v56  ;;  %2652 = vmatprep.subr.bf16.mxu1 %v5829_v52  ;;  %v5832_v56 = vld [vmem:[#allocation10 + $0xf4] ss:$8 sps:$4 sm:$0xff]  }
 0x14e   : > { %2653 = vmatpush1.bf16.msra.mxu1 %v5827_v51 }
 0x14f   : > { %2108 = vmatpush2.bf16.msra.mxu0 %v5734_v57  ;;  %2654 = vmatprep.subr.bf16.mxu1 %v5832_v56  ;;  %v5769_v57 = vld [vmem:[%s6715_s3 + $0xa0] ss:$24 sps:$4 sm:$0xff]  }
 0x150   : > { %2109 = vmatprep.subr.bf16.mxu0 %v5745_v59  ;;  %v5833_v59 = vld [vmem:[#allocation10 + $0xe0] ss:$8 sps:$4 sm:$0xff]  }
 0x151   : > { %v5809_v56 = vld [vmem:[%s6715_s3 + $0x280] ss:$24 sps:$4 sm:$0xff]  }
 0x152   : > { %1798 = vmatmul.mubr.bf16.gmra.mxu0 %v5679_v58  ;;  %2655 = vmatpush2.bf16.msra.mxu1 %v5830_v55  ;;  %v5770_v58 = vld [vmem:[%s6715_s3 + $0xd4] ss:$24 sps:$4 sm:$0xff]  }
 0x153   : > { %1807 = vmatprep.mubr.bf16.mxu0 %v5686_v60  ;;  %2110 = vmatpush2.bf16.msra.mxu0 %v5743_v61  ;;  %v5835_v60 = vld [vmem:[#allocation10 + $0xe4] ss:$8 sps:$4 sm:$0xff]  }
 0x154   : > { %1991 = vmatmul.mubr.bf16.gmra.mxu1 %v5685_v62  ;;  %2111 = vmatprep.subr.bf16.mxu0 %v5754_v63  ;;  %v5772_v61 = vld [vmem:[%s6715_s3 + $0xd0] ss:$24 sps:$4 sm:$0xff]   ;;  %v5773_v62 = vld [vmem:[%s6715_s3 + $0x104] ss:$24 sps:$4 sm:$0xff]  }
 0x155   : > { %2000 = vmatprep.mubr.bf16.mxu1 %v5692_v0  ;;  %2656 = vmatprep.subr.bf16.mxu1 %v5835_v60  ;;  %v5836_v63 = vld [vmem:[#allocation10 + $0xd0] ss:$8 sps:$4 sm:$0xff]   ;;  %v5838_v0 = vld [vmem:[#allocation10 + $0xd4] ss:$8 sps:$4 sm:$0xff]  }
 0x156   : > { %2657 = vmatpush2.bf16.msra.mxu1 %v5833_v59 }
 0x157   : > { %2112 = vmatpush2.bf16.msra.mxu0 %v5752_v1  ;;  %2658 = vmatprep.subr.bf16.mxu1 %v5838_v0  ;;  %v5775_v1 = vld [vmem:[%s6715_s3 + $0x100] ss:$24 sps:$4 sm:$0xff]   ;;  %v5815_v0 = vld [vmem:[%s6715_s3 + $0x2b0] ss:$24 sps:$4 sm:$0xff]  }
 0x15a   : > { %1808 = vmatmul.mubr.bf16.gmra.mxu0 %v5688_v2  ;;  %2659 = vmatpush2.bf16.msra.mxu1 %v5836_v63  ;;  %v5776_v2 = vld [vmem:[%s6715_s3 + $0x134] ss:$24 sps:$4 sm:$0xff]  }
 0x15b   : > { %1817 = vmatprep.mubr.bf16.mxu0 %v5695_v3  ;;  %v5839_v3 = vld [vmem:[#allocation10 + $0xc0] ss:$8 sps:$4 sm:$0xff]  }
 0x15c   : > { %2001 = vmatmul.mubr.bf16.gmra.mxu1 %v5694_v4  ;;  %v5841_v4 = vld [vmem:[#allocation10 + $0xc4] ss:$8 sps:$4 sm:$0xff]  }
 0x15d   : > { %2010 = vmatprep.mubr.bf16.mxu1 %v5701_v5  ;;  %2660 = vmatprep.subr.bf16.mxu1 %v5841_v4  ;;  %v5778_v5 = vld [vmem:[%s6715_s3 + $0x130] ss:$24 sps:$4 sm:$0xff]  }
 0x15e   : > { %2661 = vmatpush2.bf16.msra.mxu1 %v5839_v3 }
 0x162   : > { %1818 = vmatmul.mubr.bf16.gmra.mxu0 %v5697_v6  ;;  %v5779_v6 = vld [vmem:[%s6715_s3 + $0x164] ss:$24 sps:$4 sm:$0xff]  }
 0x163   : > { %1827 = vmatprep.mubr.bf16.mxu0 %v5704_v8  ;;  %v5844_v8 = vld [vmem:[#allocation10 + $0xb4] ss:$8 sps:$4 sm:$0xff]  }
 0x164   : > { %2011 = vmatmul.mubr.bf16.gmra.mxu1 %v5703_v7  ;;  %v5842_v7 = vld [vmem:[#allocation10 + $0xb0] ss:$8 sps:$4 sm:$0xff]   ;;  %2662 = vmatprep.subr.bf16.mxu1 %v5844_v8 }
 0x165   : > { %2020 = vmatprep.mubr.bf16.mxu1 %v5710_v9  ;;  %2663 = vmatpush2.bf16.msra.mxu1 %v5842_v7  ;;  %v5781_v9 = vld [vmem:[%s6715_s3 + $0x160] ss:$24 sps:$4 sm:$0xff]  }
 0x166   : > { %v5821_v8 = vld [vmem:[%s6715_s3 + $0x2e0] ss:$24 sps:$4 sm:$0xff]  }
 0x16a   : > { %1828 = vmatmul.mubr.bf16.gmra.mxu0 %v5706_v10  ;;  %v5782_v10 = vld [vmem:[%s6715_s3 + $0x194] ss:$24 sps:$4 sm:$0xff]  }
 0x16b   : > { %1837 = vmatprep.mubr.bf16.mxu0 %v5713_v12  ;;  %v5847_v12 = vld [vmem:[#allocation10 + $0xa4] ss:$8 sps:$4 sm:$0xff]  }
 0x16c   : > { %2021 = vmatmul.mubr.bf16.gmra.mxu1 %v5712_v11  ;;  %v5845_v11 = vld [vmem:[#allocation10 + $0xa0] ss:$8 sps:$4 sm:$0xff]   ;;  %2664 = vmatprep.subr.bf16.mxu1 %v5847_v12 }
 0x16d   : > { %2030 = vmatprep.mubr.bf16.mxu1 %v5719_v13  ;;  %2665 = vmatpush2.bf16.msra.mxu1 %v5845_v11  ;;  %v5784_v13 = vld [vmem:[%s6715_s3 + $0x190] ss:$24 sps:$4 sm:$0xff]  }
 0x172   : > { %1838 = vmatmul.mubr.bf16.gmra.mxu0 %v5715_v16  ;;  %v5850_v16 = vld [vmem:[#allocation10 + $0x94] ss:$8 sps:$4 sm:$0xff]  }
 0x173   : > { %1847 = vmatprep.mubr.bf16.mxu0 %v5722_v18  ;;  %2666 = vmatprep.subr.bf16.mxu1 %v5850_v16 }
 0x174   : > { %2031 = vmatmul.mubr.bf16.gmra.mxu1 %v5721_v17 }
 0x175   : > { %2040 = vmatprep.mubr.bf16.mxu1 %v5728_v19  ;;  %2667 = vmatpush2.bf16.msra.mxu1 %v5848_v15 }
 0x176   : > { %2668 = vmatprep.subr.bf16.mxu1 %v5853_v27 }
 0x17a   : > { %1848 = vmatmul.mubr.bf16.gmra.mxu0 %v5724_v22  ;;  %v5787_v22 = vld [vmem:[%s6715_s3 + $0x1c0] ss:$24 sps:$4 sm:$0xff]  }
 0x17b   : > { %1857 = vmatprep.mubr.bf16.mxu0 %v5731_v24 }
 0x17c   : > { %2041 = vmatmul.mubr.bf16.gmra.mxu1 %v5730_v23  ;;  %v5791_v23 = vld [vmem:[%s6715_s3 + $0x1f4] ss:$24 sps:$4 sm:$0xff]  }
 0x17d   : > { %2050 = vmatprep.mubr.bf16.mxu1 %v5737_v25 }
 0x182   : > { %1858 = vmatmul.mubr.bf16.gmra.mxu0 %v5733_v28  ;;  %v5851_v28 = vld [vmem:[#allocation10 + $0x80] ss:$8 sps:$4 sm:$0xff]  }
 0x183   : > { %1867 = vmatprep.mubr.bf16.mxu0 %v5740_v30  ;;  %2669 = vmatpush2.bf16.msra.mxu1 %v5851_v28 }
 0x184   : > { %2051 = vmatmul.mubr.bf16.gmra.mxu1 %v5739_v29 }
 0x185   : > { %2060 = vmatprep.mubr.bf16.mxu1 %v5746_v31 }
 0x18a   : > { %1868 = vmatmul.mubr.bf16.gmra.mxu0 %v5742_v34 }
 0x18b   : > { %1877 = vmatprep.mubr.bf16.mxu0 %v5749_v36 }
 0x18c   : > { %2061 = vmatmul.mubr.bf16.gmra.mxu1 %v5748_v35 }
 0x18d   : > { %2070 = vmatprep.mubr.bf16.mxu1 %v5755_v37 }
 0x192   : > { %1878 = vmatmul.mubr.bf16.gmra.mxu0 %v5751_v40  ;;  %v5799_v40 = vld [vmem:[%s6715_s3 + $0x220] ss:$24 sps:$4 sm:$0xff]  }
 0x193   : > { %2113 = vmatprep.mubr.bf16.mxu0 %v5760_v41  ;;  %v5805_v41 = vld [vmem:[%s6715_s3 + $0x254] ss:$24 sps:$4 sm:$0xff]  }
 0x194   : > { %2071 = vmatmul.mubr.bf16.gmra.mxu1 %v5757_v42 }
 0x19a   : > { %2114 = vmatmul.mubr.bf16.vlgmr.msra.gmra.mxu0 %v5758_v45 }
 0x19b   : > { %2123 = vmatprep.mubr.bf16.mxu0 %v5761_v46 }
 0x1a2   : > { %2124 = vmatmul.mubr.bf16.gmra.mxu0 %v5763_v49  ;;  %v5811_v49 = vld [vmem:[%s6715_s3 + $0x284] ss:$24 sps:$4 sm:$0xff]  }
 0x1a3   : > { %2133 = vmatprep.mubr.bf16.mxu0 %v5764_v50 }
 0x1aa   : > { %2134 = vmatmul.mubr.bf16.gmra.mxu0 %v5766_v53 }
 0x1ab   : > { %2143 = vmatprep.mubr.bf16.mxu0 %v5767_v54 }
 0x1b2   : > { %2144 = vmatmul.mubr.bf16.gmra.mxu0 %v5769_v57  ;;  %v5817_v57 = vld [vmem:[%s6715_s3 + $0x2b4] ss:$24 sps:$4 sm:$0xff]  }
 0x1b3   : > { %2153 = vmatprep.mubr.bf16.mxu0 %v5770_v58 }
 0x1ba   : > { %2154 = vmatmul.mubr.bf16.gmra.mxu0 %v5772_v61 }
 0x1bb   : > { %2163 = vmatprep.mubr.bf16.mxu0 %v5773_v62 }
 0x1c2   : > { %2164 = vmatmul.mubr.bf16.gmra.mxu0 %v5775_v1  ;;  %v5823_v1 = vld [vmem:[%s6715_s3 + $0x2e4] ss:$24 sps:$4 sm:$0xff]  }
 0x1c3   : > { %2173 = vmatprep.mubr.bf16.mxu0 %v5776_v2 }
 0x1ca   : > { %2174 = vmatmul.mubr.bf16.gmra.mxu0 %v5778_v5 }
 0x1cb   : > { %2183 = vmatprep.mubr.bf16.mxu0 %v5779_v6 }
 0x1d2   : > { %2184 = vmatmul.mubr.bf16.gmra.mxu0 %v5781_v9 }
 0x1d3   : > { %2193 = vmatprep.mubr.bf16.mxu0 %v5782_v10 }
 0x1da   : > { %v6832_v17 = vpop.f32.mrf.mxu0  ;;  %2194 = vmatmul.mubr.bf16.gmra.mxu0 %v5784_v13 }
 0x1db   : > { %2203 = vmatprep.mubr.bf16.mxu0 %v5785_v14 }
 0x1dc   : > { %v6834_v18 = vpop.f32.mrf.mxu0  ;;  %v6836_v19 = vpop.f32.mrf.mxu1 }
 0x1de   : > { %v6838_v20 = vpop.f32.mrf.mxu0  ;;  %v6840_v21 = vpop.f32.mrf.mxu1 }
 0x1e0   : > { %v6844_v24 = vpop.f32.mrf.mxu0  ;;  %v6846_v25 = vpop.f32.mrf.mxu1 }
 0x1e2   : > { %v6848_v26 = vpop.f32.mrf.mxu0  ;;  %2204 = vmatmul.mubr.bf16.gmra.mxu0 %v5787_v22  ;;  %v6850_v29 = vpop.f32.mrf.mxu1 }
 0x1e3   : > { %2213 = vmatprep.mubr.bf16.mxu0 %v5791_v23 }
 0x1e4   : > { %v6852_v30 = vpop.f32.mrf.mxu0  ;;  %v6858_v34 = vpop.f32.mrf.mxu1 }
 0x1e6   : > { %v6854_v31 = vpop.f32.mrf.mxu0  ;;  %v6864_v37 = vpop.f32.mrf.mxu1 }
 0x1e8   : > { %v6860_v35 = vpop.f32.mrf.mxu0  ;;  %v6872_v42 = vpop.f32.mrf.mxu1 }
 0x1ea   : > { %v6862_v36 = vpop.f32.mrf.mxu0  ;;  %2214 = vmatmul.mubr.bf16.gmra.mxu0 %v5793_v32  ;;  %v6878_v45 = vpop.f32.mrf.mxu1 }
 0x1eb   : > { %2223 = vmatprep.mubr.bf16.mxu0 %v5797_v33 }
 0x1ec   : > { %v6866_v38 = vpop.f32.mrf.mxu0  ;;  %v6886_v50 = vpop.f32.mrf.mxu1 }
 0x1ee   : > { %v6868_v39 = vpop.f32.mrf.mxu0  ;;  %v6892_v53 = vpop.f32.mrf.mxu1 }
 0x1f0   : > { %v6874_v43 = vpop.f32.mrf.mxu0  ;;  %v6900_v58 = vpop.f32.mrf.mxu1 }
 0x1f2   : > { %v6876_v44 = vpop.f32.mrf.mxu0  ;;  %2224 = vmatmul.mubr.bf16.gmra.mxu0 %v5799_v40  ;;  %v6906_v61 = vpop.f32.mrf.mxu1 }
 0x1f3   : > { %2233 = vmatprep.mubr.bf16.mxu0 %v5805_v41 }
 0x1f4   : > { %v6880_v46 = vpop.f32.mrf.mxu0  ;;  %v6914_v2 = vpop.f32.mrf.mxu1 }
 0x1f6   : > { %v6882_v47 = vpop.f32.mrf.mxu0  ;;  %v6920_v5 = vpop.f32.mrf.mxu1 }
 0x1f8   : > { %v6888_v51 = vpop.f32.mrf.mxu0  ;;  %v6927_v9 = vpop.f32.mrf.mxu1 }
 0x1fa   : > { %v6890_v52 = vpop.f32.mrf.mxu0  ;;  %2234 = vmatmul.mubr.bf16.gmra.mxu0 %v5803_v48  ;;  %v6933_v12 = vpop.f32.mrf.mxu1 }
 0x1fb   : > { %2243 = vmatprep.mubr.bf16.mxu0 %v5811_v49 }
 0x1fc   : > { %v6894_v54 = vpop.f32.mrf.mxu0  ;;  %v6939_v15 = vpop.f32.mrf.mxu1 }
 0x1fe   : > { %v6896_v55 = vpop.f32.mrf.mxu0  ;;  %v6945_v23 = vpop.f32.mrf.mxu1 }
 0x200   : > { %v6902_v59 = vpop.f32.mrf.mxu0  ;;  %v6951_v32 = vpop.f32.mrf.mxu1 }
 0x202   : > { %v6904_v60 = vpop.f32.mrf.mxu0  ;;  %2244 = vmatmul.mubr.bf16.gmra.mxu0 %v5809_v56  ;;  %v6957_v41 = vpop.f32.mrf.mxu1 }
 0x203   : > { %2253 = vmatprep.mubr.bf16.mxu0 %v5817_v57 }
 0x204   : > { %v6908_v62 = vpop.f32.mrf.mxu0  ;;  %v6963_v56 = vpop.f32.mrf.mxu1 }
 0x206   : > { %v6910_v63 = vpop.f32.mrf.mxu0 }
 0x208   : > { %v6916_v3 = vpop.f32.mrf.mxu0 }
 0x20a   : > { %v6918_v4 = vpop.f32.mrf.mxu0  ;;  %2254 = vmatmul.mubr.bf16.gmra.mxu0 %v5815_v0 }
 0x20b   : > { %8173 = vst [vmem:[#allocation28_spill] sm:$0xff] %v6918_v4  ;;  %2263 = vmatprep.mubr.bf16.mxu0 %v5823_v1  ;;  %v6969_v1 = vpop.f32.mrf.mxu1 }
 0x20c   : > { %v6922_v6 = vpop.f32.mrf.mxu0 }
 0x20d   : > { %8174 = vst [vmem:[#allocation29_spill] sm:$0xff] %v6922_v6  ;;  %v5869_v6 = vld [vmem:[#allocation13 + $0x20] ss:$8 sps:$4 sm:$0xff]  }
 0x20e   : > { %v6924_v7 = vpop.f32.mrf.mxu0 }
 0x20f   : > { %8175 = vst [vmem:[#allocation30_spill] sm:$0xff] %v6924_v7 }
 0x210   : > { %v6929_v10 = vpop.f32.mrf.mxu0 }
 0x211   : > { %8176 = vst [vmem:[#allocation31_spill] sm:$0xff] %v6929_v10 }
 0x212   : > { %v6931_v11 = vpop.f32.mrf.mxu0  ;;  %2264 = vmatmul.mubr.bf16.gmra.mxu0 %v5821_v8 }
 0x213   : > { %8177 = vst [vmem:[#allocation32_spill] sm:$0xff] %v6931_v11  ;;  %v5857_v11 = vld [vmem:[#allocation13 + $0x60] ss:$8 sps:$4 sm:$0xff]  }
 0x214   : > { %v6935_v13 = vpop.f32.mrf.mxu0 }
 0x215   : > { %8178 = vst [vmem:[#allocation33_spill] sm:$0xff] %v6935_v13 }
 0x216   : > { %v6937_v14 = vpop.f32.mrf.mxu0 }
 0x217   : > { %8179 = vst [vmem:[#allocation34_spill] sm:$0xff] %v6937_v14 }
 0x218   : > { %v6941_v16 = vpop.f32.mrf.mxu0 }
 0x219   : > { %8180 = vst [vmem:[#allocation35_spill] sm:$0xff] %v6941_v16  ;;  %v5854_v16 = vld [vmem:[#allocation13 + $0x70] ss:$8 sps:$4 sm:$0xff]  }
 0x21a   : > { %v6943_v22 = vpop.f32.mrf.mxu0 }
 0x21b   : > { %8181 = vst [vmem:[#allocation36_spill] sm:$0xff] %v6943_v22 }
 0x21c   : > { %v6947_v27 = vpop.f32.mrf.mxu0 }
 0x21d   : > { %8182 = vst [vmem:[#allocation37_spill] sm:$0xff] %v6947_v27 }
 0x21e   : > { %v6949_v28 = vpop.f32.mrf.mxu0 }
 0x21f   : > { %8183 = vst [vmem:[#allocation38_spill] sm:$0xff] %v6949_v28 }
 0x220   : > { %v6953_v33 = vpop.f32.mrf.mxu0 }
 0x221   : > { %8184 = vst [vmem:[#allocation39_spill] sm:$0xff] %v6953_v33  ;;  %v6975_v33 = vpop.f32.mrf.mxu1 }
 0x222   : > { %v6955_v40 = vpop.f32.mrf.mxu0  ;;  %8192 = vst [vmem:[#allocation47_spill] sm:$0xff] %v6975_v33 }
 0x223   : > { %8185 = vst [vmem:[#allocation40_spill] sm:$0xff] %v6955_v40 }
 0x224   : > { %v6959_v48 = vpop.f32.mrf.mxu0 }
 0x225   : > { %8186 = vst [vmem:[#allocation41_spill] sm:$0xff] %v6959_v48  ;;  %v6981_v48 = vpop.f32.mrf.mxu1 }
 0x226   : > { %v6961_v49 = vpop.f32.mrf.mxu0  ;;  %8195 = vst [vmem:[#allocation50_spill] sm:$0xff] %v6981_v48 }
 0x227   : > { %8187 = vst [vmem:[#allocation42_spill] sm:$0xff] %v6961_v49 }
 0x228   : > { %v6965_v57 = vpop.f32.mrf.mxu0 }
 0x229   : > { %8188 = vst [vmem:[#allocation43_spill] sm:$0xff] %v6965_v57  ;;  %v6987_v57 = vpop.f32.mrf.mxu1 }
 0x22a   : > { %v6967_v0 = vpop.f32.mrf.mxu0  ;;  %8198 = vst [vmem:[#allocation53_spill] sm:$0xff] %v6987_v57 }
 0x22b   : > { %8189 = vst [vmem:[#allocation44_spill] sm:$0xff] %v6967_v0 }
 0x22c   : > { %v6971_v8 = vpop.f32.mrf.mxu0 }
 0x22d   : > { %8190 = vst [vmem:[#allocation45_spill] sm:$0xff] %v6971_v8  ;;  %v5856_v8 = vld [vmem:[#allocation13 + $0x74] ss:$8 sps:$4 sm:$0xff]  }
 0x22e   : > { %v6973_v28 = vpop.f32.mrf.mxu0  ;;  %3131 = vmatprep.subr.bf16.mxu0 %v5856_v8 }
 0x22f   : > { %8191 = vst [vmem:[#allocation46_spill] sm:$0xff] %v6973_v28  ;;  %v6993_v28 = vpop.f32.mrf.mxu1  ;;  %3132 = vmatpush1.bf16.msra.mxu0 %v5854_v16 }
 0x230   : > { %v6977_v40 = vpop.f32.mrf.mxu0  ;;  %8201 = vst [vmem:[#allocation56_spill] sm:$0xff] %v6993_v28 }
 0x231   : > { %8193 = vst [vmem:[#allocation48_spill] sm:$0xff] %v6977_v40  ;;  %v6999_v13 = vpop.f32.mrf.mxu1 }
 0x232   : > { %v6979_v27 = vpop.f32.mrf.mxu0  ;;  %8204 = vst [vmem:[#allocation59_spill] sm:$0xff] %v6999_v13  ;;  %v5862_v13 = vld [vmem:[#allocation13 + $0x54] ss:$8 sps:$4 sm:$0xff]  }
 0x233   : > { %8194 = vst [vmem:[#allocation49_spill] sm:$0xff] %v6979_v27  ;;  %v7005_v10 = vpop.f32.mrf.mxu1 }
 0x234   : > { %v6983_v49 = vpop.f32.mrf.mxu0  ;;  %8207 = vst [vmem:[#allocation62_spill] sm:$0xff] %v7005_v10 }
 0x235   : > { %8196 = vst [vmem:[#allocation51_spill] sm:$0xff] %v6983_v49  ;;  %v7011_v16 = vpop.f32.mrf.mxu1 }
 0x236   : > { %v6985_v22 = vpop.f32.mrf.mxu0  ;;  %8210 = vst [vmem:[#allocation65_spill] sm:$0xff] %v7011_v16 }
 0x237   : > { %8197 = vst [vmem:[#allocation52_spill] sm:$0xff] %v6985_v22  ;;  %v7019_v28 = vpop.f32.mrf.mxu1 }
 0x238   : > { %v6989_v0 = vpop.f32.mrf.mxu0  ;;  %8214 = vst [vmem:[#allocation69_spill] sm:$0xff] %v7019_v28 }
 0x239   : > { %8199 = vst [vmem:[#allocation54_spill] sm:$0xff] %v6989_v0  ;;  %v5859_v0 = vld [vmem:[#allocation13 + $0x64] ss:$8 sps:$4 sm:$0xff]  }
 0x23a   : > { %v6991_v14 = vpop.f32.mrf.mxu0  ;;  %3133 = vmatprep.subr.bf16.mxu0 %v5859_v0 }
 0x23b   : > { %8200 = vst [vmem:[#allocation55_spill] sm:$0xff] %v6991_v14  ;;  %3134 = vmatpush1.bf16.msra.mxu0 %v5857_v11 }
 0x23c   : > { %v6995_v40 = vpop.f32.mrf.mxu0  ;;  %3135 = vmatprep.subr.bf16.mxu0 %v5862_v13  ;;  %v5863_v13 = vld [vmem:[#allocation13 + $0x40] ss:$8 sps:$4 sm:$0xff]  }
 0x23d   : > { %8202 = vst [vmem:[#allocation57_spill] sm:$0xff] %v6995_v40  ;;  %v725_v40 = vlaneseq }
 0x23e   : > { %v6997_v27 = vpop.f32.mrf.mxu0 }
 0x23f   : > { %8203 = vst [vmem:[#allocation58_spill] sm:$0xff] %v6997_v27 }
 0x240   : > { %v7001_v49 = vpop.f32.mrf.mxu0 }
 0x241   : > { %8205 = vst [vmem:[#allocation60_spill] sm:$0xff] %v7001_v49  ;;  %v7017_v49 = vshrl.u32 %v725_v40, 7 }
 0x242   : > { %v7003_v22 = vpop.f32.mrf.mxu0 }
 0x243   : > { %8206 = vst [vmem:[#allocation61_spill] sm:$0xff] %v7003_v22  ;;  %8213 = vst [vmem:[#allocation68_spill] sm:$0xff] %v7017_v49  ;;  %v5860_v22 = vld [vmem:[#allocation13 + $0x50] ss:$8 sps:$4 sm:$0xff]   ;;  %v7026_v11 = vsub.s32 0, %v7017_v49  ;;  %v7033_v40 = vsub.s32 1, %v7017_v49 }
 0x244   : > { %v7007_v57 = vpop.f32.mrf.mxu0  ;;  %3136 = vmatpush1.bf16.msra.mxu0 %v5860_v22 }
 0x245   : > { %8208 = vst [vmem:[#allocation63_spill] sm:$0xff] %v7007_v57  ;;  %8217 = vst [vmem:[#allocation72_spill] sm:$0xff] %v7026_v11  ;;  %v7028_v57 = vpop.f32.mrf.mxu1 }
 0x246   : > { %v7009_v8 = vpop.f32.mrf.mxu0  ;;  %8218 = vst [vmem:[#allocation73_spill] sm:$0xff] %v7028_v57  ;;  %8220 = vst [vmem:[#allocation75_spill] sm:$0xff] %v7033_v40 }
 0x247   : > { %8209 = vst [vmem:[#allocation64_spill] sm:$0xff] %v7009_v8  ;;  %v723_v8 = vld [vmem:[#allocation8] sm:$0x3] }
 0x248   : > { %v7013_v27 = vpop.f32.mrf.mxu0  ;;  %v7038_v28 = vrot.slane %v723_v8, %v7026_v11  ;;  %v7045_v16 = vrot.slane %v723_v8, %v7033_v40  ;;  %v5866_v40 = vld [vmem:[#allocation13 + $0x30] ss:$8 sps:$4 sm:$0xff]  }
 0x249   : > { %8211 = vst [vmem:[#allocation66_spill] sm:$0xff] %v7013_v27 }
 0x24a   : > { %v7015_v14 = vpop.f32.mrf.mxu0  ;;  %v1730_v49 = vadd.f32 %v6832_v17, %v7038_v28  ;;  %v5868_v17 = vld [vmem:[#allocation13 + $0x34] ss:$8 sps:$4 sm:$0xff]  }
 0x24b   : > { %8212 = vst [vmem:[#allocation67_spill] sm:$0xff] %v7015_v14 }
 0x24c   : > { %v7021_v10 = vpop.f32.mrf.mxu0 }
 0x24d   : > { %8215 = vst [vmem:[#allocation70_spill] sm:$0xff] %v7021_v10  ;;  %v5865_v10 = vld [vmem:[#allocation13 + $0x44] ss:$8 sps:$4 sm:$0xff]  }
 0x24e   : > { %v7023_v0 = vpop.f32.mrf.mxu0  ;;  %3137 = vmatprep.subr.bf16.mxu0 %v5865_v10  ;;  %v1923_v10 = vadd.f32 %v6836_v19, %v1730_v49  ;;  %v1740_v19 = vadd.f32 %v6848_v26, %v7038_v28  ;;  %v1744_v26 = vadd.f32 %v6854_v31, %v7038_v28 }
 0x24f   : > { %8216 = vst [vmem:[#allocation71_spill] sm:$0xff] %v7023_v0  ;;  %v7040_v0 = vpop.f32.mrf.mxu1  ;;  %3138 = vmatpush1.bf16.msra.mxu0 %v5863_v13  ;;  %v1736_v13 = vadd.f32 %v6844_v24, %v7045_v16  ;;  %v2276_v24 = vld [vmem:[%s6723_s12 + $0x10] sm:$0xff] }
 0x250   : > { %v7030_v27 = vpop.f32.mrf.mxu0  ;;  %8222 = vst [vmem:[#allocation77_spill] sm:$0xff] %v7040_v0  ;;  %3139 = vmatprep.subr.bf16.mxu0 %v5868_v17 }
 0x251   : > { %8219 = vst [vmem:[#allocation74_spill] sm:$0xff] %v7030_v27  ;;  %v1732_v27 = vadd.f32 %v6834_v18, %v7045_v16 }
 0x252   : > { %v7035_v14 = vpop.f32.mrf.mxu0 }
 0x253   : > { %8221 = vst [vmem:[#allocation76_spill] sm:$0xff] %v7035_v14  ;;  %v7051_v14 = vpop.f32.mrf.mxu1  ;;  %v1925_v0 = vadd.f32 %v6840_v21, %v1732_v27  ;;  %3140 = vmatpush1.bf16.msra.mxu0 %v5866_v40  ;;  %v1742_v21 = vadd.f32 %v6852_v30, %v7045_v16  ;;  %v2275_v27 = vld [vmem:[%s6723_s12 + $0x8] sm:$0xff]  ;;  %v1746_v30 = vadd.f32 %v6860_v35, %v7045_v16  ;;  %v2278_v35 = vld [vmem:[%s6723_s12 + $0x20] sm:$0xff] }
 0x254   : > { %v7042_v22 = vpop.f32.mrf.mxu0  ;;  %8225 = vst [vmem:[#allocation80_spill] sm:$0xff] %v7051_v14 }
 0x255   : > { %8223 = vst [vmem:[#allocation78_spill] sm:$0xff] %v7042_v22  ;;  %v1734_v22 = vadd.f32 %v6838_v20, %v7038_v28  ;;  %v2274_v20 = vld [vmem:[%s6723_s12] sm:$0xff] }
 0x256   : > { %v7047_v57 = vpop.f32.mrf.mxu0 }
 0x257   : > { %8224 = vst [vmem:[#allocation79_spill] sm:$0xff] %v7047_v57  ;;  %v7062_v57 = vpop.f32.mrf.mxu1  ;;  %v1927_v18 = vadd.f32 %v6846_v25, %v1734_v22 }
 0x258   : > { %v7053_v11 = vpop.f32.mrf.mxu0  ;;  %8227 = vst [vmem:[#allocation82_spill] sm:$0xff] %v7062_v57  ;;  %v1929_v57 = vadd.f32 %v6850_v29, %v1736_v13  ;;  %v1933_v29 = vadd.f32 %v6858_v34, %v1740_v19  ;;  %v1937_v34 = vadd.f32 %v6872_v42, %v1744_v26  ;;  %v2280_v19 = vld [vmem:[%s6723_s12 + $0x30] sm:$0xff]  ;;  %v1752_v42 = vadd.f32 %v6866_v38, %v7045_v16 }
 0x259   : > { %8226 = vst [vmem:[#allocation81_spill] sm:$0xff] %v7053_v11  ;;  %v5871_v11 = vld [vmem:[#allocation13 + $0x24] ss:$8 sps:$4 sm:$0xff]   ;;  %v7073_v25 = vpop.f32.mrf.mxu1  ;;  %v1756_v38 = vadd.f32 %v6874_v43, %v7045_v16  ;;  %v2282_v43 = vld [vmem:[%s6723_s12 + $0x40] sm:$0xff] }
 0x25a   : > { %v2115_v8 = vpop.f32.mrf.mxu0  ;;  %3141 = vmatprep.subr.bf16.mxu0 %v5871_v11  ;;  %8228 = vst [vmem:[#allocation83_spill] sm:$0xff] %v7073_v25 }
 0x25b   : > { %v2116_v7 = vadd.f32 %v2115_v8, %v1923_v10  ;;  %v2277_v8 = vld [vmem:[%s6723_s12 + $0x18] sm:$0xff]  ;;  %3142 = vmatpush1.bf16.msra.mxu0 %v5869_v6  ;;  %v7082_v25 = vpop.f32.mrf.mxu1 }
 0x25c   : > { %v2117_v14 = vpop.f32.mrf.mxu0  ;;  %v5874_v10 = vld [vmem:[#allocation13 + $0x14] ss:$8 sps:$4 sm:$0xff]  }
 0x25d   : > { %v2118_v48 = vadd.f32 %v2117_v14, %v1925_v0  ;;  %v2338_v17 = vadd.f32 %v2274_v20, %v2116_v7  ;;  %v5872_v0 = vld [vmem:[#allocation13 + $0x10] ss:$8 sps:$4 sm:$0xff]   ;;  %3143 = vmatprep.subr.bf16.mxu0 %v5874_v10  ;;  %v1939_v20 = vadd.f32 %v6878_v45, %v1746_v30  ;;  %v1754_v10 = vadd.f32 %v6868_v39, %v7038_v28 }
 0x25e   : > { %v2119_v49 = vpop.f32.mrf.mxu0 }
 0x25f   : > { %v2120_v4 = vadd.f32 %v2119_v49, %v1927_v18  ;;  %v2339_v11 = vadd.f32 %v2275_v27, %v2118_v48  ;;  %v5877_v49 = vld [vmem:[#allocation13 + $0x4] ss:$8 sps:$4 sm:$0xff]   ;;  %3144 = vmatpush1.bf16.msra.mxu0 %v5872_v0 }
 0x260   : > { %v2121_v22 = vpop.f32.mrf.mxu0  ;;  %3145 = vmatprep.subr.bf16.mxu0 %v5877_v49  ;;  %v1945_v49 = vadd.f32 %v6892_v53, %v1752_v42  ;;  %v5886_v53 = vld [vmem:[#allocation13 + $0xd4] ss:$8 sps:$4 sm:$0xff]  }
 0x261   : > { %v2340_v40 = vadd.f32 %v2276_v24, %v2120_v4  ;;  %v2122_v33 = vadd.f32 %v2121_v22, %v1929_v57  ;;  %v1935_v4 = vadd.f32 %v6864_v37, %v1742_v21  ;;  %v1750_v57 = vadd.f32 %v6862_v36, %v7038_v28  ;;  %v5880_v37 = vld [vmem:[#allocation13 + $0xf4] ss:$8 sps:$4 sm:$0xff]   ;;  %v7093_v21 = vpop.f32.mrf.mxu1  ;;  %v2279_v22 = vld [vmem:[%s6723_s12 + $0x28] sm:$0xff] }
 0x262   : > { %v2125_v14 = vpop.f32.mrf.mxu0 }
 0x263   : > { %v2402_v13 = vpack.c.bf16 %v2340_v40, %v2338_v17  ;;  %v2341_v18 = vadd.f32 %v2277_v8, %v2122_v33  ;;  %v2126_v7 = vadd.f32 %v2125_v14, %v1933_v29  ;;  %v5875_v33 = vld [vmem:[#allocation13] ss:$8 sps:$4 sm:$0xff]   ;;  %v2281_v8 = vld [vmem:[%s6723_s12 + $0x38] sm:$0xff]  ;;  %v1943_v40 = vadd.f32 %v6886_v50, %v1750_v57 }
 0x264   : > { %v2127_v31 = vpop.f32.mrf.mxu0  ;;  %3146 = vmatpush1.bf16.msra.mxu0 %v5875_v33  ;;  %v5878_v14 = vld [vmem:[#allocation13 + $0xf0] ss:$8 sps:$4 sm:$0xff]   ;;  %v1947_v50 = vadd.f32 %v6900_v58, %v1754_v10  ;;  %v5881_v57 = vld [vmem:[#allocation13 + $0xe0] ss:$8 sps:$4 sm:$0xff]   ;;  %v1762_v58 = vadd.f32 %v6880_v46, %v7045_v16  ;;  %v1766_v46 = vadd.f32 %v6888_v51, %v7045_v16 }
 0x265   : > { %v2403_v6 = vpack.c.bf16 %v2341_v18, %v2339_v11  ;;  %v2128_v24 = vadd.f32 %v2127_v31, %v1935_v4  ;;  %v2342_v26 = vadd.f32 %v2278_v35, %v2126_v7  ;;  %3147 = vmatprep.subr.bf16.mxu0 %v5880_v37  ;;  %v7102_v18 = vpop.f32.mrf.mxu1  ;;  %v1949_v35 = vadd.f32 %v6906_v61, %v1756_v38  ;;  %v2286_v51 = vld [vmem:[%s6723_s12 + $0x60] sm:$0xff] }
 0x266   : > { %v2129_v48 = vpop.f32.mrf.mxu0 }
 0x267   : > { %v2130_v27 = vadd.f32 %v2129_v48, %v1937_v34  ;;  %2670 = vmatprep.mubr.bf16.mxu1 %v2403_v6  ;;  %v2343_v0 = vadd.f32 %v2279_v22, %v2128_v24  ;;  %v1760_v34 = vadd.f32 %v6876_v44, %v7038_v28  ;;  %v2284_v6 = vld [vmem:[%s6723_s12 + $0x50] sm:$0xff]  ;;  %v7113_v33 = vpop.f32.mrf.mxu1  ;;  %v2285_v24 = vld [vmem:[%s6723_s12 + $0x58] sm:$0xff] }
 0x268   : > { %v2131_v36 = vpop.f32.mrf.mxu0  ;;  %2671 = vmatmul.mubr.bf16.vlgmr.msra.gmra.mxu1 %v2402_v13  ;;  %v5883_v13 = vld [vmem:[#allocation13 + $0xe4] ss:$8 sps:$4 sm:$0xff]   ;;  %3148 = vmatpush2.bf16.msra.mxu0 %v5878_v14 }
 0x269   : > { %v2344_v17 = vadd.f32 %v2280_v19, %v2130_v27  ;;  %v2132_v45 = vadd.f32 %v2131_v36, %v1939_v20  ;;  %3149 = vmatprep.subr.bf16.mxu0 %v5883_v13  ;;  %v2283_v20 = vld [vmem:[%s6723_s12 + $0x48] sm:$0xff]  ;;  %v1764_v27 = vadd.f32 %v6882_v47, %v7038_v28  ;;  %v1953_v22 = vadd.f32 %v6914_v2, %v1760_v34  ;;  %v2289_v34 = vld [vmem:[%s6723_s12 + $0x78] sm:$0xff] }
 0x26a   : > { %v2135_v29 = vpop.f32.mrf.mxu0  ;;  %v5887_v13 = vld [vmem:[#allocation13 + $0xc0] ss:$8 sps:$4 sm:$0xff]  }
 0x26b   : > { %v2345_v30 = vadd.f32 %v2281_v8, %v2132_v45  ;;  %v2404_v11 = vpack.c.bf16 %v2344_v17, %v2342_v26  ;;  %v2136_v31 = vadd.f32 %v2135_v29, %v1943_v40  ;;  %v5884_v8 = vld [vmem:[#allocation13 + $0xd0] ss:$8 sps:$4 sm:$0xff]   ;;  %v5889_v45 = vld [vmem:[#allocation13 + $0xc4] ss:$8 sps:$4 sm:$0xff]   ;;  %v7122_v40 = vpop.f32.mrf.mxu1  ;;  %v1955_v29 = vadd.f32 %v6920_v5, %v1762_v58  ;;  %v5892_v5 = vld [vmem:[#allocation13 + $0xb4] ss:$8 sps:$4 sm:$0xff]  }
 0x26c   : > { %v2137_v39 = vpop.f32.mrf.mxu0  ;;  %3150 = vmatpush2.bf16.msra.mxu0 %v5881_v57  ;;  %v1957_v2 = vadd.f32 %v6927_v9, %v1764_v27  ;;  %v1772_v9 = vadd.f32 %v6894_v54, %v7045_v16  ;;  %v1776_v54 = vadd.f32 %v6902_v59, %v7045_v16  ;;  %v2290_v59 = vld [vmem:[%s6723_s12 + $0x80] sm:$0xff] }
 0x26d   : > { %v2405_v4 = vpack.c.bf16 %v2345_v30, %v2343_v0  ;;  %v2138_v48 = vadd.f32 %v2137_v39, %v1945_v49  ;;  %v2346_v37 = vadd.f32 %v2282_v43, %v2136_v31  ;;  %3151 = vmatprep.subr.bf16.mxu0 %v5886_v53  ;;  %v1770_v0 = vadd.f32 %v6890_v52, %v7038_v28  ;;  %v7133_v31 = vpop.f32.mrf.mxu1 }
 0x26e   : > { %v2139_v7 = vpop.f32.mrf.mxu0  ;;  %v1959_v39 = vadd.f32 %v6933_v12, %v1766_v46  ;;  %v1774_v43 = vadd.f32 %v6896_v55, %v7038_v28 }
 0x26f   : > { %v2140_v19 = vadd.f32 %v2139_v7, %v1947_v50  ;;  %2680 = vmatprep.mubr.bf16.mxu1 %v2405_v4  ;;  %v2347_v10 = vadd.f32 %v2283_v20, %v2138_v48  ;;  %v2287_v4 = vld [vmem:[%s6723_s12 + $0x68] sm:$0xff]  ;;  %v1963_v57 = vadd.f32 %v6939_v15, %v1770_v0  ;;  %v5890_v48 = vld [vmem:[#allocation13 + $0xb0] ss:$8 sps:$4 sm:$0xff]  }
 0x270   : > { %v2141_v44 = vpop.f32.mrf.mxu0  ;;  %2681 = vmatmul.mubr.bf16.gmra.mxu1 %v2404_v11  ;;  %v2288_v11 = vld [vmem:[%s6723_s12 + $0x70] sm:$0xff]  ;;  %3152 = vmatpush2.bf16.msra.mxu0 %v5884_v8  ;;  %v1967_v15 = vadd.f32 %v6951_v32, %v1774_v43  ;;  %v1969_v8 = vadd.f32 %v6957_v41, %v1776_v54  ;;  %v1782_v32 = vadd.f32 %v6908_v62, %v7045_v16  ;;  %v8231_v43 = vld [vmem:[#allocation50_spill] sm:$0xff] }
 0x271   : > { %v2348_v42 = vadd.f32 %v2284_v6, %v2140_v19  ;;  %v2142_v61 = vadd.f32 %v2141_v44, %v1949_v35  ;;  %3153 = vmatprep.subr.bf16.mxu0 %v5889_v45  ;;  %v5895_v20 = vld [vmem:[#allocation13 + $0xa4] ss:$8 sps:$4 sm:$0xff]   ;;  %v7142_v44 = vpop.f32.mrf.mxu1  ;;  %v2293_v45 = vld [vmem:[%s6723_s12 + $0x98] sm:$0xff]  ;;  %v1786_v62 = vadd.f32 %v6916_v3, %v7045_v16 }
 0x272   : > { %v2145_v36 = vpop.f32.mrf.mxu0  ;;  %v5896_v0 = vld [vmem:[#allocation13 + $0x90] ss:$8 sps:$4 sm:$0xff]  }
 0x273   : > { %v2349_v26 = vadd.f32 %v2285_v24, %v2142_v61  ;;  %v2406_v17 = vpack.c.bf16 %v2348_v42, %v2346_v37  ;;  %v2146_v14 = vadd.f32 %v2145_v36, %v1953_v22  ;;  %v1965_v24 = vadd.f32 %v6945_v23, %v1772_v9  ;;  %v2292_v22 = vld [vmem:[%s6723_s12 + $0x90] sm:$0xff]  ;;  %v5893_v36 = vld [vmem:[#allocation13 + $0xa0] ss:$8 sps:$4 sm:$0xff]   ;;  %v5898_v23 = vld [vmem:[#allocation13 + $0x94] ss:$8 sps:$4 sm:$0xff]  }
 0x274   : > { %v2147_v47 = vpop.f32.mrf.mxu0  ;;  %3154 = vmatpush2.bf16.msra.mxu0 %v5887_v13  ;;  %v1780_v42 = vadd.f32 %v6904_v60, %v7038_v28  ;;  %v8230_v9 = vld [vmem:[#allocation28_spill] sm:$0xff] }
 0x275   : > { %v2407_v38 = vpack.c.bf16 %v2349_v26, %v2347_v10  ;;  %v2148_v49 = vadd.f32 %v2147_v47, %v1955_v29  ;;  %v2350_v7 = vadd.f32 %v2286_v51, %v2146_v14  ;;  %3155 = vmatprep.subr.bf16.mxu0 %v5892_v5  ;;  %v7153_v26 = vpop.f32.mrf.mxu1  ;;  %v1784_v47 = vadd.f32 %v6910_v63, %v7038_v28 }
 0x276   : > { %v2149_v30 = vpop.f32.mrf.mxu0  ;;  %v1973_v14 = vadd.f32 %v6963_v56, %v1780_v42  ;;  %v8235_v42 = vld [vmem:[#allocation31_spill] sm:$0xff] }
 0x277   : > { %v2150_v50 = vadd.f32 %v2149_v30, %v1957_v2  ;;  %2690 = vmatprep.mubr.bf16.mxu1 %v2407_v38  ;;  %v2351_v19 = vadd.f32 %v2287_v4, %v2148_v49  ;;  %v7162_v13 = vpop.f32.mrf.mxu1  ;;  %v8229_v49 = vld [vmem:[#allocation47_spill] sm:$0xff]  ;;  %v1790_v4 = vadd.f32 %v8230_v9, %v7038_v28 }
 0x278   : > { %v2151_v52 = vpop.f32.mrf.mxu0  ;;  %2691 = vmatmul.mubr.bf16.gmra.mxu1 %v2406_v17  ;;  %3156 = vmatpush2.bf16.msra.mxu0 %v5890_v48  ;;  %v2291_v17 = vld [vmem:[%s6723_s12 + $0x88] sm:$0xff]  ;;  %v1977_v56 = vadd.f32 %v8229_v49, %v1784_v47 }
 0x279   : > { %v2352_v6 = vadd.f32 %v2288_v11, %v2150_v50  ;;  %v2152_v12 = vadd.f32 %v2151_v52, %v1959_v39  ;;  %3157 = vmatprep.subr.bf16.mxu0 %v5895_v20  ;;  %v1975_v39 = vadd.f32 %v6969_v1, %v1782_v32  ;;  %v2294_v52 = vld [vmem:[%s6723_s12 + $0xa0] sm:$0xff]  ;;  %v2295_v48 = vld [vmem:[%s6723_s12 + $0xa8] sm:$0xff] }
 0x27a   : > { %v2155_v35 = vpop.f32.mrf.mxu0  ;;  %v8237_v32 = vld [vmem:[#allocation59_spill] sm:$0xff]  ;;  %v8238_v47 = vld [vmem:[#allocation32_spill] sm:$0xff] }
 0x27b   : > { %v2353_v53 = vadd.f32 %v2289_v34, %v2152_v12  ;;  %v2408_v58 = vpack.c.bf16 %v2352_v6, %v2350_v7  ;;  %v2156_v27 = vadd.f32 %v2155_v35, %v1963_v57  ;;  %v2296_v34 = vld [vmem:[%s6723_s12 + $0xb0] sm:$0xff]  ;;  %v1979_v7 = vadd.f32 %v8231_v43, %v1786_v62  ;;  %v7173_v35 = vpop.f32.mrf.mxu1 }
 0x27c   : > { %v2157_v55 = vpop.f32.mrf.mxu0  ;;  %3158 = vmatpush2.bf16.msra.mxu0 %v5893_v36  ;;  %v8232_v57 = vld [vmem:[#allocation29_spill] sm:$0xff] }
 0x27d   : > { %v2409_v37 = vpack.c.bf16 %v2353_v53, %v2351_v19  ;;  %v2158_v46 = vadd.f32 %v2157_v55, %v1965_v24  ;;  %v2354_v29 = vadd.f32 %v2290_v59, %v2156_v27  ;;  %3159 = vmatprep.subr.bf16.mxu0 %v5898_v23  ;;  %v1792_v1 = vadd.f32 %v8232_v57, %v7045_v16  ;;  %v2297_v19 = vld [vmem:[%s6723_s12 + $0xb8] sm:$0xff] }
 0x27e   : > { %v2159_v61 = vpop.f32.mrf.mxu0  ;;  %v8233_v53 = vld [vmem:[#allocation30_spill] sm:$0xff]  ;;  %v1796_v59 = vadd.f32 %v8235_v42, %v7045_v16 }
 0x27f   : > { %v2160_v10 = vadd.f32 %v2159_v61, %v1967_v15  ;;  %2700 = vmatprep.mubr.bf16.mxu1 %v2409_v37  ;;  %v2355_v51 = vadd.f32 %v2291_v17, %v2158_v46  ;;  %v8234_v15 = vld [vmem:[#allocation53_spill] sm:$0xff] }
 0x280   : > { %v2161_v60 = vpop.f32.mrf.mxu0  ;;  %2701 = vmatmul.mubr.bf16.gmra.mxu1 %v2408_v58  ;;  %3160 = vmatpush2.bf16.msra.mxu0 %v5896_v0  ;;  %v1794_v58 = vadd.f32 %v8233_v53, %v7038_v28  ;;  %v1983_v27 = vadd.f32 %v8234_v15, %v1790_v4  ;;  %v8246_v15 = vld [vmem:[#allocation36_spill] sm:$0xff] }
 0x281   : > { %v2356_v2 = vadd.f32 %v2292_v22, %v2160_v10  ;;  %v2162_v41 = vadd.f32 %v2161_v60, %v1969_v8  ;;  %v7182_v8 = vpop.f32.mrf.mxu1  ;;  %v8236_v10 = vld [vmem:[#allocation56_spill] sm:$0xff] }
 0x282   : > { %v2165_v38 = vpop.f32.mrf.mxu0  ;;  %v1985_v23 = vadd.f32 %v8236_v10, %v1792_v1  ;;  %v1987_v17 = vadd.f32 %v8237_v32, %v1794_v58  ;;  %v8245_v58 = vld [vmem:[#allocation73_spill] sm:$0xff] }
 0x283   : > { %v2357_v30 = vadd.f32 %v2293_v45, %v2162_v41  ;;  %v2410_v11 = vpack.c.bf16 %v2356_v2, %v2354_v29  ;;  %v2166_v50 = vadd.f32 %v2165_v38, %v1973_v14  ;;  %v1800_v29 = vadd.f32 %v8238_v47, %v7038_v28  ;;  %v2298_v2 = vld [vmem:[%s6723_s12 + $0xc0] sm:$0xff]  ;;  %v2300_v14 = vld [vmem:[%s6723_s12 + $0xd0] sm:$0xff] }
 0x284   : > { %v2167_v63 = vpop.f32.mrf.mxu0  ;;  %v8239_v38 = vld [vmem:[#allocation62_spill] sm:$0xff]  ;;  %v8248_v10 = vld [vmem:[#allocation37_spill] sm:$0xff] }
 0x285   : > { %v2411_v5 = vpack.c.bf16 %v2357_v30, %v2355_v51  ;;  %v2168_v6 = vadd.f32 %v2167_v63, %v1975_v39  ;;  %v2358_v20 = vadd.f32 %v2294_v52, %v2166_v50  ;;  %v1989_v0 = vadd.f32 %v8239_v38, %v1796_v59  ;;  %v8240_v30 = vld [vmem:[#allocation33_spill] sm:$0xff]  ;;  %v7193_v63 = vpop.f32.mrf.mxu1  ;;  %v2299_v39 = vld [vmem:[%s6723_s12 + $0xc8] sm:$0xff]  ;;  %v8241_v50 = vld [vmem:[#allocation34_spill] sm:$0xff] }
 0x286   : > { %v2169_v3 = vpop.f32.mrf.mxu0  ;;  %v2304_v59 = vld [vmem:[%s6723_s12 + $0xf0] sm:$0xff]  ;;  %v8249_v47 = vld [vmem:[#allocation38_spill] sm:$0xff] }
 0x287   : > { %v2170_v12 = vadd.f32 %v2169_v3, %v1977_v56  ;;  %2710 = vmatprep.mubr.bf16.mxu1 %v2411_v5  ;;  %v2359_v61 = vadd.f32 %v2295_v48, %v2168_v6  ;;  %v2301_v56 = vld [vmem:[%s6723_s12 + $0xd8] sm:$0xff]  ;;  %v1804_v5 = vadd.f32 %v8241_v50, %v7038_v28  ;;  %v7202_v48 = vpop.f32.mrf.mxu1  ;;  %v8250_v38 = vld [vmem:[#allocation80_spill] sm:$0xff] }
 0x288   : > { %v2171_v54 = vpop.f32.mrf.mxu0  ;;  %2711 = vmatmul.mubr.bf16.gmra.mxu1 %v2410_v11  ;;  %v1802_v11 = vadd.f32 %v8240_v30, %v7045_v16  ;;  %v8242_v3 = vld [vmem:[#allocation65_spill] sm:$0xff] }
 0x289   : > { %v2360_v55 = vadd.f32 %v2296_v34, %v2170_v12  ;;  %v2172_v24 = vadd.f32 %v2171_v54, %v1979_v7  ;;  %v1993_v34 = vadd.f32 %v8242_v3, %v1800_v29  ;;  %v8243_v7 = vld [vmem:[#allocation35_spill] sm:$0xff]  ;;  %v7213_v32 = vpop.f32.mrf.mxu1  ;;  %v1814_v29 = vadd.f32 %v8249_v47, %v7038_v28 }
 0x28a   : > { %v2175_v37 = vpop.f32.mrf.mxu0  ;;  %v1806_v6 = vadd.f32 %v8243_v7, %v7045_v16 }
 0x28b   : > { %v2361_v22 = vadd.f32 %v2297_v19, %v2172_v24  ;;  %v2412_v36 = vpack.c.bf16 %v2360_v55, %v2358_v20  ;;  %v2176_v60 = vadd.f32 %v2175_v37, %v1983_v27  ;;  %v8244_v19 = vld [vmem:[#allocation69_spill] sm:$0xff]  ;;  %v1997_v20 = vadd.f32 %v8245_v58, %v1804_v5  ;;  %v2302_v37 = vld [vmem:[%s6723_s12 + $0xe0] sm:$0xff] }
 0x28c   : > { %v2177_v46 = vpop.f32.mrf.mxu0  ;;  %v1995_v53 = vadd.f32 %v8244_v19, %v1802_v11  ;;  %v1810_v27 = vadd.f32 %v8246_v15, %v7038_v28  ;;  %v8252_v5 = vld [vmem:[#allocation82_spill] sm:$0xff] }
 0x28d   : > { %v2413_v45 = vpack.c.bf16 %v2361_v22, %v2359_v61  ;;  %v2178_v62 = vadd.f32 %v2177_v46, %v1985_v23  ;;  %v2362_v9 = vadd.f32 %v2298_v2, %v2176_v60  ;;  %v8247_v61 = vld [vmem:[#allocation77_spill] sm:$0xff]  ;;  %v1812_v23 = vadd.f32 %v8248_v10, %v7045_v16 }
 0x28e   : > { %v2179_v41 = vpop.f32.mrf.mxu0  ;;  %v1999_v22 = vadd.f32 %v8247_v61, %v1806_v6  ;;  %v2306_v6 = vld [vmem:[%s6723_s12 + $0x100] sm:$0xff]  ;;  %v2309_v15 = vld [vmem:[%s6723_s12 + $0x118] sm:$0xff] }
 0x28f   : > { %v2180_v51 = vadd.f32 %v2179_v41, %v1987_v17  ;;  %2720 = vmatprep.mubr.bf16.mxu1 %v2413_v45  ;;  %v2363_v12 = vadd.f32 %v2299_v39, %v2178_v62  ;;  %v2303_v17 = vld [vmem:[%s6723_s12 + $0xe8] sm:$0xff]  ;;  %v2305_v45 = vld [vmem:[%s6723_s12 + $0xf8] sm:$0xff] }
 0x290   : > { %v2181_v49 = vpop.f32.mrf.mxu0  ;;  %2721 = vmatmul.mubr.bf16.gmra.mxu1 %v2412_v36 }
 0x291   : > { %v2364_v4 = vadd.f32 %v2300_v14, %v2180_v51  ;;  %v2182_v52 = vadd.f32 %v2181_v49, %v1989_v0  ;;  %v2003_v0 = vadd.f32 %v8250_v38, %v1810_v27  ;;  %v8251_v51 = vld [vmem:[#allocation39_spill] sm:$0xff]  ;;  %v8256_v27 = vld [vmem:[#allocation42_spill] sm:$0xff] }
 0x292   : > { %v2185_v43 = vpop.f32.mrf.mxu0  ;;  %v1816_v30 = vadd.f32 %v8251_v51, %v7045_v16  ;;  %v2310_v38 = vld [vmem:[%s6723_s12 + $0x120] sm:$0xff] }
 0x293   : > { %v2365_v57 = vadd.f32 %v2301_v56, %v2182_v52  ;;  %v2414_v1 = vpack.c.bf16 %v2364_v4, %v2362_v9  ;;  %v2186_v55 = vadd.f32 %v2185_v43, %v1993_v34  ;;  %v7222_v56 = vpop.f32.mrf.mxu1  ;;  %v2005_v9 = vadd.f32 %v8252_v5, %v1812_v23  ;;  %v8253_v4 = vld [vmem:[#allocation83_spill] sm:$0xff]  ;;  %v8254_v43 = vld [vmem:[#allocation40_spill] sm:$0xff]  ;;  %v2313_v5 = vld [vmem:[%s6723_s12 + $0x138] sm:$0xff] }
 0x294   : > { %v2187_v54 = vpop.f32.mrf.mxu0  ;;  %v2007_v52 = vadd.f32 %v8253_v4, %v1814_v29  ;;  %v1820_v7 = vadd.f32 %v8254_v43, %v7038_v28 }
 0x295   : > { %v2415_v24 = vpack.c.bf16 %v2365_v57, %v2363_v12  ;;  %v2188_v36 = vadd.f32 %v2187_v54, %v1995_v53  ;;  %v2366_v2 = vadd.f32 %v2302_v37, %v2186_v55  ;;  %v2308_v57 = vld [vmem:[%s6723_s12 + $0x110] sm:$0xff]  ;;  %v2307_v55 = vld [vmem:[%s6723_s12 + $0x108] sm:$0xff]  ;;  %v1824_v37 = vadd.f32 %v8256_v27, %v7038_v28  ;;  %v2314_v27 = vld [vmem:[%s6723_s12 + $0x140] sm:$0xff] }
 0x296   : > { %v2189_v42 = vpop.f32.mrf.mxu0  ;;  %v8255_v53 = vld [vmem:[#allocation41_spill] sm:$0xff] }
 0x297   : > { %v2190_v46 = vadd.f32 %v2189_v42, %v1997_v20  ;;  %2730 = vmatprep.mubr.bf16.mxu1 %v2415_v24  ;;  %v2367_v11 = vadd.f32 %v2303_v17, %v2188_v36  ;;  %v1822_v58 = vadd.f32 %v8255_v53, %v7045_v16  ;;  %v7233_v20 = vpop.f32.mrf.mxu1  ;;  %v8257_v36 = vld [vmem:[#allocation43_spill] sm:$0xff]  ;;  %v2017_v29 = vadd.f32 %v7113_v33, %v1824_v37 }
 0x298   : > { %v2191_v60 = vpop.f32.mrf.mxu0  ;;  %2731 = vmatmul.mubr.bf16.gmra.mxu1 %v2414_v1  ;;  %v2009_v1 = vadd.f32 %v7082_v25, %v1816_v30  ;;  %v2013_v25 = vadd.f32 %v7093_v21, %v1820_v7  ;;  %v8258_v21 = vld [vmem:[#allocation44_spill] sm:$0xff] }
 0x299   : > { %v2368_v41 = vadd.f32 %v2304_v59, %v2190_v46  ;;  %v2192_v14 = vadd.f32 %v2191_v60, %v1999_v22  ;;  %v1826_v46 = vadd.f32 %v8257_v36, %v7045_v16  ;;  %v7242_v60 = vpop.f32.mrf.mxu1  ;;  %v2015_v47 = vadd.f32 %v7102_v18, %v1822_v58  ;;  %v8261_v7 = vld [vmem:[#allocation48_spill] sm:$0xff] }
 0x29a   : > { %v2195_v62 = vpop.f32.mrf.mxu0 }
 0x29b   : > { %v2369_v39 = vadd.f32 %v2305_v45, %v2192_v14  ;;  %v2416_v49 = vpack.c.bf16 %v2368_v41, %v2366_v2  ;;  %v2196_v3 = vadd.f32 %v2195_v62, %v2003_v0  ;;  %v1830_v14 = vadd.f32 %v8258_v21, %v7038_v28  ;;  %v2312_v62 = vld [vmem:[%s6723_s12 + $0x130] sm:$0xff]  ;;  %v7253_v18 = vpop.f32.mrf.mxu1 }
 0x29c   : > { %v2197_v50 = vpop.f32.mrf.mxu0  ;;  %v2019_v51 = vadd.f32 %v7122_v40, %v1826_v46  ;;  %v2315_v46 = vld [vmem:[%s6723_s12 + $0x148] sm:$0xff] }
 0x29d   : > { %v2417_v34 = vpack.c.bf16 %v2369_v39, %v2367_v11  ;;  %v2198_v54 = vadd.f32 %v2197_v50, %v2005_v9  ;;  %v2370_v42 = vadd.f32 %v2306_v6, %v2196_v3  ;;  %v8259_v39 = vld [vmem:[#allocation45_spill] sm:$0xff]  ;;  %v2311_v50 = vld [vmem:[%s6723_s12 + $0x128] sm:$0xff]  ;;  %v8260_v9 = vld [vmem:[#allocation46_spill] sm:$0xff]  ;;  %v2023_v40 = vadd.f32 %v7133_v31, %v1830_v14 }
 0x29e   : > { %v2199_v12 = vpop.f32.mrf.mxu0  ;;  %v1834_v4 = vadd.f32 %v8260_v9, %v7038_v28  ;;  %v1836_v6 = vadd.f32 %v8261_v7, %v7045_v16  ;;  %v8262_v31 = vld [vmem:[#allocation49_spill] sm:$0xff]  ;;  %v8265_v14 = vld [vmem:[#allocation54_spill] sm:$0xff] }
 0x29f   : > { %v2200_v19 = vadd.f32 %v2199_v12, %v2007_v52  ;;  %2740 = vmatprep.mubr.bf16.mxu1 %v2417_v34  ;;  %v2371_v10 = vadd.f32 %v2307_v55, %v2198_v54  ;;  %v7262_v54 = vpop.f32.mrf.mxu1  ;;  %v2318_v9 = vld [vmem:[%s6723_s12 + $0x160] sm:$0xff] }
 0x2a0   : > { %v2201_v24 = vpop.f32.mrf.mxu0  ;;  %2741 = vmatmul.mubr.bf16.gmra.mxu1 %v2416_v49  ;;  %v1832_v49 = vadd.f32 %v8259_v39, %v7045_v16  ;;  %v2027_v58 = vadd.f32 %v7153_v26, %v1834_v4 }
 0x2a1   : > { %v2372_v59 = vadd.f32 %v2308_v57, %v2200_v19  ;;  %v2202_v61 = vadd.f32 %v2201_v24, %v2009_v1 }
 0x2a2   : > { %v2205_v22 = vpop.f32.mrf.mxu0  ;;  %v2025_v53 = vadd.f32 %v7142_v44, %v1832_v49  ;;  %v7273_v44 = vpop.f32.mrf.mxu1 }
 0x2a3   : > { %v2373_v23 = vadd.f32 %v2309_v15, %v2202_v61  ;;  %v2418_v17 = vpack.c.bf16 %v2372_v59, %v2370_v42  ;;  %v2206_v2 = vadd.f32 %v2205_v22, %v2013_v25  ;;  %v1840_v15 = vadd.f32 %v8262_v31, %v7038_v28  ;;  %v2316_v42 = vld [vmem:[%s6723_s12 + $0x150] sm:$0xff]  ;;  %v8263_v22 = vld [vmem:[#allocation51_spill] sm:$0xff] }
 0x2a4   : > { %v2207_v45 = vpop.f32.mrf.mxu0  ;;  %v2029_v59 = vadd.f32 %v7162_v13, %v1836_v6  ;;  %v1842_v36 = vadd.f32 %v8263_v22, %v7045_v16  ;;  %v5899_v13 = vld [vmem:[#allocation13 + $0x80] ss:$8 sps:$4 sm:$0xff]  }
 0x2a5   : > { %v2419_v41 = vpack.c.bf16 %v2373_v23, %v2371_v10  ;;  %v2208_v30 = vadd.f32 %v2207_v45, %v2015_v47  ;;  %v2374_v52 = vadd.f32 %v2310_v38, %v2206_v2  ;;  %v2317_v10 = vld [vmem:[%s6723_s12 + $0x158] sm:$0xff]  ;;  %v5901_v23 = vld [vmem:[#allocation13 + $0x84] ss:$8 sps:$4 sm:$0xff]   ;;  %v1846_v38 = vadd.f32 %v8265_v14, %v7045_v16 }
 0x2a6   : > { %v2209_v0 = vpop.f32.mrf.mxu0  ;;  %3161 = vmatprep.subr.bf16.mxu0 %v5901_v23  ;;  %v2035_v39 = vadd.f32 %v7182_v8, %v1842_v36  ;;  %v2319_v6 = vld [vmem:[%s6723_s12 + $0x168] sm:$0xff]  ;;  %v2324_v23 = vld [vmem:[%s6723_s12 + $0x190] sm:$0xff] }
 0x2a7   : > { %v2210_v11 = vadd.f32 %v2209_v0, %v2017_v29  ;;  %2750 = vmatprep.mubr.bf16.mxu1 %v2419_v41  ;;  %v2375_v12 = vadd.f32 %v2311_v50, %v2208_v30  ;;  %v2033_v41 = vadd.f32 %v7173_v35, %v1840_v15  ;;  %3162 = vmatpush2.bf16.msra.mxu0 %v5899_v13  ;;  %v7282_v30 = vpop.f32.mrf.mxu1  ;;  %v2323_v13 = vld [vmem:[%s6723_s12 + $0x188] sm:$0xff] }
 0x2a8   : > { %v2211_v33 = vpop.f32.mrf.mxu0  ;;  %2751 = vmatmul.mubr.bf16.gmra.mxu1 %v2418_v17  ;;  %v8264_v17 = vld [vmem:[#allocation52_spill] sm:$0xff] }
 0x2a9   : > { %v2376_v3 = vadd.f32 %v2312_v62, %v2210_v11  ;;  %v2212_v34 = vadd.f32 %v2211_v33, %v2019_v51  ;;  %v1844_v45 = vadd.f32 %v8264_v17, %v7038_v28  ;;  %v8266_v33 = vld [vmem:[#allocation55_spill] sm:$0xff]  ;;  %v7293_v8 = vpop.f32.mrf.mxu1 }
 0x2aa   : > { %v2215_v43 = vpop.f32.mrf.mxu0 }
 0x2ab   : > { %v2377_v57 = vadd.f32 %v2313_v5, %v2212_v34  ;;  %v2420_v1 = vpack.c.bf16 %v2376_v3, %v2374_v52  ;;  %v2216_v55 = vadd.f32 %v2215_v43, %v2023_v40  ;;  %v2037_v49 = vadd.f32 %v7193_v63, %v1844_v45  ;;  %v2320_v52 = vld [vmem:[%s6723_s12 + $0x170] sm:$0xff] }
 0x2ac   : > { %v2217_v19 = vpop.f32.mrf.mxu0  ;;  %v1850_v5 = vadd.f32 %v8266_v33, %v7038_v28  ;;  %v2039_v3 = vadd.f32 %v7202_v48, %v1846_v38  ;;  %v8267_v43 = vld [vmem:[#allocation57_spill] sm:$0xff] }
 0x2ad   : > { %v2421_v24 = vpack.c.bf16 %v2377_v57, %v2375_v12  ;;  %v2218_v61 = vadd.f32 %v2217_v19, %v2025_v53  ;;  %v2378_v47 = vadd.f32 %v2314_v27, %v2216_v55  ;;  %v1852_v7 = vadd.f32 %v8267_v43, %v7045_v16  ;;  %v2321_v12 = vld [vmem:[%s6723_s12 + $0x178] sm:$0xff] }
 0x2ae   : > { %v2219_v37 = vpop.f32.mrf.mxu0  ;;  %v8268_v57 = vld [vmem:[#allocation58_spill] sm:$0xff]  ;;  %v2043_v48 = vadd.f32 %v7213_v32, %v1850_v5 }
 0x2af   : > { %v2220_v25 = vadd.f32 %v2219_v37, %v2027_v58  ;;  %2760 = vmatprep.mubr.bf16.mxu1 %v2421_v24  ;;  %v2379_v0 = vadd.f32 %v2315_v46, %v2218_v61  ;;  %v8269_v24 = vld [vmem:[#allocation60_spill] sm:$0xff]  ;;  %v2045_v61 = vadd.f32 %v7222_v56, %v1852_v7  ;;  %v8270_v46 = vld [vmem:[#allocation61_spill] sm:$0xff] }
 0x2b0   : > { %v2221_v26 = vpop.f32.mrf.mxu0  ;;  %2761 = vmatmul.mubr.bf16.gmra.mxu1 %v2420_v1  ;;  %v1854_v1 = vadd.f32 %v8268_v57, %v7038_v28  ;;  %v1856_v31 = vadd.f32 %v8269_v24, %v7045_v16  ;;  %v1860_v32 = vadd.f32 %v8270_v46, %v7038_v28  ;;  %v2328_v7 = vld [vmem:[%s6723_s12 + $0x1b0] sm:$0xff]  ;;  %v8275_v57 = vld [vmem:[#allocation70_spill] sm:$0xff] }
 0x2b1   : > { %v2380_v29 = vadd.f32 %v2316_v42, %v2220_v25  ;;  %v2222_v2 = vadd.f32 %v2221_v26, %v2029_v59  ;;  %v2064_v42 = vpop.f32.mrf.mxu1  ;;  %v2322_v26 = vld [vmem:[%s6723_s12 + $0x180] sm:$0xff] }
 0x2b2   : > { %v2225_v21 = vpop.f32.mrf.mxu0  ;;  %v2047_v25 = vadd.f32 %v7233_v20, %v1854_v1  ;;  %v2049_v17 = vadd.f32 %v7242_v60, %v1856_v31  ;;  %v2325_v20 = vld [vmem:[%s6723_s12 + $0x198] sm:$0xff]  ;;  %v2053_v60 = vadd.f32 %v7253_v18, %v1860_v32  ;;  %v1872_v1 = vadd.f32 %v8275_v57, %v7045_v16 }
 0x2b3   : > { %v2381_v62 = vadd.f32 %v2317_v10, %v2222_v2  ;;  %v2422_v51 = vpack.c.bf16 %v2380_v29, %v2378_v47  ;;  %v2226_v35 = vadd.f32 %v2225_v21, %v2033_v41  ;;  %v8271_v29 = vld [vmem:[#allocation63_spill] sm:$0xff]  ;;  %v2066_v56 = vpop.f32.mrf.mxu1  ;;  %v8272_v21 = vld [vmem:[#allocation64_spill] sm:$0xff]  ;;  %v2337_v57 = vld [vmem:[%s6723_s12 + $0x1f8] sm:$0xff] }
 0x2b4   : > { %v2227_v11 = vpop.f32.mrf.mxu0  ;;  %v1862_v2 = vadd.f32 %v8271_v29, %v7045_v16  ;;  %v1864_v14 = vadd.f32 %v8272_v21, %v7038_v28  ;;  %v2065_v46 = vadd.f32 %v2064_v42, %v1872_v1 }
 0x2b5   : > { %v2423_v50 = vpack.c.bf16 %v2381_v62, %v2379_v0  ;;  %v2228_v34 = vadd.f32 %v2227_v11, %v2035_v39  ;;  %v2382_v19 = vadd.f32 %v2318_v9, %v2226_v35  ;;  %v8273_v11 = vld [vmem:[#allocation66_spill] sm:$0xff]  ;;  %v2068_v33 = vpop.f32.mrf.mxu1 }
 0x2b6   : > { %v2229_v4 = vpop.f32.mrf.mxu0  ;;  %v1866_v39 = vadd.f32 %v8273_v11, %v7045_v16  ;;  %v2055_v9 = vadd.f32 %v7262_v54, %v1862_v2 }
 0x2b7   : > { %v2230_v40 = vadd.f32 %v2229_v4, %v2037_v49  ;;  %2770 = vmatprep.mubr.bf16.mxu1 %v2423_v50  ;;  %v2383_v15 = vadd.f32 %v2319_v6, %v2228_v34  ;;  %v2057_v4 = vadd.f32 %v7273_v44, %v1864_v14  ;;  %v8274_v34 = vld [vmem:[#allocation67_spill] sm:$0xff]  ;;  %v2072_v54 = vpop.f32.mrf.mxu1  ;;  %v2329_v44 = vld [vmem:[%s6723_s12 + $0x1b8] sm:$0xff] }
 0x2b8   : > { %v2231_v63 = vpop.f32.mrf.mxu0  ;;  %2771 = vmatmul.mubr.bf16.gmra.mxu1 %v2422_v51  ;;  %v1870_v18 = vadd.f32 %v8274_v34, %v7038_v28  ;;  %v2059_v6 = vadd.f32 %v7282_v30, %v1866_v39  ;;  %v2331_v14 = vld [vmem:[%s6723_s12 + $0x1c8] sm:$0xff] }
 0x2b9   : > { %v2384_v53 = vadd.f32 %v2320_v52, %v2230_v40  ;;  %v2232_v58 = vadd.f32 %v2231_v63, %v2039_v3  ;;  %v2326_v40 = vld [vmem:[%s6723_s12 + $0x1a0] sm:$0xff] }
 0x2ba   : > { %v2235_v55 = vpop.f32.mrf.mxu0  ;;  %v2063_v30 = vadd.f32 %v7293_v8, %v1870_v18  ;;  %v2334_v18 = vld [vmem:[%s6723_s12 + $0x1e0] sm:$0xff] }
 0x2bb   : > { %v2385_v27 = vadd.f32 %v2321_v12, %v2232_v58  ;;  %v2424_v37 = vpack.c.bf16 %v2384_v53, %v2382_v19  ;;  %v2236_v22 = vadd.f32 %v2235_v55, %v2043_v48  ;;  %v2327_v19 = vld [vmem:[%s6723_s12 + $0x1a8] sm:$0xff] }
 0x2bc   : > { %v2237_v59 = vpop.f32.mrf.mxu0  ;;  %v8276_v58 = vld [vmem:[#allocation71_spill] sm:$0xff] }
 0x2bd   : > { %v2425_v36 = vpack.c.bf16 %v2385_v27, %v2383_v15  ;;  %v2238_v45 = vadd.f32 %v2237_v59, %v2045_v61  ;;  %v2386_v38 = vadd.f32 %v2322_v26, %v2236_v22  ;;  %v1874_v48 = vadd.f32 %v8276_v58, %v7038_v28  ;;  %v8277_v27 = vld [vmem:[#allocation74_spill] sm:$0xff]  ;;  %v2074_v22 = vpop.f32.mrf.mxu1 }
 0x2be   : > { %v2239_v10 = vpop.f32.mrf.mxu0 }
 0x2bf   : > { %v2240_v47 = vadd.f32 %v2239_v10, %v2047_v25  ;;  %2780 = vmatprep.mubr.bf16.mxu1 %v2425_v36  ;;  %v2387_v49 = vadd.f32 %v2323_v13, %v2238_v45  ;;  %v2067_v32 = vadd.f32 %v2066_v56, %v1874_v48  ;;  %v2330_v45 = vld [vmem:[%s6723_s12 + $0x1c0] sm:$0xff]  ;;  %v2076_v21 = vpop.f32.mrf.mxu1 }
 0x2c0   : > { %v2241_v41 = vpop.f32.mrf.mxu0  ;;  %2781 = vmatmul.mubr.bf16.gmra.mxu1 %v2424_v37  ;;  %v1876_v37 = vadd.f32 %v8277_v27, %v7045_v16  ;;  %v8280_v56 = vld [vmem:[#allocation79_spill] sm:$0xff]  ;;  %v5910_v27 = vld [vmem:[#allocation16 + $0xf4] ss:$24 sps:$4 sm:$0xff]  }
 0x2c1   : > { %v2388_v0 = vadd.f32 %v2324_v23, %v2240_v47  ;;  %v2242_v62 = vadd.f32 %v2241_v41, %v2049_v17  ;;  %v8278_v23 = vld [vmem:[#allocation76_spill] sm:$0xff]  ;;  %v8279_v41 = vld [vmem:[#allocation78_spill] sm:$0xff] }
 0x2c2   : > { %v2245_v51 = vpop.f32.mrf.mxu0  ;;  %v1880_v17 = vadd.f32 %v8278_v23, %v7038_v28  ;;  %v2332_v47 = vld [vmem:[%s6723_s12 + $0x1d0] sm:$0xff]  ;;  %v2069_v29 = vadd.f32 %v2068_v33, %v1876_v37  ;;  %v5911_v37 = vld [vmem:[#allocation16 + $0xc0] ss:$24 sps:$4 sm:$0xff]  }
 0x2c3   : > { %v2426_v35 = vpack.c.bf16 %v2388_v0, %v2386_v38  ;;  %v2389_v50 = vadd.f32 %v2325_v20, %v2242_v62  ;;  %v2246_v52 = vadd.f32 %v2245_v51, %v2053_v60  ;;  %v1882_v20 = vadd.f32 %v8279_v41, %v7045_v16  ;;  %v2333_v38 = vld [vmem:[%s6723_s12 + $0x1d8] sm:$0xff] }
 0x2c4   : > { %v2247_v5 = vpop.f32.mrf.mxu0  ;;  %v1884_v0 = vadd.f32 %v8280_v56, %v7038_v28  ;;  %v2073_v11 = vadd.f32 %v2072_v54, %v1880_v17  ;;  %v5919_v17 = vld [vmem:[#allocation16 + $0x64] ss:$24 sps:$4 sm:$0xff]   ;;  %v5922_v41 = vld [vmem:[#allocation16 + $0x34] ss:$24 sps:$4 sm:$0xff]  }
 0x2c5   : > { %v2427_v3 = vpack.c.bf16 %v2389_v50, %v2387_v49  ;;  %v2248_v63 = vadd.f32 %v2247_v5, %v2055_v9  ;;  %v2390_v55 = vadd.f32 %v2326_v40, %v2246_v52  ;;  %v8281_v49 = vld [vmem:[#allocation81_spill] sm:$0xff]  ;;  %v2078_v9 = vpop.f32.mrf.mxu1  ;;  %v2075_v52 = vadd.f32 %v2074_v22, %v1882_v20  ;;  %v8282_v22 = vld [vmem:[#allocation75_spill] sm:$0xff] }
 0x2c6   : > { %v2249_v43 = vpop.f32.mrf.mxu0 }
 0x2c7   : > { %v2250_v12 = vadd.f32 %v2249_v43, %v2057_v4  ;;  %2790 = vmatprep.mubr.bf16.mxu1 %v2427_v3  ;;  %v2391_v59 = vadd.f32 %v2327_v19, %v2248_v63  ;;  %v2077_v3 = vadd.f32 %v2076_v21, %v1884_v0  ;;  %v2336_v43 = vld [vmem:[%s6723_s12 + $0x1f0] sm:$0xff] }
 0x2c8   : > { %v2251_v53 = vpop.f32.mrf.mxu0  ;;  %2791 = vmatmul.mubr.bf16.gmra.mxu1 %v2426_v35  ;;  %v1886_v35 = vadd.f32 %v8281_v49, %v7045_v16 }
 0x2c9   : > { %v2392_v24 = vadd.f32 %v2328_v7, %v2250_v12  ;;  %v2252_v31 = vadd.f32 %v2251_v53, %v2059_v6  ;;  %v2335_v12 = vld [vmem:[%s6723_s12 + $0x1e8] sm:$0xff] }
 0x2ca   : > { %v2255_v15 = vpop.f32.mrf.mxu0  ;;  %v2079_v7 = vadd.f32 %v2078_v9, %v1886_v35 }
 0x2cb   : > { %v2428_v61 = vpack.c.bf16 %v2392_v24, %v2390_v55  ;;  %v2393_v25 = vadd.f32 %v2329_v44, %v2252_v31  ;;  %v2256_v26 = vadd.f32 %v2255_v15, %v2063_v30  ;;  %v5902_v55 = vld [vmem:[#allocation16 + $0x150] ss:$24 sps:$4 sm:$0xff]   ;;  %v5904_v24 = vld [vmem:[#allocation16 + $0x154] ss:$24 sps:$4 sm:$0xff]   ;;  %v5905_v31 = vld [vmem:[#allocation16 + $0x120] ss:$24 sps:$4 sm:$0xff]  }
 0x2cc   : > { %v2257_v36 = vpop.f32.mrf.mxu0  ;;  %4028 = vmatprep.subr.bf16.mxu1 %v5904_v24  ;;  %v5907_v30 = vld [vmem:[#allocation16 + $0x124] ss:$24 sps:$4 sm:$0xff]   ;;  %v5908_v15 = vld [vmem:[#allocation16 + $0xf0] ss:$24 sps:$4 sm:$0xff]   ;;  %v5946_v24 = vld [vmem:[#allocation16 + $0x274] ss:$24 sps:$4 sm:$0xff]  }
 0x2cd   : > { %v2429_v10 = vpack.c.bf16 %v2393_v25, %v2391_v59  ;;  %v2258_v2 = vadd.f32 %v2257_v36, %v2065_v46  ;;  %v2394_v62 = vadd.f32 %v2330_v45, %v2256_v26  ;;  %4029 = vmatpush1.bf16.msra.mxu1 %v5902_v55  ;;  %v5913_v59 = vld [vmem:[#allocation16 + $0xc4] ss:$24 sps:$4 sm:$0xff]   ;;  %v5914_v46 = vld [vmem:[#allocation16 + $0x90] ss:$24 sps:$4 sm:$0xff]  }
 0x2ce   : > { %v2259_v8 = vpop.f32.mrf.mxu0  ;;  %4030 = vmatprep.subr.bf16.mxu1 %v5907_v30  ;;  %v8283_v26 = vld [vmem:[#allocation72_spill] sm:$0xff] }
 0x2cf   : > { %v2260_v13 = vadd.f32 %v2259_v8, %v2067_v32  ;;  %2800 = vmatprep.mubr.bf16.mxu1 %v2429_v10  ;;  %v2395_v50 = vadd.f32 %v2331_v14, %v2258_v2  ;;  %v5916_v32 = vld [vmem:[#allocation16 + $0x94] ss:$24 sps:$4 sm:$0xff]   ;;  %v5917_v8 = vld [vmem:[#allocation16 + $0x60] ss:$24 sps:$4 sm:$0xff]  }
 0x2d0   : > { %v2261_v42 = vpop.f32.mrf.mxu0  ;;  %2801 = vmatmul.mubr.bf16.gmra.mxu1 %v2428_v61  ;;  %v2466_v61 = vld [vmem:[#allocation11] sm:$0x3] }
 0x2d1   : > { %v2396_v60 = vadd.f32 %v2332_v47, %v2260_v13  ;;  %v2262_v51 = vadd.f32 %v2261_v42, %v2069_v29  ;;  %4031 = vmatpush1.bf16.msra.mxu1 %v5905_v31  ;;  %v7351_v36 = vrot.slane %v2466_v61, %v8282_v22  ;;  %v7354_v10 = vrot.slane %v2466_v61, %v8283_v26  ;;  %v5920_v42 = vld [vmem:[#allocation16 + $0x30] ss:$24 sps:$4 sm:$0xff]  }
 0x2d2   : > { %v2265_v39 = vpop.f32.mrf.mxu0  ;;  %4032 = vmatprep.subr.bf16.mxu1 %v5910_v27  ;;  %v5941_v27 = vld [vmem:[#allocation16 + $0xc8] ss:$24 sps:$4 sm:$0xff]  }
 0x2d3   : > { %v2430_v33 = vpack.c.bf16 %v2396_v60, %v2394_v62  ;;  %v2397_v5 = vadd.f32 %v2333_v38, %v2262_v51  ;;  %v2266_v28 = vadd.f32 %v2265_v39, %v2073_v11  ;;  %v5931_v38 = vld [vmem:[#allocation16 + $0x15c] ss:$24 sps:$4 sm:$0xff]   ;;  %v5929_v39 = vld [vmem:[#allocation16 + $0x158] ss:$24 sps:$4 sm:$0xff]  }
 0x2d4   : > { %v2267_v4 = vpop.f32.mrf.mxu0  ;;  %v5925_v62 = vld [vmem:[#allocation16 + $0x4] ss:$24 sps:$4 sm:$0xff]   ;;  %4221 = vmatprep.subr.bf16.mxu0 %v5931_v38  ;;  %v5944_v61 = vld [vmem:[#allocation16 + $0x270] ss:$24 sps:$4 sm:$0xff]  }
 0x2d5   : > { %v2431_v34 = vpack.c.bf16 %v2397_v5, %v2395_v50  ;;  %v2268_v6 = vadd.f32 %v2267_v4, %v2075_v52  ;;  %v2398_v1 = vadd.f32 %v2334_v18, %v2266_v28  ;;  %4033 = vmatpush1.bf16.msra.mxu1 %v5908_v15  ;;  %v5923_v50 = vld [vmem:[#allocation16] ss:$24 sps:$4 sm:$0xff]   ;;  %v5928_v4 = vld [vmem:[#allocation16 + $0x2d4] ss:$24 sps:$4 sm:$0xff]  }
 0x2d6   : > { %v2269_v40 = vpop.f32.mrf.mxu0  ;;  %4034 = vmatprep.subr.bf16.mxu1 %v5913_v59 }
 0x2d7   : > { %v2270_v63 = vadd.f32 %v2269_v40, %v2077_v3  ;;  %2810 = vmatprep.mubr.bf16.mxu1 %v2431_v34  ;;  %v2399_v53 = vadd.f32 %v2335_v12, %v2268_v6  ;;  %v5932_v34 = vld [vmem:[#allocation16 + $0x128] ss:$24 sps:$4 sm:$0xff]   ;;  %v5937_v12 = vld [vmem:[#allocation16 + $0x2a4] ss:$24 sps:$4 sm:$0xff]  }
 0x2d8   : > { %v2271_v16 = vpop.f32.mrf.mxu0  ;;  %2811 = vmatmul.mubr.bf16.gmra.mxu1 %v2430_v33  ;;  %v5934_v33 = vld [vmem:[#allocation16 + $0x12c] ss:$24 sps:$4 sm:$0xff]  }
 0x2d9   : > { %v2400_v54 = vadd.f32 %v2336_v43, %v2270_v63  ;;  %v2272_v19 = vadd.f32 %v2271_v16, %v2079_v7  ;;  %4035 = vmatpush1.bf16.msra.mxu1 %v5911_v37  ;;  %v5926_v43 = vld [vmem:[#allocation16 + $0x2d0] ss:$24 sps:$4 sm:$0xff]   ;;  %v5940_v7 = vld [vmem:[#allocation16 + $0xfc] ss:$24 sps:$4 sm:$0xff]  }
 0x2da   : > { %4036 = vmatprep.subr.bf16.mxu1 %v5916_v32 }
 0x2db   : > { %v2432_v44 = vpack.c.bf16 %v2400_v54, %v2398_v1  ;;  %v2401_v58 = vadd.f32 %v2337_v57, %v2272_v19  ;;  %v5938_v54 = vld [vmem:[#allocation16 + $0xf8] ss:$24 sps:$4 sm:$0xff]  }
 0x2dd   : > { %v2433_v48 = vpack.c.bf16 %v2401_v58, %v2399_v53  ;;  %4037 = vmatpush1.bf16.msra.mxu1 %v5914_v46  ;;  %v5943_v58 = vld [vmem:[#allocation16 + $0xcc] ss:$24 sps:$4 sm:$0xff]  }
 0x2de   : > { %4038 = vmatprep.subr.bf16.mxu1 %v5919_v17 }
 0x2df   : > { %2820 = vmatprep.mubr.bf16.mxu1 %v2433_v48 }
 0x2e0   : > { %2821 = vmatmul.mubr.bf16.gmra.mxu1 %v2432_v44  ;;  %v5935_v44 = vld [vmem:[#allocation16 + $0x2a0] ss:$24 sps:$4 sm:$0xff]  }
 0x2e1   : > { %4039 = vmatpush1.bf16.msra.mxu1 %v5917_v8 }
 0x2e2   : > { %4040 = vmatprep.subr.bf16.mxu1 %v5922_v41  ;;  %v5953_v41 = vld [vmem:[#allocation16 + $0x240] ss:$24 sps:$4 sm:$0xff]  }
 0x2e5   : > { %4041 = vmatpush1.bf16.msra.mxu1 %v5920_v42 }
 0x2e6   : > { %4042 = vmatprep.subr.bf16.mxu1 %v5925_v62 }
 0x2e9   : > { %4043 = vmatpush1.bf16.msra.mxu1 %v5923_v50 }
 0x2ea   : > { %4044 = vmatprep.subr.bf16.mxu1 %v5928_v4 }
 0x2ed   : > { %4045 = vmatpush2.bf16.msra.mxu1 %v5926_v43 }
 0x2ee   : > { %4046 = vmatprep.subr.bf16.mxu1 %v5937_v12 }
 0x2f1   : > { %4047 = vmatpush2.bf16.msra.mxu1 %v5935_v44 }
 0x2f2   : > { %4048 = vmatprep.subr.bf16.mxu1 %v5946_v24 }
 0x2f5   : > { %4049 = vmatpush2.bf16.msra.mxu1 %v5944_v61  ;;  %v5968_v61 = vld [vmem:[#allocation16 + $0x2a8] ss:$24 sps:$4 sm:$0xff]  }
 0x328   : > { %v2672_v25 = vpop.f32.mrf.mxu1 }
 0x329   : > { %v2673_v2 = vadd.f32 %v2672_v25, %v7354_v10  ;;  %v5949_v25 = vld [vmem:[#allocation16 + $0x9c] ss:$24 sps:$4 sm:$0xff]  }
 0x32a   : > { %v2674_v23 = vpop.f32.mrf.mxu1 }
 0x32b   : > { %v2675_v47 = vadd.f32 %v2674_v23, %v7351_v36  ;;  %v2831_v60 = vmax.f32 %v2673_v2, 0.0  ;;  %v5955_v23 = vld [vmem:[#allocation16 + $0x244] ss:$24 sps:$4 sm:$0xff]  }
 0x32c   : > { %v2676_v45 = vpop.f32.mrf.mxu1  ;;  %4050 = vmatprep.subr.bf16.mxu1 %v5955_v23 }
 0x32d   : > { %v2677_v29 = vadd.f32 %v2676_v45, %v7354_v10  ;;  %v2832_v56 = vmax.f32 %v2675_v47, 0.0  ;;  %v5947_v47 = vld [vmem:[#allocation16 + $0x98] ss:$24 sps:$4 sm:$0xff]   ;;  %4051 = vmatpush2.bf16.msra.mxu1 %v5953_v41  ;;  %v5979_v41 = vld [vmem:[#allocation16 + $0x24c] ss:$24 sps:$4 sm:$0xff]  }
 0x32e   : > { %v2678_v13 = vpop.f32.mrf.mxu1 }
 0x32f   : > { %v2679_v20 = vadd.f32 %v2678_v13, %v7351_v36  ;;  %v2833_v21 = vmax.f32 %v2677_v29, 0.0  ;;  %v5952_v13 = vld [vmem:[#allocation16 + $0x6c] ss:$24 sps:$4 sm:$0xff]  }
 0x330   : > { %v2682_v14 = vpop.f32.mrf.mxu1 }
 0x331   : > { %v2834_v0 = vmax.f32 %v2679_v20, 0.0  ;;  %v2895_v49 = vpack.c.bf16 %v2833_v21, %v2831_v60  ;;  %v2683_v52 = vadd.f32 %v2682_v14, %v7354_v10  ;;  %v5964_v14 = vld [vmem:[#allocation16 + $0x214] ss:$24 sps:$4 sm:$0xff]  }
 0x332   : > { %v2684_v51 = vpop.f32.mrf.mxu1  ;;  %4052 = vmatprep.subr.bf16.mxu1 %v5964_v14 }
 0x333   : > { %v2896_v11 = vpack.c.bf16 %v2834_v0, %v2832_v56  ;;  %v2685_v5 = vadd.f32 %v2684_v51, %v7351_v36  ;;  %v2835_v16 = vmax.f32 %v2683_v52, 0.0  ;;  %v5950_v0 = vld [vmem:[#allocation16 + $0x68] ss:$24 sps:$4 sm:$0xff]   ;;  %v5958_v51 = vld [vmem:[#allocation16 + $0x3c] ss:$24 sps:$4 sm:$0xff]  }
 0x334   : > { %v2686_v35 = vpop.f32.mrf.mxu1 }
 0x335   : > { %v2687_v9 = vadd.f32 %v2686_v35, %v7354_v10  ;;  %3163 = vmatprep.mubr.bf16.mxu0 %v2896_v11  ;;  %v2836_v6 = vmax.f32 %v2685_v5, 0.0  ;;  %v5962_v11 = vld [vmem:[#allocation16 + $0x210] ss:$24 sps:$4 sm:$0xff]   ;;  %v5973_v35 = vld [vmem:[#allocation16 + $0x1e4] ss:$24 sps:$4 sm:$0xff]  }
 0x336   : > { %v2688_v3 = vpop.f32.mrf.mxu1  ;;  %3164 = vmatmul.mubr.bf16.vlgmr.msra.gmra.mxu0 %v2895_v49  ;;  %4053 = vmatpush2.bf16.msra.mxu1 %v5962_v11 }
 0x337   : > { %v2689_v28 = vadd.f32 %v2688_v3, %v7351_v36  ;;  %4222 = vmatpush1.bf16.msra.mxu0 %v5929_v39  ;;  %v2837_v18 = vmax.f32 %v2687_v9, 0.0  ;;  %v5956_v9 = vld [vmem:[#allocation16 + $0x38] ss:$24 sps:$4 sm:$0xff]   ;;  %v5961_v3 = vld [vmem:[#allocation16 + $0xc] ss:$24 sps:$4 sm:$0xff]   ;;  %4054 = vmatprep.subr.bf16.mxu1 %v5973_v35 }
 0x338   : > { %v2692_v40 = vpop.f32.mrf.mxu1  ;;  %4223 = vmatprep.subr.bf16.mxu0 %v5934_v33 }
 0x339   : > { %v2838_v63 = vmax.f32 %v2689_v28, 0.0  ;;  %v2897_v19 = vpack.c.bf16 %v2837_v18, %v2835_v16  ;;  %v2693_v31 = vadd.f32 %v2692_v40, %v7354_v10  ;;  %v5971_v28 = vld [vmem:[#allocation16 + $0x1e0] ss:$24 sps:$4 sm:$0xff]   ;;  %v5982_v40 = vld [vmem:[#allocation16 + $0x1b4] ss:$24 sps:$4 sm:$0xff]  }
 0x33a   : > { %v2694_v57 = vpop.f32.mrf.mxu1  ;;  %4055 = vmatpush2.bf16.msra.mxu1 %v5971_v28 }
 0x33b   : > { %v2898_v1 = vpack.c.bf16 %v2838_v63, %v2836_v6  ;;  %4224 = vmatpush1.bf16.msra.mxu0 %v5932_v34  ;;  %v2695_v48 = vadd.f32 %v2694_v57, %v7351_v36  ;;  %v2839_v17 = vmax.f32 %v2693_v31, 0.0  ;;  %v5959_v63 = vld [vmem:[#allocation16 + $0x8] ss:$24 sps:$4 sm:$0xff]   ;;  %v5967_v57 = vld [vmem:[#allocation16 + $0x2dc] ss:$24 sps:$4 sm:$0xff]   ;;  %4056 = vmatprep.subr.bf16.mxu1 %v5982_v40 }
 0x33c   : > { %v2696_v53 = vpop.f32.mrf.mxu1  ;;  %4225 = vmatprep.subr.bf16.mxu0 %v5940_v7  ;;  %v5970_v31 = vld [vmem:[#allocation16 + $0x2ac] ss:$24 sps:$4 sm:$0xff]  }
 0x33d   : > { %v2697_v55 = vadd.f32 %v2696_v53, %v7354_v10  ;;  %3173 = vmatprep.mubr.bf16.mxu0 %v2898_v1  ;;  %v2840_v46 = vmax.f32 %v2695_v48, 0.0  ;;  %v5980_v1 = vld [vmem:[#allocation16 + $0x1b0] ss:$24 sps:$4 sm:$0xff]  }
 0x33e   : > { %v2698_v30 = vpop.f32.mrf.mxu1  ;;  %3174 = vmatmul.mubr.bf16.gmra.mxu0 %v2897_v19  ;;  %v5965_v48 = vld [vmem:[#allocation16 + $0x2d8] ss:$24 sps:$4 sm:$0xff]   ;;  %4057 = vmatpush2.bf16.msra.mxu1 %v5980_v1 }
 0x33f   : > { %v2699_v15 = vadd.f32 %v2698_v30, %v7351_v36  ;;  %4226 = vmatpush1.bf16.msra.mxu0 %v5938_v54  ;;  %v2841_v37 = vmax.f32 %v2697_v55, 0.0 }
 0x340   : > { %v2702_v59 = vpop.f32.mrf.mxu1  ;;  %4227 = vmatprep.subr.bf16.mxu0 %v5943_v58 }
 0x341   : > { %v2842_v32 = vmax.f32 %v2699_v15, 0.0  ;;  %v2899_v29 = vpack.c.bf16 %v2841_v37, %v2839_v17  ;;  %v2703_v42 = vadd.f32 %v2702_v59, %v7354_v10 }
 0x342   : > { %v2704_v45 = vpop.f32.mrf.mxu1 }
 0x343   : > { %v2900_v8 = vpack.c.bf16 %v2842_v32, %v2840_v46  ;;  %4228 = vmatpush1.bf16.msra.mxu0 %v5941_v27  ;;  %v2705_v20 = vadd.f32 %v2704_v45, %v7351_v36  ;;  %v2843_v50 = vmax.f32 %v2703_v42, 0.0  ;;  %v5976_v32 = vld [vmem:[#allocation16 + $0x27c] ss:$24 sps:$4 sm:$0xff]  }
 0x344   : > { %v2706_v2 = vpop.f32.mrf.mxu1  ;;  %4229 = vmatprep.subr.bf16.mxu0 %v5949_v25 }
 0x345   : > { %v2707_v21 = vadd.f32 %v2706_v2, %v7354_v10  ;;  %3183 = vmatprep.mubr.bf16.mxu0 %v2900_v8  ;;  %v2844_v39 = vmax.f32 %v2705_v20, 0.0 }
 0x346   : > { %v2708_v38 = vpop.f32.mrf.mxu1  ;;  %3184 = vmatmul.mubr.bf16.gmra.mxu0 %v2899_v29  ;;  %v5974_v29 = vld [vmem:[#allocation16 + $0x278] ss:$24 sps:$4 sm:$0xff]  }
 0x347   : > { %v2709_v56 = vadd.f32 %v2708_v38, %v7351_v36  ;;  %4230 = vmatpush1.bf16.msra.mxu0 %v5947_v47  ;;  %v2845_v62 = vmax.f32 %v2707_v21, 0.0 }
 0x348   : > { %v2712_v60 = vpop.f32.mrf.mxu1  ;;  %4231 = vmatprep.subr.bf16.mxu0 %v5952_v13 }
 0x349   : > { %v2846_v49 = vmax.f32 %v2709_v56, 0.0  ;;  %v2901_v4 = vpack.c.bf16 %v2845_v62, %v2843_v50  ;;  %v2713_v43 = vadd.f32 %v2712_v60, %v7354_v10  ;;  %v5977_v56 = vld [vmem:[#allocation16 + $0x248] ss:$24 sps:$4 sm:$0xff]   ;;  %v5985_v60 = vld [vmem:[#allocation16 + $0x21c] ss:$24 sps:$4 sm:$0xff]  }
 0x34a   : > { %v2714_v33 = vpop.f32.mrf.mxu1  ;;  %v5983_v50 = vld [vmem:[#allocation16 + $0x218] ss:$24 sps:$4 sm:$0xff]  }
 0x34b   : > { %v2902_v5 = vpack.c.bf16 %v2846_v49, %v2844_v39  ;;  %4232 = vmatpush1.bf16.msra.mxu0 %v5950_v0  ;;  %v2715_v34 = vadd.f32 %v2714_v33, %v7351_v36  ;;  %v2847_v53 = vmax.f32 %v2713_v43, 0.0 }
 0x34c   : > { %v2716_v52 = vpop.f32.mrf.mxu1  ;;  %4233 = vmatprep.subr.bf16.mxu0 %v5958_v51 }
 0x34d   : > { %v2717_v18 = vadd.f32 %v2716_v52, %v7354_v10  ;;  %3193 = vmatprep.mubr.bf16.mxu0 %v2902_v5  ;;  %v2848_v54 = vmax.f32 %v2715_v34, 0.0 }
 0x34e   : > { %v2718_v7 = vpop.f32.mrf.mxu1  ;;  %3194 = vmatmul.mubr.bf16.gmra.mxu0 %v2901_v4 }
 0x34f   : > { %v2719_v6 = vadd.f32 %v2718_v7, %v7351_v36  ;;  %4234 = vmatpush1.bf16.msra.mxu0 %v5956_v9  ;;  %v2849_v12 = vmax.f32 %v2717_v18, 0.0 }
 0x350   : > { %v2722_v16 = vpop.f32.mrf.mxu1  ;;  %4235 = vmatprep.subr.bf16.mxu0 %v5961_v3 }
 0x351   : > { %v2850_v19 = vmax.f32 %v2719_v6, 0.0  ;;  %v2903_v55 = vpack.c.bf16 %v2849_v12, %v2847_v53  ;;  %v2723_v27 = vadd.f32 %v2722_v16, %v7354_v10 }
 0x352   : > { %v2724_v44 = vpop.f32.mrf.mxu1 }
 0x353   : > { %v2904_v58 = vpack.c.bf16 %v2850_v19, %v2848_v54  ;;  %4236 = vmatpush1.bf16.msra.mxu0 %v5959_v63  ;;  %v2725_v30 = vadd.f32 %v2724_v44, %v7351_v36  ;;  %v2851_v45 = vmax.f32 %v2723_v27, 0.0 }
 0x354   : > { %v2726_v24 = vpop.f32.mrf.mxu1  ;;  %4237 = vmatprep.subr.bf16.mxu0 %v5967_v57 }
 0x355   : > { %v2727_v15 = vadd.f32 %v2726_v24, %v7354_v10  ;;  %3203 = vmatprep.mubr.bf16.mxu0 %v2904_v58  ;;  %v2852_v23 = vmax.f32 %v2725_v30, 0.0 }
 0x356   : > { %v2728_v37 = vpop.f32.mrf.mxu1  ;;  %3204 = vmatmul.mubr.bf16.gmra.mxu0 %v2903_v55 }
 0x357   : > { %v2729_v59 = vadd.f32 %v2728_v37, %v7351_v36  ;;  %4238 = vmatpush2.bf16.msra.mxu0 %v5965_v48  ;;  %v2853_v25 = vmax.f32 %v2727_v15, 0.0 }
 0x358   : > { %v2732_v46 = vpop.f32.mrf.mxu1  ;;  %4239 = vmatprep.subr.bf16.mxu0 %v5970_v31 }
 0x359   : > { %v2854_v17 = vmax.f32 %v2729_v59, 0.0  ;;  %v2905_v2 = vpack.c.bf16 %v2853_v25, %v2851_v45  ;;  %v2733_v14 = vadd.f32 %v2732_v46, %v7354_v10  ;;  %v5988_v46 = vld [vmem:[#allocation16 + $0x1ec] ss:$24 sps:$4 sm:$0xff]  }
 0x35a   : > { %v2734_v8 = vpop.f32.mrf.mxu1 }
 0x35b   : > { %v2906_v47 = vpack.c.bf16 %v2854_v17, %v2852_v23  ;;  %4240 = vmatpush2.bf16.msra.mxu0 %v5968_v61  ;;  %v2735_v20 = vadd.f32 %v2734_v8, %v7351_v36  ;;  %v2855_v39 = vmax.f32 %v2733_v14, 0.0  ;;  %v5986_v23 = vld [vmem:[#allocation16 + $0x1e8] ss:$24 sps:$4 sm:$0xff]  }
 0x35c   : > { %v2736_v13 = vpop.f32.mrf.mxu1  ;;  %4241 = vmatprep.subr.bf16.mxu0 %v5976_v32 }
 0x35d   : > { %v2737_v21 = vadd.f32 %v2736_v13, %v7354_v10  ;;  %3213 = vmatprep.mubr.bf16.mxu0 %v2906_v47  ;;  %v2856_v51 = vmax.f32 %v2735_v20, 0.0  ;;  %v5994_v13 = vld [vmem:[#allocation16 + $0x1bc] ss:$24 sps:$4 sm:$0xff]   ;;  %v5992_v20 = vld [vmem:[#allocation16 + $0x1b8] ss:$24 sps:$4 sm:$0xff]  }
 0x35e   : > { %v2738_v42 = vpop.f32.mrf.mxu1  ;;  %3214 = vmatmul.mubr.bf16.gmra.mxu0 %v2905_v2 }
 0x35f   : > { %v2739_v38 = vadd.f32 %v2738_v42, %v7351_v36  ;;  %4242 = vmatpush2.bf16.msra.mxu0 %v5974_v29  ;;  %v2857_v0 = vmax.f32 %v2737_v21, 0.0 }
 0x360   : > { %v2742_v62 = vpop.f32.mrf.mxu1  ;;  %4243 = vmatprep.subr.bf16.mxu0 %v5979_v41 }
 0x361   : > { %v2858_v11 = vmax.f32 %v2739_v38, 0.0  ;;  %v2907_v33 = vpack.c.bf16 %v2857_v0, %v2855_v39  ;;  %v2743_v52 = vadd.f32 %v2742_v62, %v7354_v10  ;;  %v5991_v62 = vld [vmem:[#allocation16 + $0x184] ss:$24 sps:$4 sm:$0xff]   ;;  %v5995_v39 = vld [vmem:[#allocation16 + $0x188] ss:$24 sps:$4 sm:$0xff]  }
 0x362   : > { %v2744_v49 = vpop.f32.mrf.mxu1  ;;  %4058 = vmatprep.subr.bf16.mxu1 %v5991_v62 }
 0x363   : > { %v2908_v35 = vpack.c.bf16 %v2858_v11, %v2856_v51  ;;  %4244 = vmatpush2.bf16.msra.mxu0 %v5977_v56  ;;  %v2745_v9 = vadd.f32 %v2744_v49, %v7351_v36  ;;  %v2859_v7 = vmax.f32 %v2743_v52, 0.0  ;;  %v5989_v11 = vld [vmem:[#allocation16 + $0x180] ss:$24 sps:$4 sm:$0xff]  }
 0x364   : > { %v2746_v5 = vpop.f32.mrf.mxu1  ;;  %4245 = vmatprep.subr.bf16.mxu0 %v5985_v60  ;;  %v5997_v60 = vld [vmem:[#allocation16 + $0x18c] ss:$24 sps:$4 sm:$0xff]   ;;  %4059 = vmatpush2.bf16.msra.mxu1 %v5989_v11 }
 0x365   : > { %v2747_v4 = vadd.f32 %v2746_v5, %v7354_v10  ;;  %3223 = vmatprep.mubr.bf16.mxu0 %v2908_v35  ;;  %v2860_v40 = vmax.f32 %v2745_v9, 0.0 }
 0x366   : > { %v2748_v3 = vpop.f32.mrf.mxu1  ;;  %3224 = vmatmul.mubr.bf16.gmra.mxu0 %v2907_v33 }
 0x367   : > { %v2749_v28 = vadd.f32 %v2748_v3, %v7351_v36  ;;  %4246 = vmatpush2.bf16.msra.mxu0 %v5983_v50  ;;  %v2861_v34 = vmax.f32 %v2747_v4, 0.0 }
 0x368   : > { %v2752_v18 = vpop.f32.mrf.mxu1  ;;  %4247 = vmatprep.subr.bf16.mxu0 %v5988_v46 }
 0x369   : > { %v2862_v43 = vmax.f32 %v2749_v28, 0.0  ;;  %v2909_v12 = vpack.c.bf16 %v2861_v34, %v2859_v7  ;;  %v2753_v54 = vadd.f32 %v2752_v18, %v7354_v10  ;;  %v6000_v7 = vld [vmem:[#allocation16 + $0x164] ss:$24 sps:$4 sm:$0xff]  }
 0x36a   : > { %v2754_v6 = vpop.f32.mrf.mxu1  ;;  %4414 = vmatprep.subr.bf16.mxu1 %v6000_v7 }
 0x36b   : > { %v2910_v63 = vpack.c.bf16 %v2862_v43, %v2860_v40  ;;  %v2755_v57 = vadd.f32 %v2754_v6, %v7351_v36  ;;  %v2863_v24 = vmax.f32 %v2753_v54, 0.0  ;;  %4248 = vmatpush2.bf16.msra.mxu0 %v5986_v23 }
 0x36c   : > { %v2756_v16 = vpop.f32.mrf.mxu1  ;;  %4249 = vmatprep.subr.bf16.mxu0 %v5994_v13 }
 0x36d   : > { %v2757_v1 = vadd.f32 %v2756_v16, %v7354_v10  ;;  %3233 = vmatprep.mubr.bf16.mxu0 %v2910_v63  ;;  %v2864_v48 = vmax.f32 %v2755_v57, 0.0 }
 0x36e   : > { %v2758_v19 = vpop.f32.mrf.mxu1  ;;  %3234 = vmatmul.mubr.bf16.gmra.mxu0 %v2909_v12 }
 0x36f   : > { %v2759_v53 = vadd.f32 %v2758_v19, %v7351_v36  ;;  %v2865_v44 = vmax.f32 %v2757_v1, 0.0  ;;  %4250 = vmatpush2.bf16.msra.mxu0 %v5992_v20 }
 0x370   : > { %v2762_v58 = vpop.f32.mrf.mxu1  ;;  %4251 = vmatprep.subr.bf16.mxu0 %v5997_v60 }
 0x371   : > { %v2866_v55 = vmax.f32 %v2759_v53, 0.0  ;;  %v2911_v15 = vpack.c.bf16 %v2865_v44, %v2863_v24  ;;  %v2763_v61 = vadd.f32 %v2762_v58, %v7354_v10 }
 0x372   : > { %v2764_v31 = vpop.f32.mrf.mxu1 }
 0x373   : > { %v2912_v30 = vpack.c.bf16 %v2866_v55, %v2864_v48  ;;  %v2765_v37 = vadd.f32 %v2764_v31, %v7351_v36  ;;  %v2867_v29 = vmax.f32 %v2763_v61, 0.0  ;;  %4252 = vmatpush2.bf16.msra.mxu0 %v5995_v39 }
 0x374   : > { %v2766_v27 = vpop.f32.mrf.mxu1 }
 0x375   : > { %v2767_v59 = vadd.f32 %v2766_v27, %v7354_v10  ;;  %3243 = vmatprep.mubr.bf16.mxu0 %v2912_v30  ;;  %v2868_v8 = vmax.f32 %v2765_v37, 0.0 }
 0x376   : > { %v2768_v25 = vpop.f32.mrf.mxu1  ;;  %3244 = vmatmul.mubr.bf16.gmra.mxu0 %v2911_v15 }
 0x377   : > { %v2769_v32 = vadd.f32 %v2768_v25, %v7351_v36  ;;  %v2869_v17 = vmax.f32 %v2767_v59, 0.0 }
 0x378   : > { %v2772_v45 = vpop.f32.mrf.mxu1 }
 0x379   : > { %v2870_v47 = vmax.f32 %v2769_v32, 0.0  ;;  %v2913_v21 = vpack.c.bf16 %v2869_v17, %v2867_v29  ;;  %v2773_v56 = vadd.f32 %v2772_v45, %v7354_v10 }
 0x37a   : > { %v2774_v2 = vpop.f32.mrf.mxu1 }
 0x37b   : > { %v2914_v41 = vpack.c.bf16 %v2870_v47, %v2868_v8  ;;  %v2775_v42 = vadd.f32 %v2774_v2, %v7351_v36  ;;  %v2871_v5 = vmax.f32 %v2773_v56, 0.0 }
 0x37c   : > { %v2776_v14 = vpop.f32.mrf.mxu1 }
 0x37d   : > { %v2777_v38 = vadd.f32 %v2776_v14, %v7354_v10  ;;  %3253 = vmatprep.mubr.bf16.mxu0 %v2914_v41  ;;  %v2872_v50 = vmax.f32 %v2775_v42, 0.0 }
 0x37e   : > { %v2778_v0 = vpop.f32.mrf.mxu1  ;;  %3254 = vmatmul.mubr.bf16.gmra.mxu0 %v2913_v21 }
 0x37f   : > { %v2779_v51 = vadd.f32 %v2778_v0, %v7351_v36  ;;  %v2873_v49 = vmax.f32 %v2777_v38, 0.0 }
 0x380   : > { %v2782_v35 = vpop.f32.mrf.mxu1 }
 0x381   : > { %v2874_v33 = vmax.f32 %v2779_v51, 0.0  ;;  %v2915_v52 = vpack.c.bf16 %v2873_v49, %v2871_v5  ;;  %v2783_v18 = vadd.f32 %v2782_v35, %v7354_v10 }
 0x382   : > { %v2784_v9 = vpop.f32.mrf.mxu1 }
 0x383   : > { %v2916_v4 = vpack.c.bf16 %v2874_v33, %v2872_v50  ;;  %v2785_v28 = vadd.f32 %v2784_v9, %v7351_v36  ;;  %v2875_v57 = vmax.f32 %v2783_v18, 0.0 }
 0x384   : > { %v2786_v3 = vpop.f32.mrf.mxu1 }
 0x385   : > { %v2787_v34 = vadd.f32 %v2786_v3, %v7354_v10  ;;  %3263 = vmatprep.mubr.bf16.mxu0 %v2916_v4  ;;  %v2876_v12 = vmax.f32 %v2785_v28, 0.0 }
 0x386   : > { %v2788_v40 = vpop.f32.mrf.mxu1  ;;  %3264 = vmatmul.mubr.bf16.gmra.mxu0 %v2915_v52 }
 0x387   : > { %v2789_v43 = vadd.f32 %v2788_v40, %v7351_v36  ;;  %v2877_v6 = vmax.f32 %v2787_v34, 0.0 }
 0x388   : > { %v2792_v63 = vpop.f32.mrf.mxu1 }
 0x389   : > { %v2878_v16 = vmax.f32 %v2789_v43, 0.0  ;;  %v2917_v19 = vpack.c.bf16 %v2877_v6, %v2875_v57  ;;  %v2793_v48 = vadd.f32 %v2792_v63, %v7354_v10 }
 0x38a   : > { %v2794_v1 = vpop.f32.mrf.mxu1 }
 0x38b   : > { %v2918_v54 = vpack.c.bf16 %v2878_v16, %v2876_v12  ;;  %v2795_v44 = vadd.f32 %v2794_v1, %v7351_v36  ;;  %v2879_v37 = vmax.f32 %v2793_v48, 0.0  ;;  %v2959_v12 = vld [vmem:[#allocation14] sm:$0x3] }
 0x38c   : > { %v2796_v53 = vpop.f32.mrf.mxu1  ;;  %v7421_v57 = vrot.slane %v2959_v12, %v8282_v22  ;;  %v7424_v1 = vrot.slane %v2959_v12, %v8283_v26 }
 0x38d   : > { %v2797_v58 = vadd.f32 %v2796_v53, %v7354_v10  ;;  %3273 = vmatprep.mubr.bf16.mxu0 %v2918_v54  ;;  %v2880_v15 = vmax.f32 %v2795_v44, 0.0 }
 0x38e   : > { %v2798_v55 = vpop.f32.mrf.mxu1  ;;  %3274 = vmatmul.mubr.bf16.gmra.mxu0 %v2917_v19 }
 0x38f   : > { %v2799_v24 = vadd.f32 %v2798_v55, %v7351_v36  ;;  %v2881_v31 = vmax.f32 %v2797_v58, 0.0 }
 0x390   : > { %v2802_v30 = vpop.f32.mrf.mxu1 }
 0x391   : > { %v2882_v27 = vmax.f32 %v2799_v24, 0.0  ;;  %v2919_v25 = vpack.c.bf16 %v2881_v31, %v2879_v37  ;;  %v2803_v17 = vadd.f32 %v2802_v30, %v7354_v10  ;;  %v5998_v37 = vld [vmem:[#allocation16 + $0x160] ss:$24 sps:$4 sm:$0xff]  }
 0x392   : > { %v2804_v59 = vpop.f32.mrf.mxu1 }
 0x393   : > { %v2920_v61 = vpack.c.bf16 %v2882_v27, %v2880_v15  ;;  %v2805_v32 = vadd.f32 %v2804_v59, %v7351_v36  ;;  %v2883_v41 = vmax.f32 %v2803_v17, 0.0 }
 0x394   : > { %v2806_v46 = vpop.f32.mrf.mxu1 }
 0x395   : > { %v2807_v23 = vadd.f32 %v2806_v46, %v7354_v10  ;;  %3283 = vmatprep.mubr.bf16.mxu0 %v2920_v61  ;;  %v2884_v2 = vmax.f32 %v2805_v32, 0.0 }
 0x396   : > { %v2808_v45 = vpop.f32.mrf.mxu1  ;;  %3284 = vmatmul.mubr.bf16.gmra.mxu0 %v2919_v25  ;;  %v6003_v25 = vld [vmem:[#allocation16 + $0x134] ss:$24 sps:$4 sm:$0xff]  }
 0x397   : > { %v2809_v8 = vadd.f32 %v2808_v45, %v7351_v36  ;;  %v2885_v47 = vmax.f32 %v2807_v23, 0.0 }
 0x398   : > { %v2812_v29 = vpop.f32.mrf.mxu1 }
 0x399   : > { %v2886_v13 = vmax.f32 %v2809_v8, 0.0  ;;  %v2921_v14 = vpack.c.bf16 %v2885_v47, %v2883_v41  ;;  %v2813_v0 = vadd.f32 %v2812_v29, %v7354_v10  ;;  %v6001_v8 = vld [vmem:[#allocation16 + $0x130] ss:$24 sps:$4 sm:$0xff]  }
 0x39a   : > { %v2814_v20 = vpop.f32.mrf.mxu1 }
 0x39b   : > { %v2922_v21 = vpack.c.bf16 %v2886_v13, %v2884_v2  ;;  %v2815_v38 = vadd.f32 %v2814_v20, %v7351_v36  ;;  %v2887_v35 = vmax.f32 %v2813_v0, 0.0  ;;  %v6006_v2 = vld [vmem:[#allocation16 + $0x104] ss:$24 sps:$4 sm:$0xff]   ;;  %v6009_v0 = vld [vmem:[#allocation16 + $0xd4] ss:$24 sps:$4 sm:$0xff]  }
 0x39c   : > { %v2816_v42 = vpop.f32.mrf.mxu1 }
 0x39d   : > { %v2817_v56 = vadd.f32 %v2816_v42, %v7354_v10  ;;  %3293 = vmatprep.mubr.bf16.mxu0 %v2922_v21  ;;  %v2888_v39 = vmax.f32 %v2815_v38, 0.0  ;;  %v6004_v42 = vld [vmem:[#allocation16 + $0x100] ss:$24 sps:$4 sm:$0xff]  }
 0x39e   : > { %v2818_v62 = vpop.f32.mrf.mxu1  ;;  %3294 = vmatmul.mubr.bf16.gmra.mxu0 %v2921_v14 }
 0x39f   : > { %v2819_v60 = vadd.f32 %v2818_v62, %v7351_v36  ;;  %v2889_v51 = vmax.f32 %v2817_v56, 0.0 }
 0x3a0   : > { %v2822_v11 = vpop.f32.mrf.mxu1 }
 0x3a1   : > { %v2890_v49 = vmax.f32 %v2819_v60, 0.0  ;;  %v2923_v5 = vpack.c.bf16 %v2889_v51, %v2887_v35  ;;  %v2823_v3 = vadd.f32 %v2822_v11, %v7354_v10 }
 0x3a2   : > { %v2824_v50 = vpop.f32.mrf.mxu1 }
 0x3a3   : > { %v2924_v33 = vpack.c.bf16 %v2890_v49, %v2888_v39  ;;  %v2825_v4 = vadd.f32 %v2824_v50, %v7351_v36  ;;  %v2891_v7 = vmax.f32 %v2823_v3, 0.0  ;;  %v6007_v49 = vld [vmem:[#allocation16 + $0xd0] ss:$24 sps:$4 sm:$0xff]  }
 0x3a4   : > { %v2826_v9 = vpop.f32.mrf.mxu1 }
 0x3a5   : > { %v2827_v52 = vadd.f32 %v2826_v9, %v7354_v10  ;;  %3303 = vmatprep.mubr.bf16.mxu0 %v2924_v33  ;;  %v2892_v40 = vmax.f32 %v2825_v4, 0.0  ;;  %v6012_v33 = vld [vmem:[#allocation16 + $0xa4] ss:$24 sps:$4 sm:$0xff]  }
 0x3a6   : > { %v2828_v28 = vpop.f32.mrf.mxu1  ;;  %3304 = vmatmul.mubr.bf16.gmra.mxu0 %v2923_v5 }
 0x3a7   : > { %v2829_v34 = vadd.f32 %v2828_v28, %v7351_v36  ;;  %v2893_v18 = vmax.f32 %v2827_v52, 0.0  ;;  %v6010_v28 = vld [vmem:[#allocation16 + $0xa0] ss:$24 sps:$4 sm:$0xff]  }
 0x3a9   : > { %v2894_v43 = vmax.f32 %v2829_v34, 0.0  ;;  %v2925_v63 = vpack.c.bf16 %v2893_v18, %v2891_v7 }
 0x3ab   : > { %v2926_v6 = vpack.c.bf16 %v2894_v43, %v2892_v40  ;;  %v6015_v40 = vld [vmem:[#allocation16 + $0x74] ss:$24 sps:$4 sm:$0xff]  }
 0x3ad   : > { %3313 = vmatprep.mubr.bf16.mxu0 %v2926_v6 }
 0x3ae   : > { %3314 = vmatmul.mubr.bf16.gmra.mxu0 %v2925_v63 }
 0x3f6   : > { %v3165_v16 = vpop.f32.mrf.mxu0 }
 0x3f7   : > { %v3166_v53 = vadd.f32 %v3165_v16, %v7424_v1  ;;  %v6013_v16 = vld [vmem:[#allocation16 + $0x70] ss:$24 sps:$4 sm:$0xff]  }
 0x3f8   : > { %v3167_v10 = vpop.f32.mrf.mxu0 }
 0x3f9   : > { %v3168_v36 = vadd.f32 %v3167_v10, %v7421_v57  ;;  %v3324_v30 = vmax.f32 %v3166_v53, 0.0 }
 0x3fa   : > { %v3169_v54 = vpop.f32.mrf.mxu0 }
 0x3fb   : > { %v3170_v19 = vadd.f32 %v3169_v54, %v7424_v1  ;;  %v3325_v24 = vmax.f32 %v3168_v36, 0.0  ;;  %v6018_v36 = vld [vmem:[#allocation16 + $0x44] ss:$24 sps:$4 sm:$0xff]  }
 0x3fc   : > { %v3171_v44 = vpop.f32.mrf.mxu0 }
 0x3fd   : > { %v3172_v58 = vadd.f32 %v3171_v44, %v7421_v57  ;;  %v3326_v48 = vmax.f32 %v3170_v19, 0.0 }
 0x3fe   : > { %v3175_v55 = vpop.f32.mrf.mxu0 }
 0x3ff   : > { %v3327_v31 = vmax.f32 %v3172_v58, 0.0  ;;  %v7432_v59 = vpack.c.bf16 %v3326_v48, %v3324_v30  ;;  %v3176_v23 = vadd.f32 %v3175_v55, %v7424_v1  ;;  %v6016_v55 = vld [vmem:[#allocation16 + $0x40] ss:$24 sps:$4 sm:$0xff]   ;;  %v6021_v30 = vld [vmem:[#allocation16 + $0x14] ss:$24 sps:$4 sm:$0xff]  }
 0x400   : > { %v3177_v15 = vpop.f32.mrf.mxu0 }
 0x401   : > { %v7430_v27 = vpack.c.bf16 %v3327_v31, %v3325_v24  ;;  %v3178_v46 = vadd.f32 %v3177_v15, %v7421_v57  ;;  %v3328_v20 = vmax.f32 %v3176_v23, 0.0 }
 0x402   : > { %v3179_v61 = vpop.f32.mrf.mxu0 }
 0x403   : > { %v3180_v32 = vadd.f32 %v3179_v61, %v7424_v1  ;;  %4060 = vmatprep.mubr.bf16.mxu1 %v7430_v27  ;;  %4253 = vmatprep.mubr.bf16.mxu0 %v7430_v27  ;;  %v3329_v13 = vmax.f32 %v3178_v46, 0.0 }
 0x404   : > { %v3181_v17 = vpop.f32.mrf.mxu0  ;;  %4061 = vmatmul.mubr.bf16.vlgmr.msra.gmra.mxu1 %v7432_v59  ;;  %4254 = vmatmul.mubr.bf16.vlgmr.msra.gmra.mxu0 %v7432_v59 }
 0x405   : > { %v3182_v45 = vadd.f32 %v3181_v17, %v7421_v57  ;;  %4415 = vmatpush1.bf16.msra.mxu1 %v5998_v37  ;;  %v3330_v47 = vmax.f32 %v3180_v32, 0.0  ;;  %v6019_v32 = vld [vmem:[#allocation16 + $0x10] ss:$24 sps:$4 sm:$0xff]  }
 0x406   : > { %v3185_v29 = vpop.f32.mrf.mxu0  ;;  %4416 = vmatprep.subr.bf16.mxu1 %v6003_v25 }
 0x407   : > { %v3331_v41 = vmax.f32 %v3182_v45, 0.0  ;;  %v7444_v38 = vpack.c.bf16 %v3330_v47, %v3328_v20  ;;  %v3186_v51 = vadd.f32 %v3185_v29, %v7424_v1  ;;  %v6024_v45 = vld [vmem:[#allocation16 + $0x2e4] ss:$24 sps:$4 sm:$0xff]  }
 0x408   : > { %v3187_v21 = vpop.f32.mrf.mxu0 }
 0x409   : > { %v7442_v14 = vpack.c.bf16 %v3331_v41, %v3329_v13  ;;  %4417 = vmatpush1.bf16.msra.mxu1 %v6001_v8  ;;  %v3188_v62 = vadd.f32 %v3187_v21, %v7421_v57  ;;  %v3332_v4 = vmax.f32 %v3186_v51, 0.0  ;;  %v6022_v41 = vld [vmem:[#allocation16 + $0x2e0] ss:$24 sps:$4 sm:$0xff]  }
 0x40a   : > { %v3189_v56 = vpop.f32.mrf.mxu0  ;;  %4418 = vmatprep.subr.bf16.mxu1 %v6006_v2 }
 0x40b   : > { %v3190_v60 = vadd.f32 %v3189_v56, %v7424_v1  ;;  %4070 = vmatprep.mubr.bf16.mxu1 %v7442_v14  ;;  %4263 = vmatprep.mubr.bf16.mxu0 %v7442_v14  ;;  %v3333_v5 = vmax.f32 %v3188_v62, 0.0 }
 0x40c   : > { %v3191_v11 = vpop.f32.mrf.mxu0  ;;  %4071 = vmatmul.mubr.bf16.gmra.mxu1 %v7444_v38  ;;  %4264 = vmatmul.mubr.bf16.gmra.mxu0 %v7444_v38 }
 0x40d   : > { %v3192_v39 = vadd.f32 %v3191_v11, %v7421_v57  ;;  %4419 = vmatpush1.bf16.msra.mxu1 %v6004_v42  ;;  %v3334_v35 = vmax.f32 %v3190_v60, 0.0  ;;  %v6027_v42 = vld [vmem:[#allocation16 + $0x2b4] ss:$24 sps:$4 sm:$0xff]   ;;  %v6025_v11 = vld [vmem:[#allocation16 + $0x2b0] ss:$24 sps:$4 sm:$0xff]  }
 0x40e   : > { %v3195_v50 = vpop.f32.mrf.mxu0  ;;  %4420 = vmatprep.subr.bf16.mxu1 %v6009_v0 }
 0x40f   : > { %v3335_v9 = vmax.f32 %v3192_v39, 0.0  ;;  %v7456_v34 = vpack.c.bf16 %v3334_v35, %v3332_v4  ;;  %v3196_v6 = vadd.f32 %v3195_v50, %v7424_v1  ;;  %v6030_v35 = vld [vmem:[#allocation16 + $0x284] ss:$24 sps:$4 sm:$0xff]  }
 0x410   : > { %v3197_v52 = vpop.f32.mrf.mxu0 }
 0x411   : > { %v7454_v3 = vpack.c.bf16 %v3335_v9, %v3333_v5  ;;  %4421 = vmatpush1.bf16.msra.mxu1 %v6007_v49  ;;  %v3198_v43 = vadd.f32 %v3197_v52, %v7421_v57  ;;  %v3336_v44 = vmax.f32 %v3196_v6, 0.0  ;;  %v6028_v52 = vld [vmem:[#allocation16 + $0x280] ss:$24 sps:$4 sm:$0xff]  }
 0x412   : > { %v3199_v18 = vpop.f32.mrf.mxu0  ;;  %4422 = vmatprep.subr.bf16.mxu1 %v6012_v33 }
 0x413   : > { %v3200_v7 = vadd.f32 %v3199_v18, %v7424_v1  ;;  %4080 = vmatprep.mubr.bf16.mxu1 %v7454_v3  ;;  %4273 = vmatprep.mubr.bf16.mxu0 %v7454_v3  ;;  %v3337_v19 = vmax.f32 %v3198_v43, 0.0 }
 0x414   : > { %v3201_v63 = vpop.f32.mrf.mxu0  ;;  %4081 = vmatmul.mubr.bf16.gmra.mxu1 %v7456_v34  ;;  %4274 = vmatmul.mubr.bf16.gmra.mxu0 %v7456_v34 }
 0x415   : > { %v3202_v12 = vadd.f32 %v3201_v63, %v7421_v57  ;;  %4423 = vmatpush1.bf16.msra.mxu1 %v6010_v28  ;;  %v3338_v10 = vmax.f32 %v3200_v7, 0.0 }
 0x416   : > { %v3205_v54 = vpop.f32.mrf.mxu0  ;;  %4424 = vmatprep.subr.bf16.mxu1 %v6015_v40  ;;  %v6033_v40 = vld [vmem:[#allocation16 + $0x254] ss:$24 sps:$4 sm:$0xff]  }
 0x417   : > { %v3339_v53 = vmax.f32 %v3202_v12, 0.0  ;;  %v7468_v24 = vpack.c.bf16 %v3338_v10, %v3336_v44  ;;  %v3206_v61 = vadd.f32 %v3205_v54, %v7424_v1 }
 0x418   : > { %v3207_v58 = vpop.f32.mrf.mxu0 }
 0x419   : > { %v7466_v48 = vpack.c.bf16 %v3339_v53, %v3337_v19  ;;  %4425 = vmatpush1.bf16.msra.mxu1 %v6013_v16  ;;  %v3208_v15 = vadd.f32 %v3207_v58, %v7421_v57  ;;  %v3340_v29 = vmax.f32 %v3206_v61, 0.0  ;;  %v6031_v16 = vld [vmem:[#allocation16 + $0x250] ss:$24 sps:$4 sm:$0xff]  }
 0x41a   : > { %v3209_v31 = vpop.f32.mrf.mxu0  ;;  %4426 = vmatprep.subr.bf16.mxu1 %v6018_v36  ;;  %v6036_v36 = vld [vmem:[#allocation16 + $0x224] ss:$24 sps:$4 sm:$0xff]  }
 0x41b   : > { %v3210_v37 = vadd.f32 %v3209_v31, %v7424_v1  ;;  %4090 = vmatprep.mubr.bf16.mxu1 %v7466_v48  ;;  %4283 = vmatprep.mubr.bf16.mxu0 %v7466_v48  ;;  %v3341_v8 = vmax.f32 %v3208_v15, 0.0  ;;  %v6034_v31 = vld [vmem:[#allocation16 + $0x220] ss:$24 sps:$4 sm:$0xff]  }
 0x41c   : > { %v3211_v25 = vpop.f32.mrf.mxu0  ;;  %4091 = vmatmul.mubr.bf16.gmra.mxu1 %v7468_v24  ;;  %4284 = vmatmul.mubr.bf16.gmra.mxu0 %v7468_v24 }
 0x41d   : > { %v3212_v46 = vadd.f32 %v3211_v25, %v7421_v57  ;;  %4427 = vmatpush1.bf16.msra.mxu1 %v6016_v55  ;;  %v3342_v23 = vmax.f32 %v3210_v37, 0.0  ;;  %v6039_v37 = vld [vmem:[#allocation16 + $0x1f4] ss:$24 sps:$4 sm:$0xff]  }
 0x41e   : > { %v3215_v17 = vpop.f32.mrf.mxu0  ;;  %4428 = vmatprep.subr.bf16.mxu1 %v6021_v30 }
 0x41f   : > { %v3343_v47 = vmax.f32 %v3212_v46, 0.0  ;;  %v7480_v20 = vpack.c.bf16 %v3342_v23, %v3340_v29  ;;  %v3216_v62 = vadd.f32 %v3215_v17, %v7424_v1  ;;  %v6037_v17 = vld [vmem:[#allocation16 + $0x1f0] ss:$24 sps:$4 sm:$0xff]  }
 0x420   : > { %v3217_v2 = vpop.f32.mrf.mxu0 }
 0x421   : > { %v7478_v13 = vpack.c.bf16 %v3343_v47, %v3341_v8  ;;  %4429 = vmatpush1.bf16.msra.mxu1 %v6019_v32  ;;  %v3218_v56 = vadd.f32 %v3217_v2, %v7421_v57  ;;  %v3344_v5 = vmax.f32 %v3216_v62, 0.0  ;;  %v6042_v47 = vld [vmem:[#allocation16 + $0x1c4] ss:$24 sps:$4 sm:$0xff]  }
 0x422   : > { %v3219_v21 = vpop.f32.mrf.mxu0  ;;  %4430 = vmatprep.subr.bf16.mxu1 %v6024_v45 }
 0x423   : > { %v3220_v0 = vadd.f32 %v3219_v21, %v7424_v1  ;;  %4100 = vmatprep.mubr.bf16.mxu1 %v7478_v13  ;;  %4293 = vmatprep.mubr.bf16.mxu0 %v7478_v13  ;;  %v3345_v50 = vmax.f32 %v3218_v56, 0.0  ;;  %v6040_v56 = vld [vmem:[#allocation16 + $0x1c0] ss:$24 sps:$4 sm:$0xff]  }
 0x424   : > { %v3221_v60 = vpop.f32.mrf.mxu0  ;;  %4101 = vmatmul.mubr.bf16.gmra.mxu1 %v7480_v20  ;;  %4294 = vmatmul.mubr.bf16.gmra.mxu0 %v7480_v20 }
 0x425   : > { %v3222_v51 = vadd.f32 %v3221_v60, %v7421_v57  ;;  %4431 = vmatpush2.bf16.msra.mxu1 %v6022_v41  ;;  %v3346_v39 = vmax.f32 %v3220_v0, 0.0  ;;  %v6045_v60 = vld [vmem:[#allocation16 + $0x194] ss:$24 sps:$4 sm:$0xff]  }
 0x426   : > { %v3225_v49 = vpop.f32.mrf.mxu0  ;;  %4432 = vmatprep.subr.bf16.mxu1 %v6027_v42 }
 0x427   : > { %v3347_v33 = vmax.f32 %v3222_v51, 0.0  ;;  %v7492_v28 = vpack.c.bf16 %v3346_v39, %v3344_v5  ;;  %v3226_v6 = vadd.f32 %v3225_v49, %v7424_v1 }
 0x428   : > { %v3227_v9 = vpop.f32.mrf.mxu0 }
 0x429   : > { %v7490_v4 = vpack.c.bf16 %v3347_v33, %v3345_v50  ;;  %4433 = vmatpush2.bf16.msra.mxu1 %v6025_v11  ;;  %v3228_v43 = vadd.f32 %v3227_v9, %v7421_v57  ;;  %v3348_v44 = vmax.f32 %v3226_v6, 0.0  ;;  %v6043_v50 = vld [vmem:[#allocation16 + $0x190] ss:$24 sps:$4 sm:$0xff]  }
 0x42a   : > { %v3229_v18 = vpop.f32.mrf.mxu0  ;;  %4434 = vmatprep.subr.bf16.mxu1 %v6030_v35 }
 0x42b   : > { %v3230_v7 = vadd.f32 %v3229_v18, %v7424_v1  ;;  %4110 = vmatprep.mubr.bf16.mxu1 %v7490_v4  ;;  %4303 = vmatprep.mubr.bf16.mxu0 %v7490_v4  ;;  %v3349_v19 = vmax.f32 %v3228_v43, 0.0 }
 0x42c   : > { %v3231_v63 = vpop.f32.mrf.mxu0  ;;  %4111 = vmatmul.mubr.bf16.gmra.mxu1 %v7492_v28  ;;  %4304 = vmatmul.mubr.bf16.gmra.mxu0 %v7492_v28 }
 0x42d   : > { %v3232_v12 = vadd.f32 %v3231_v63, %v7421_v57  ;;  %4435 = vmatpush2.bf16.msra.mxu1 %v6028_v52  ;;  %v3350_v10 = vmax.f32 %v3230_v7, 0.0 }
 0x42e   : > { %v3235_v54 = vpop.f32.mrf.mxu0  ;;  %4436 = vmatprep.subr.bf16.mxu1 %v6033_v40 }
 0x42f   : > { %v3351_v53 = vmax.f32 %v3232_v12, 0.0  ;;  %v7504_v30 = vpack.c.bf16 %v3350_v10, %v3348_v44  ;;  %v3236_v46 = vadd.f32 %v3235_v54, %v7424_v1 }
 0x430   : > { %v3237_v58 = vpop.f32.mrf.mxu0 }
 0x431   : > { %v7502_v55 = vpack.c.bf16 %v3351_v53, %v3349_v19  ;;  %4437 = vmatpush2.bf16.msra.mxu1 %v6031_v16  ;;  %v3238_v61 = vadd.f32 %v3237_v58, %v7421_v57  ;;  %v3352_v41 = vmax.f32 %v3236_v46, 0.0 }
 0x432   : > { %v3239_v15 = vpop.f32.mrf.mxu0  ;;  %4438 = vmatprep.subr.bf16.mxu1 %v6036_v36 }
 0x433   : > { %v3240_v25 = vadd.f32 %v3239_v15, %v7424_v1  ;;  %4120 = vmatprep.mubr.bf16.mxu1 %v7502_v55  ;;  %4313 = vmatprep.mubr.bf16.mxu0 %v7502_v55  ;;  %v3353_v29 = vmax.f32 %v3238_v61, 0.0 }
 0x434   : > { %v3241_v32 = vpop.f32.mrf.mxu0  ;;  %4121 = vmatmul.mubr.bf16.gmra.mxu1 %v7504_v30  ;;  %4314 = vmatmul.mubr.bf16.gmra.mxu0 %v7504_v30 }
 0x435   : > { %v3242_v23 = vadd.f32 %v3241_v32, %v7421_v57  ;;  %4439 = vmatpush2.bf16.msra.mxu1 %v6034_v31  ;;  %v3354_v45 = vmax.f32 %v3240_v25, 0.0 }
 0x436   : > { %v3245_v8 = vpop.f32.mrf.mxu0  ;;  %4440 = vmatprep.subr.bf16.mxu1 %v6039_v37 }
 0x437   : > { %v3355_v2 = vmax.f32 %v3242_v23, 0.0  ;;  %v7516_v0 = vpack.c.bf16 %v3354_v45, %v3352_v41  ;;  %v3246_v39 = vadd.f32 %v3245_v8, %v7424_v1 }
 0x438   : > { %v3247_v21 = vpop.f32.mrf.mxu0 }
 0x439   : > { %v7514_v42 = vpack.c.bf16 %v3355_v2, %v3353_v29  ;;  %4441 = vmatpush2.bf16.msra.mxu1 %v6037_v17  ;;  %v3248_v51 = vadd.f32 %v3247_v21, %v7421_v57  ;;  %v3356_v18 = vmax.f32 %v3246_v39, 0.0 }
 0x43a   : > { %v3249_v62 = vpop.f32.mrf.mxu0  ;;  %4442 = vmatprep.subr.bf16.mxu1 %v6042_v47 }
 0x43b   : > { %v3250_v11 = vadd.f32 %v3249_v62, %v7424_v1  ;;  %4130 = vmatprep.mubr.bf16.mxu1 %v7514_v42  ;;  %4323 = vmatprep.mubr.bf16.mxu0 %v7514_v42  ;;  %v3357_v9 = vmax.f32 %v3248_v51, 0.0 }
 0x43c   : > { %v3251_v49 = vpop.f32.mrf.mxu0  ;;  %4131 = vmatmul.mubr.bf16.gmra.mxu1 %v7516_v0  ;;  %4324 = vmatmul.mubr.bf16.gmra.mxu0 %v7516_v0 }
 0x43d   : > { %v3252_v35 = vadd.f32 %v3251_v49, %v7421_v57  ;;  %4443 = vmatpush2.bf16.msra.mxu1 %v6040_v56  ;;  %v3358_v33 = vmax.f32 %v3250_v11, 0.0 }
 0x43e   : > { %v3255_v5 = vpop.f32.mrf.mxu0  ;;  %4444 = vmatprep.subr.bf16.mxu1 %v6045_v60 }
 0x43f   : > { %v3359_v52 = vmax.f32 %v3252_v35, 0.0  ;;  %v7528_v7 = vpack.c.bf16 %v3358_v33, %v3356_v18  ;;  %v3256_v16 = vadd.f32 %v3255_v5, %v7424_v1 }
 0x440   : > { %v3257_v40 = vpop.f32.mrf.mxu0 }
 0x441   : > { %v7526_v43 = vpack.c.bf16 %v3359_v52, %v3357_v9  ;;  %4445 = vmatpush2.bf16.msra.mxu1 %v6043_v50  ;;  %v3258_v63 = vadd.f32 %v3257_v40, %v7421_v57  ;;  %v3360_v58 = vmax.f32 %v3256_v16, 0.0 }
 0x442   : > { %v3259_v6 = vpop.f32.mrf.mxu0 }
 0x443   : > { %v3260_v12 = vadd.f32 %v3259_v6, %v7424_v1  ;;  %4140 = vmatprep.mubr.bf16.mxu1 %v7526_v43  ;;  %4333 = vmatprep.mubr.bf16.mxu0 %v7526_v43  ;;  %v3361_v53 = vmax.f32 %v3258_v63, 0.0 }
 0x444   : > { %v3261_v10 = vpop.f32.mrf.mxu0  ;;  %4141 = vmatmul.mubr.bf16.gmra.mxu1 %v7528_v7  ;;  %4334 = vmatmul.mubr.bf16.gmra.mxu0 %v7528_v7 }
 0x445   : > { %v3262_v54 = vadd.f32 %v3261_v10, %v7421_v57  ;;  %v3362_v36 = vmax.f32 %v3260_v12, 0.0 }
 0x446   : > { %v3265_v19 = vpop.f32.mrf.mxu0 }
 0x447   : > { %v3363_v44 = vmax.f32 %v3262_v54, 0.0  ;;  %v7540_v37 = vpack.c.bf16 %v3362_v36, %v3360_v58  ;;  %v3266_v32 = vadd.f32 %v3265_v19, %v7424_v1 }
 0x448   : > { %v3267_v31 = vpop.f32.mrf.mxu0 }
 0x449   : > { %v7538_v15 = vpack.c.bf16 %v3363_v44, %v3361_v53  ;;  %v3268_v25 = vadd.f32 %v3267_v31, %v7421_v57  ;;  %v3364_v2 = vmax.f32 %v3266_v32, 0.0 }
 0x44a   : > { %v3269_v61 = vpop.f32.mrf.mxu0 }
 0x44b   : > { %v3270_v46 = vadd.f32 %v3269_v61, %v7424_v1  ;;  %4150 = vmatprep.mubr.bf16.mxu1 %v7538_v15  ;;  %4343 = vmatprep.mubr.bf16.mxu0 %v7538_v15  ;;  %v3365_v47 = vmax.f32 %v3268_v25, 0.0 }
 0x44c   : > { %v3271_v23 = vpop.f32.mrf.mxu0  ;;  %4151 = vmatmul.mubr.bf16.gmra.mxu1 %v7540_v37  ;;  %4344 = vmatmul.mubr.bf16.gmra.mxu0 %v7540_v37 }
 0x44d   : > { %v3272_v17 = vadd.f32 %v3271_v23, %v7421_v57  ;;  %v3366_v45 = vmax.f32 %v3270_v46, 0.0 }
 0x44e   : > { %v3275_v8 = vpop.f32.mrf.mxu0 }
 0x44f   : > { %v3367_v29 = vmax.f32 %v3272_v17, 0.0  ;;  %v7552_v56 = vpack.c.bf16 %v3366_v45, %v3364_v2  ;;  %v3276_v11 = vadd.f32 %v3275_v8, %v7424_v1 }
 0x450   : > { %v3277_v41 = vpop.f32.mrf.mxu0 }
 0x451   : > { %v7550_v21 = vpack.c.bf16 %v3367_v29, %v3365_v47  ;;  %v3278_v60 = vadd.f32 %v3277_v41, %v7421_v57  ;;  %v3368_v9 = vmax.f32 %v3276_v11, 0.0 }
 0x452   : > { %v3279_v62 = vpop.f32.mrf.mxu0 }
 0x453   : > { %v3280_v51 = vadd.f32 %v3279_v62, %v7424_v1  ;;  %4160 = vmatprep.mubr.bf16.mxu1 %v7550_v21  ;;  %4353 = vmatprep.mubr.bf16.mxu0 %v7550_v21  ;;  %v3369_v33 = vmax.f32 %v3278_v60, 0.0 }
 0x454   : > { %v3281_v39 = vpop.f32.mrf.mxu0  ;;  %4161 = vmatmul.mubr.bf16.gmra.mxu1 %v7552_v56  ;;  %4354 = vmatmul.mubr.bf16.gmra.mxu0 %v7552_v56 }
 0x455   : > { %v3282_v49 = vadd.f32 %v3281_v39, %v7421_v57  ;;  %v3370_v35 = vmax.f32 %v3280_v51, 0.0 }
 0x456   : > { %v3285_v50 = vpop.f32.mrf.mxu0 }
 0x457   : > { %v3371_v5 = vmax.f32 %v3282_v49, 0.0  ;;  %v7564_v40 = vpack.c.bf16 %v3370_v35, %v3368_v9  ;;  %v3286_v16 = vadd.f32 %v3285_v50, %v7424_v1 }
 0x458   : > { %v3287_v52 = vpop.f32.mrf.mxu0 }
 0x459   : > { %v7562_v18 = vpack.c.bf16 %v3371_v5, %v3369_v33  ;;  %v3288_v63 = vadd.f32 %v3287_v52, %v7421_v57  ;;  %v3372_v58 = vmax.f32 %v3286_v16, 0.0 }
 0x45a   : > { %v3289_v6 = vpop.f32.mrf.mxu0 }
 0x45b   : > { %v3290_v12 = vadd.f32 %v3289_v6, %v7424_v1  ;;  %4170 = vmatprep.mubr.bf16.mxu1 %v7562_v18  ;;  %4363 = vmatprep.mubr.bf16.mxu0 %v7562_v18  ;;  %v3373_v53 = vmax.f32 %v3288_v63, 0.0 }
 0x45c   : > { %v3291_v10 = vpop.f32.mrf.mxu0  ;;  %4171 = vmatmul.mubr.bf16.gmra.mxu1 %v7564_v40  ;;  %4364 = vmatmul.mubr.bf16.gmra.mxu0 %v7564_v40 }
 0x45d   : > { %v3292_v54 = vadd.f32 %v3291_v10, %v7421_v57  ;;  %v3374_v36 = vmax.f32 %v3290_v12, 0.0 }
 0x45e   : > { %v3295_v19 = vpop.f32.mrf.mxu0 }
 0x45f   : > { %v3375_v44 = vmax.f32 %v3292_v54, 0.0  ;;  %v7576_v25 = vpack.c.bf16 %v3374_v36, %v3372_v58  ;;  %v3296_v17 = vadd.f32 %v3295_v19, %v7424_v1 }
 0x460   : > { %v3297_v31 = vpop.f32.mrf.mxu0 }
 0x461   : > { %v7574_v61 = vpack.c.bf16 %v3375_v44, %v3373_v53  ;;  %v3298_v32 = vadd.f32 %v3297_v31, %v7421_v57  ;;  %v3376_v62 = vmax.f32 %v3296_v17, 0.0 }
 0x462   : > { %v3299_v46 = vpop.f32.mrf.mxu0 }
 0x463   : > { %v3300_v23 = vadd.f32 %v3299_v46, %v7424_v1  ;;  %4180 = vmatprep.mubr.bf16.mxu1 %v7574_v61  ;;  %4373 = vmatprep.mubr.bf16.mxu0 %v7574_v61  ;;  %v3377_v2 = vmax.f32 %v3298_v32, 0.0 }
 0x464   : > { %v3301_v45 = vpop.f32.mrf.mxu0  ;;  %4181 = vmatmul.mubr.bf16.gmra.mxu1 %v7576_v25  ;;  %4374 = vmatmul.mubr.bf16.gmra.mxu0 %v7576_v25 }
 0x465   : > { %v3302_v8 = vadd.f32 %v3301_v45, %v7421_v57  ;;  %v3378_v47 = vmax.f32 %v3300_v23, 0.0 }
 0x466   : > { %v3305_v29 = vpop.f32.mrf.mxu0 }
 0x467   : > { %v3379_v41 = vmax.f32 %v3302_v8, 0.0  ;;  %v7588_v11 = vpack.c.bf16 %v3378_v47, %v3376_v62  ;;  %v3306_v50 = vadd.f32 %v3305_v29, %v7424_v1 }
 0x468   : > { %v3307_v60 = vpop.f32.mrf.mxu0 }
 0x469   : > { %v7586_v51 = vpack.c.bf16 %v3379_v41, %v3377_v2  ;;  %v3308_v49 = vadd.f32 %v3307_v60, %v7421_v57  ;;  %v3380_v12 = vmax.f32 %v3306_v50, 0.0 }
 0x46a   : > { %v3309_v39 = vpop.f32.mrf.mxu0 }
 0x46b   : > { %v3310_v35 = vadd.f32 %v3309_v39, %v7424_v1  ;;  %4190 = vmatprep.mubr.bf16.mxu1 %v7586_v51  ;;  %4383 = vmatprep.mubr.bf16.mxu0 %v7586_v51  ;;  %v3381_v6 = vmax.f32 %v3308_v49, 0.0 }
 0x46c   : > { %v3311_v33 = vpop.f32.mrf.mxu0  ;;  %4191 = vmatmul.mubr.bf16.gmra.mxu1 %v7588_v11  ;;  %4384 = vmatmul.mubr.bf16.gmra.mxu0 %v7588_v11 }
 0x46d   : > { %v3312_v5 = vadd.f32 %v3311_v33, %v7421_v57  ;;  %v3382_v9 = vmax.f32 %v3310_v35, 0.0 }
 0x46e   : > { %v3315_v52 = vpop.f32.mrf.mxu0 }
 0x46f   : > { %v3383_v63 = vmax.f32 %v3312_v5, 0.0  ;;  %v7600_v54 = vpack.c.bf16 %v3382_v9, %v3380_v12  ;;  %v3316_v44 = vadd.f32 %v3315_v52, %v7424_v1 }
 0x470   : > { %v3317_v16 = vpop.f32.mrf.mxu0 }
 0x471   : > { %v7598_v10 = vpack.c.bf16 %v3383_v63, %v3381_v6  ;;  %v3318_v19 = vadd.f32 %v3317_v16, %v7421_v57  ;;  %v3384_v17 = vmax.f32 %v3316_v44, 0.0 }
 0x472   : > { %v3319_v36 = vpop.f32.mrf.mxu0 }
 0x473   : > { %v3320_v53 = vadd.f32 %v3319_v36, %v7424_v1  ;;  %4200 = vmatprep.mubr.bf16.mxu1 %v7598_v10  ;;  %4393 = vmatprep.mubr.bf16.mxu0 %v7598_v10  ;;  %v3385_v32 = vmax.f32 %v3318_v19, 0.0 }
 0x474   : > { %v3321_v58 = vpop.f32.mrf.mxu0  ;;  %4201 = vmatmul.mubr.bf16.gmra.mxu1 %v7600_v54  ;;  %4394 = vmatmul.mubr.bf16.gmra.mxu0 %v7600_v54 }
 0x475   : > { %v3322_v31 = vadd.f32 %v3321_v58, %v7421_v57  ;;  %v3386_v46 = vmax.f32 %v3320_v53, 0.0  ;;  %v8284_v57 = vld [vmem:[#allocation68_spill] sm:$0xff] }
 0x476   : > { %v3528_v1 = vsub.s32 2, %v8284_v57 }
 0x477   : > { %v3387_v23 = vmax.f32 %v3322_v31, 0.0  ;;  %v7612_v8 = vpack.c.bf16 %v3386_v46, %v3384_v17 }
 0x479   : > { %v7610_v45 = vpack.c.bf16 %v3387_v23, %v3385_v32 }
 0x47b   : > { %4210 = vmatprep.mubr.bf16.mxu1 %v7610_v45  ;;  %4403 = vmatprep.mubr.bf16.mxu0 %v7610_v45 }
 0x47c   : > { %4211 = vmatmul.mubr.bf16.gmra.mxu1 %v7612_v8  ;;  %4404 = vmatmul.mubr.bf16.gmra.mxu0 %v7612_v8 }
 0x47d   : > { %4446 = vmatprep.mubr.bf16.mxu1 %v7430_v27  ;;  %v7636_v27 = vld [vmem:[#allocation17] sm:$0x3f] }
 0x484   : > { %4447 = vmatmul.mubr.bf16.vlgmr.msra.gmra.mxu1 %v7432_v59  ;;  %v3532_v59 = vsub.s32 3, %v8284_v57 }
 0x485   : > { %4456 = vmatprep.mubr.bf16.mxu1 %v7442_v14  ;;  %v7642_v14 = vrot.slane %v7636_v27, %v8283_v26 }
 0x48c   : > { %4457 = vmatmul.mubr.bf16.gmra.mxu1 %v7444_v38  ;;  %v7645_v38 = vrot.slane %v7636_v27, %v3528_v1 }
 0x48d   : > { %4466 = vmatprep.mubr.bf16.mxu1 %v7454_v3  ;;  %v7649_v3 = vrot.slane %v7636_v27, %v8282_v22 }
 0x494   : > { %4467 = vmatmul.mubr.bf16.gmra.mxu1 %v7456_v34  ;;  %v7652_v34 = vrot.slane %v7636_v27, %v3532_v59 }
 0x495   : > { %4476 = vmatprep.mubr.bf16.mxu1 %v7466_v48 }
 0x49c   : > { %4477 = vmatmul.mubr.bf16.gmra.mxu1 %v7468_v24 }
 0x49d   : > { %4486 = vmatprep.mubr.bf16.mxu1 %v7478_v13 }
 0x4a4   : > { %4487 = vmatmul.mubr.bf16.gmra.mxu1 %v7480_v20 }
 0x4a5   : > { %4496 = vmatprep.mubr.bf16.mxu1 %v7490_v4 }
 0x4ac   : > { %4497 = vmatmul.mubr.bf16.gmra.mxu1 %v7492_v28 }
 0x4ad   : > { %4506 = vmatprep.mubr.bf16.mxu1 %v7502_v55 }
 0x4b4   : > { %4507 = vmatmul.mubr.bf16.gmra.mxu1 %v7504_v30 }
 0x4b5   : > { %4516 = vmatprep.mubr.bf16.mxu1 %v7514_v42 }
 0x4bc   : > { %4517 = vmatmul.mubr.bf16.gmra.mxu1 %v7516_v0 }
 0x4bd   : > { %4526 = vmatprep.mubr.bf16.mxu1 %v7526_v43 }
 0x4c4   : > { %v4062_v48 = vpop.f32.mrf.mxu1  ;;  %v4255_v24 = vpop.f32.mrf.mxu0  ;;  %4527 = vmatmul.mubr.bf16.gmra.mxu1 %v7528_v7 }
 0x4c5   : > { %v4063_v13 = vadd.f32 %v4062_v48, %v7642_v14  ;;  %v4256_v20 = vadd.f32 %v4255_v24, %v7645_v38  ;;  %4536 = vmatprep.mubr.bf16.mxu1 %v7538_v15 }
 0x4c6   : > { %v4064_v26 = vpop.f32.mrf.mxu1  ;;  %v4257_v4 = vpop.f32.mrf.mxu0 }
 0x4c7   : > { %4607 = vst [vmem:[%s7658_s26] sm:$0xff] %v4063_v13  ;;  %4609 = vst [vmem:[%s7658_s26 + $0x10] sm:$0xff] %v4256_v20  ;;  %v4065_v22 = vadd.f32 %v4064_v26, %v7649_v3  ;;  %v4258_v28 = vadd.f32 %v4257_v4, %v7652_v34 }
 0x4c8   : > { %v4066_v55 = vpop.f32.mrf.mxu1  ;;  %v4259_v30 = vpop.f32.mrf.mxu0 }
 0x4c9   : > { %4608 = vst [vmem:[%s7658_s26 + $0x8] sm:$0xff] %v4065_v22  ;;  %4610 = vst [vmem:[%s7658_s26 + $0x18] sm:$0xff] %v4258_v28  ;;  %v4067_v42 = vadd.f32 %v4066_v55, %v7642_v14  ;;  %v4260_v0 = vadd.f32 %v4259_v30, %v7645_v38 }
 0x4ca   : > { %v4068_v43 = vpop.f32.mrf.mxu1  ;;  %v4261_v7 = vpop.f32.mrf.mxu0 }
 0x4cb   : > { %4613 = vst [vmem:[%s7658_s26 + $0x30] sm:$0xff] %v4067_v42  ;;  %4615 = vst [vmem:[%s7658_s26 + $0x40] sm:$0xff] %v4260_v0  ;;  %v4069_v15 = vadd.f32 %v4068_v43, %v7649_v3  ;;  %v4262_v47 = vadd.f32 %v4261_v7, %v7652_v34 }
 0x4cc   : > { %v4072_v29 = vpop.f32.mrf.mxu1  ;;  %v4265_v2 = vpop.f32.mrf.mxu0  ;;  %4537 = vmatmul.mubr.bf16.gmra.mxu1 %v7540_v37 }
 0x4cd   : > { %4614 = vst [vmem:[%s7658_s26 + $0x38] sm:$0xff] %v4069_v15  ;;  %4616 = vst [vmem:[%s7658_s26 + $0x48] sm:$0xff] %v4262_v47  ;;  %v4073_v41 = vadd.f32 %v4072_v29, %v7642_v14  ;;  %v4266_v62 = vadd.f32 %v4265_v2, %v7645_v38  ;;  %4546 = vmatprep.mubr.bf16.mxu1 %v7550_v21 }
 0x4ce   : > { %v4074_v60 = vpop.f32.mrf.mxu1  ;;  %v4267_v39 = vpop.f32.mrf.mxu0 }
 0x4cf   : > { %4619 = vst [vmem:[%s7658_s26 + $0x60] sm:$0xff] %v4073_v41  ;;  %4621 = vst [vmem:[%s7658_s26 + $0x70] sm:$0xff] %v4266_v62  ;;  %v4075_v49 = vadd.f32 %v4074_v60, %v7649_v3  ;;  %v4268_v35 = vadd.f32 %v4267_v39, %v7652_v34 }
 0x4d0   : > { %v4076_v37 = vpop.f32.mrf.mxu1  ;;  %v4269_v50 = vpop.f32.mrf.mxu0 }
 0x4d1   : > { %4620 = vst [vmem:[%s7658_s26 + $0x68] sm:$0xff] %v4075_v49  ;;  %4622 = vst [vmem:[%s7658_s26 + $0x78] sm:$0xff] %v4268_v35  ;;  %v4077_v33 = vadd.f32 %v4076_v37, %v7642_v14  ;;  %v4270_v5 = vadd.f32 %v4269_v50, %v7645_v38 }
 0x4d2   : > { %v4078_v21 = vpop.f32.mrf.mxu1  ;;  %v4271_v9 = vpop.f32.mrf.mxu0 }
 0x4d3   : > { %4625 = vst [vmem:[%s7658_s26 + $0x90] sm:$0xff] %v4077_v33  ;;  %4627 = vst [vmem:[%s7658_s26 + $0xa0] sm:$0xff] %v4270_v5  ;;  %v4079_v52 = vadd.f32 %v4078_v21, %v7649_v3  ;;  %v4272_v6 = vadd.f32 %v4271_v9, %v7652_v34 }
 0x4d4   : > { %v4082_v63 = vpop.f32.mrf.mxu1  ;;  %v4275_v12 = vpop.f32.mrf.mxu0  ;;  %4547 = vmatmul.mubr.bf16.gmra.mxu1 %v7552_v56 }
 0x4d5   : > { %4626 = vst [vmem:[%s7658_s26 + $0x98] sm:$0xff] %v4079_v52  ;;  %4628 = vst [vmem:[%s7658_s26 + $0xa8] sm:$0xff] %v4272_v6  ;;  %v4083_v16 = vadd.f32 %v4082_v63, %v7642_v14  ;;  %v4276_v36 = vadd.f32 %v4275_v12, %v7645_v38  ;;  %4556 = vmatprep.mubr.bf16.mxu1 %v7562_v18 }
 0x4d6   : > { %v4084_v19 = vpop.f32.mrf.mxu1  ;;  %v4277_v53 = vpop.f32.mrf.mxu0 }
 0x4d7   : > { %4631 = vst [vmem:[%s7658_s26 + $0xc0] sm:$0xff] %v4083_v16  ;;  %4633 = vst [vmem:[%s7658_s26 + $0xd0] sm:$0xff] %v4276_v36  ;;  %v4085_v44 = vadd.f32 %v4084_v19, %v7649_v3  ;;  %v4278_v58 = vadd.f32 %v4277_v53, %v7652_v34 }
 0x4d8   : > { %v4086_v56 = vpop.f32.mrf.mxu1  ;;  %v4279_v31 = vpop.f32.mrf.mxu0 }
 0x4d9   : > { %4632 = vst [vmem:[%s7658_s26 + $0xc8] sm:$0xff] %v4085_v44  ;;  %4634 = vst [vmem:[%s7658_s26 + $0xd8] sm:$0xff] %v4278_v58  ;;  %v4087_v46 = vadd.f32 %v4086_v56, %v7642_v14  ;;  %v4280_v32 = vadd.f32 %v4279_v31, %v7645_v38 }
 0x4da   : > { %v4088_v18 = vpop.f32.mrf.mxu1  ;;  %v4281_v23 = vpop.f32.mrf.mxu0 }
 0x4db   : > { %4637 = vst [vmem:[%s7658_s26 + $0xf0] sm:$0xff] %v4087_v46  ;;  %4639 = vst [vmem:[%s7658_s26 + $0x100] sm:$0xff] %v4280_v32  ;;  %v4089_v17 = vadd.f32 %v4088_v18, %v7649_v3  ;;  %v4282_v1 = vadd.f32 %v4281_v23, %v7652_v34 }
 0x4dc   : > { %v4092_v59 = vpop.f32.mrf.mxu1  ;;  %v4285_v48 = vpop.f32.mrf.mxu0  ;;  %4557 = vmatmul.mubr.bf16.gmra.mxu1 %v7564_v40 }
 0x4dd   : > { %4638 = vst [vmem:[%s7658_s26 + $0xf8] sm:$0xff] %v4089_v17  ;;  %4640 = vst [vmem:[%s7658_s26 + $0x108] sm:$0xff] %v4282_v1  ;;  %v4093_v24 = vadd.f32 %v4092_v59, %v7642_v14  ;;  %v4286_v13 = vadd.f32 %v4285_v48, %v7645_v38  ;;  %4566 = vmatprep.mubr.bf16.mxu1 %v7574_v61 }
 0x4de   : > { %v4094_v20 = vpop.f32.mrf.mxu1  ;;  %v4287_v26 = vpop.f32.mrf.mxu0 }
 0x4df   : > { %4643 = vst [vmem:[%s7658_s26 + $0x120] sm:$0xff] %v4093_v24  ;;  %4645 = vst [vmem:[%s7658_s26 + $0x130] sm:$0xff] %v4286_v13  ;;  %v4095_v4 = vadd.f32 %v4094_v20, %v7649_v3  ;;  %v4288_v22 = vadd.f32 %v4287_v26, %v7652_v34 }
 0x4e0   : > { %v4096_v40 = vpop.f32.mrf.mxu1  ;;  %v4289_v28 = vpop.f32.mrf.mxu0 }
 0x4e1   : > { %4644 = vst [vmem:[%s7658_s26 + $0x128] sm:$0xff] %v4095_v4  ;;  %4646 = vst [vmem:[%s7658_s26 + $0x138] sm:$0xff] %v4288_v22  ;;  %v4097_v55 = vadd.f32 %v4096_v40, %v7642_v14  ;;  %v4290_v30 = vadd.f32 %v4289_v28, %v7645_v38 }
 0x4e2   : > { %v4098_v61 = vpop.f32.mrf.mxu1  ;;  %v4291_v42 = vpop.f32.mrf.mxu0 }
 0x4e3   : > { %4649 = vst [vmem:[%s7658_s26 + $0x150] sm:$0xff] %v4097_v55  ;;  %4651 = vst [vmem:[%s7658_s26 + $0x160] sm:$0xff] %v4290_v30  ;;  %v4099_v0 = vadd.f32 %v4098_v61, %v7649_v3  ;;  %v4292_v43 = vadd.f32 %v4291_v42, %v7652_v34 }
 0x4e4   : > { %v4102_v7 = vpop.f32.mrf.mxu1  ;;  %v4295_v15 = vpop.f32.mrf.mxu0  ;;  %4567 = vmatmul.mubr.bf16.gmra.mxu1 %v7576_v25 }
 0x4e5   : > { %4650 = vst [vmem:[%s7658_s26 + $0x158] sm:$0xff] %v4099_v0  ;;  %4652 = vst [vmem:[%s7658_s26 + $0x168] sm:$0xff] %v4292_v43  ;;  %v4103_v47 = vadd.f32 %v4102_v7, %v7642_v14  ;;  %v4296_v29 = vadd.f32 %v4295_v15, %v7645_v38  ;;  %4576 = vmatprep.mubr.bf16.mxu1 %v7586_v51 }
 0x4e6   : > { %v4104_v2 = vpop.f32.mrf.mxu1  ;;  %v4297_v41 = vpop.f32.mrf.mxu0 }
 0x4e7   : > { %4655 = vst [vmem:[%s7658_s26 + $0x180] sm:$0xff] %v4103_v47  ;;  %4657 = vst [vmem:[%s7658_s26 + $0x190] sm:$0xff] %v4296_v29  ;;  %v4105_v62 = vadd.f32 %v4104_v2, %v7649_v3  ;;  %v4298_v60 = vadd.f32 %v4297_v41, %v7652_v34 }
 0x4e8   : > { %v4106_v25 = vpop.f32.mrf.mxu1  ;;  %v4299_v39 = vpop.f32.mrf.mxu0 }
 0x4e9   : > { %4656 = vst [vmem:[%s7658_s26 + $0x188] sm:$0xff] %v4105_v62  ;;  %4658 = vst [vmem:[%s7658_s26 + $0x198] sm:$0xff] %v4298_v60  ;;  %v4107_v49 = vadd.f32 %v4106_v25, %v7642_v14  ;;  %v4300_v35 = vadd.f32 %v4299_v39, %v7645_v38 }
 0x4ea   : > { %v4108_v51 = vpop.f32.mrf.mxu1  ;;  %v4301_v37 = vpop.f32.mrf.mxu0 }
 0x4eb   : > { %4661 = vst [vmem:[%s7658_s26 + $0x1b0] sm:$0xff] %v4107_v49  ;;  %4663 = vst [vmem:[%s7658_s26 + $0x1c0] sm:$0xff] %v4300_v35  ;;  %v4109_v50 = vadd.f32 %v4108_v51, %v7649_v3  ;;  %v4302_v33 = vadd.f32 %v4301_v37, %v7652_v34 }
 0x4ec   : > { %v4112_v5 = vpop.f32.mrf.mxu1  ;;  %v4305_v21 = vpop.f32.mrf.mxu0  ;;  %4577 = vmatmul.mubr.bf16.gmra.mxu1 %v7588_v11 }
 0x4ed   : > { %4662 = vst [vmem:[%s7658_s26 + $0x1b8] sm:$0xff] %v4109_v50  ;;  %4664 = vst [vmem:[%s7658_s26 + $0x1c8] sm:$0xff] %v4302_v33  ;;  %v4113_v9 = vadd.f32 %v4112_v5, %v7642_v14  ;;  %v4306_v52 = vadd.f32 %v4305_v21, %v7645_v38  ;;  %4586 = vmatprep.mubr.bf16.mxu1 %v7598_v10 }
 0x4ee   : > { %v4114_v6 = vpop.f32.mrf.mxu1  ;;  %v4307_v63 = vpop.f32.mrf.mxu0 }
 0x4ef   : > { %4667 = vst [vmem:[%s7658_s26 + $0x1e0] sm:$0xff] %v4113_v9  ;;  %4669 = vst [vmem:[%s7658_s26 + $0x1f0] sm:$0xff] %v4306_v52  ;;  %v4115_v12 = vadd.f32 %v4114_v6, %v7649_v3  ;;  %v4308_v16 = vadd.f32 %v4307_v63, %v7652_v34 }
 0x4f0   : > { %v4116_v11 = vpop.f32.mrf.mxu1  ;;  %v4309_v36 = vpop.f32.mrf.mxu0 }
 0x4f1   : > { %4668 = vst [vmem:[%s7658_s26 + $0x1e8] sm:$0xff] %v4115_v12  ;;  %4670 = vst [vmem:[%s7658_s26 + $0x1f8] sm:$0xff] %v4308_v16  ;;  %v4117_v19 = vadd.f32 %v4116_v11, %v7642_v14  ;;  %v4310_v53 = vadd.f32 %v4309_v36, %v7645_v38 }
 0x4f2   : > { %v4118_v10 = vpop.f32.mrf.mxu1  ;;  %v4311_v44 = vpop.f32.mrf.mxu0 }
 0x4f3   : > { %4673 = vst [vmem:[%s7658_s26 + $0x210] sm:$0xff] %v4117_v19  ;;  %4675 = vst [vmem:[%s7658_s26 + $0x220] sm:$0xff] %v4310_v53  ;;  %v4119_v58 = vadd.f32 %v4118_v10, %v7649_v3  ;;  %v4312_v56 = vadd.f32 %v4311_v44, %v7652_v34 }
 0x4f4   : > { %v4122_v31 = vpop.f32.mrf.mxu1  ;;  %v4315_v46 = vpop.f32.mrf.mxu0  ;;  %4587 = vmatmul.mubr.bf16.gmra.mxu1 %v7600_v54 }
 0x4f5   : > { %4674 = vst [vmem:[%s7658_s26 + $0x218] sm:$0xff] %v4119_v58  ;;  %4676 = vst [vmem:[%s7658_s26 + $0x228] sm:$0xff] %v4312_v56  ;;  %v4123_v32 = vadd.f32 %v4122_v31, %v7642_v14  ;;  %v4316_v18 = vadd.f32 %v4315_v46, %v7645_v38  ;;  %4596 = vmatprep.mubr.bf16.mxu1 %v7610_v45 }
 0x4f6   : > { %v4124_v23 = vpop.f32.mrf.mxu1  ;;  %v4317_v17 = vpop.f32.mrf.mxu0 }
 0x4f7   : > { %4679 = vst [vmem:[%s7658_s26 + $0x240] sm:$0xff] %v4123_v32  ;;  %4681 = vst [vmem:[%s7658_s26 + $0x250] sm:$0xff] %v4316_v18  ;;  %v4125_v1 = vadd.f32 %v4124_v23, %v7649_v3  ;;  %v4318_v59 = vadd.f32 %v4317_v17, %v7652_v34 }
 0x4f8   : > { %v4126_v54 = vpop.f32.mrf.mxu1  ;;  %v4319_v48 = vpop.f32.mrf.mxu0 }
 0x4f9   : > { %4680 = vst [vmem:[%s7658_s26 + $0x248] sm:$0xff] %v4125_v1  ;;  %4682 = vst [vmem:[%s7658_s26 + $0x258] sm:$0xff] %v4318_v59  ;;  %v4127_v24 = vadd.f32 %v4126_v54, %v7642_v14  ;;  %v4320_v13 = vadd.f32 %v4319_v48, %v7645_v38 }
 0x4fa   : > { %v4128_v45 = vpop.f32.mrf.mxu1  ;;  %v4321_v20 = vpop.f32.mrf.mxu0 }
 0x4fb   : > { %4685 = vst [vmem:[%s7658_s26 + $0x270] sm:$0xff] %v4127_v24  ;;  %4687 = vst [vmem:[%s7658_s26 + $0x280] sm:$0xff] %v4320_v13  ;;  %v4129_v26 = vadd.f32 %v4128_v45, %v7649_v3  ;;  %v4322_v4 = vadd.f32 %v4321_v20, %v7652_v34 }
 0x4fc   : > { %v4132_v22 = vpop.f32.mrf.mxu1  ;;  %v4325_v40 = vpop.f32.mrf.mxu0  ;;  %4597 = vmatmul.mubr.bf16.gmra.mxu1 %v7612_v8 }
 0x4fd   : > { %4686 = vst [vmem:[%s7658_s26 + $0x278] sm:$0xff] %v4129_v26  ;;  %4688 = vst [vmem:[%s7658_s26 + $0x288] sm:$0xff] %v4322_v4  ;;  %v4133_v28 = vadd.f32 %v4132_v22, %v7642_v14  ;;  %v4326_v55 = vadd.f32 %v4325_v40, %v7645_v38 }
 0x4fe   : > { %v4134_v30 = vpop.f32.mrf.mxu1  ;;  %v4327_v61 = vpop.f32.mrf.mxu0 }
 0x4ff   : > { %4691 = vst [vmem:[%s7658_s26 + $0x2a0] sm:$0xff] %v4133_v28  ;;  %4693 = vst [vmem:[%s7658_s26 + $0x2b0] sm:$0xff] %v4326_v55  ;;  %v4135_v42 = vadd.f32 %v4134_v30, %v7649_v3  ;;  %v4328_v0 = vadd.f32 %v4327_v61, %v7652_v34 }
 0x500   : > { %v4136_v43 = vpop.f32.mrf.mxu1  ;;  %v4329_v8 = vpop.f32.mrf.mxu0 }
 0x501   : > { %4692 = vst [vmem:[%s7658_s26 + $0x2a8] sm:$0xff] %v4135_v42  ;;  %4694 = vst [vmem:[%s7658_s26 + $0x2b8] sm:$0xff] %v4328_v0  ;;  %v4137_v7 = vadd.f32 %v4136_v43, %v7642_v14  ;;  %v4330_v15 = vadd.f32 %v4329_v8, %v7645_v38 }
 0x502   : > { %v4138_v47 = vpop.f32.mrf.mxu1  ;;  %v4331_v29 = vpop.f32.mrf.mxu0 }
 0x503   : > { %4697 = vst [vmem:[%s7658_s26 + $0x2d0] sm:$0xff] %v4137_v7  ;;  %4699 = vst [vmem:[%s7658_s26 + $0x2e0] sm:$0xff] %v4330_v15  ;;  %v4139_v2 = vadd.f32 %v4138_v47, %v7649_v3  ;;  %v4332_v41 = vadd.f32 %v4331_v29, %v7652_v34 }
 0x504   : > { %v4142_v62 = vpop.f32.mrf.mxu1  ;;  %v4335_v60 = vpop.f32.mrf.mxu0 }
 0x505   : > { %4698 = vst [vmem:[%s7658_s26 + $0x2d8] sm:$0xff] %v4139_v2  ;;  %4700 = vst [vmem:[%s7658_s26 + $0x2e8] sm:$0xff] %v4332_v41  ;;  %v4143_v25 = vadd.f32 %v4142_v62, %v7642_v14  ;;  %v4336_v39 = vadd.f32 %v4335_v60, %v7645_v38 }
 0x506   : > { %v4144_v49 = vpop.f32.mrf.mxu1  ;;  %v4337_v35 = vpop.f32.mrf.mxu0 }
 0x507   : > { %4703 = vst [vmem:[%s7658_s26 + $0x300] sm:$0xff] %v4143_v25  ;;  %4705 = vst [vmem:[%s7658_s26 + $0x310] sm:$0xff] %v4336_v39  ;;  %v4145_v51 = vadd.f32 %v4144_v49, %v7649_v3  ;;  %v4338_v37 = vadd.f32 %v4337_v35, %v7652_v34 }
 0x508   : > { %v4146_v50 = vpop.f32.mrf.mxu1  ;;  %v4339_v33 = vpop.f32.mrf.mxu0 }
 0x509   : > { %4704 = vst [vmem:[%s7658_s26 + $0x308] sm:$0xff] %v4145_v51  ;;  %4706 = vst [vmem:[%s7658_s26 + $0x318] sm:$0xff] %v4338_v37  ;;  %v4147_v5 = vadd.f32 %v4146_v50, %v7642_v14  ;;  %v4340_v21 = vadd.f32 %v4339_v33, %v7645_v38 }
 0x50a   : > { %v4148_v9 = vpop.f32.mrf.mxu1  ;;  %v4341_v52 = vpop.f32.mrf.mxu0 }
 0x50b   : > { %4709 = vst [vmem:[%s7658_s26 + $0x330] sm:$0xff] %v4147_v5  ;;  %4711 = vst [vmem:[%s7658_s26 + $0x340] sm:$0xff] %v4340_v21  ;;  %v4149_v6 = vadd.f32 %v4148_v9, %v7649_v3  ;;  %v4342_v63 = vadd.f32 %v4341_v52, %v7652_v34 }
 0x50c   : > { %v4152_v12 = vpop.f32.mrf.mxu1  ;;  %v4345_v16 = vpop.f32.mrf.mxu0 }
 0x50d   : > { %4710 = vst [vmem:[%s7658_s26 + $0x338] sm:$0xff] %v4149_v6  ;;  %4712 = vst [vmem:[%s7658_s26 + $0x348] sm:$0xff] %v4342_v63  ;;  %v4153_v11 = vadd.f32 %v4152_v12, %v7642_v14  ;;  %v4346_v36 = vadd.f32 %v4345_v16, %v7645_v38 }
 0x50e   : > { %v4154_v19 = vpop.f32.mrf.mxu1  ;;  %v4347_v53 = vpop.f32.mrf.mxu0 }
 0x50f   : > { %4715 = vst [vmem:[%s7658_s26 + $0x360] sm:$0xff] %v4153_v11  ;;  %4717 = vst [vmem:[%s7658_s26 + $0x370] sm:$0xff] %v4346_v36  ;;  %v4155_v10 = vadd.f32 %v4154_v19, %v7649_v3  ;;  %v4348_v44 = vadd.f32 %v4347_v53, %v7652_v34 }
 0x510   : > { %v4156_v58 = vpop.f32.mrf.mxu1  ;;  %v4349_v56 = vpop.f32.mrf.mxu0 }
 0x511   : > { %4716 = vst [vmem:[%s7658_s26 + $0x368] sm:$0xff] %v4155_v10  ;;  %4718 = vst [vmem:[%s7658_s26 + $0x378] sm:$0xff] %v4348_v44  ;;  %v4157_v31 = vadd.f32 %v4156_v58, %v7642_v14  ;;  %v4350_v46 = vadd.f32 %v4349_v56, %v7645_v38 }
 0x512   : > { %v4158_v32 = vpop.f32.mrf.mxu1  ;;  %v4351_v18 = vpop.f32.mrf.mxu0 }
 0x513   : > { %4721 = vst [vmem:[%s7658_s26 + $0x390] sm:$0xff] %v4157_v31  ;;  %4723 = vst [vmem:[%s7658_s26 + $0x3a0] sm:$0xff] %v4350_v46  ;;  %v4159_v23 = vadd.f32 %v4158_v32, %v7649_v3  ;;  %v4352_v17 = vadd.f32 %v4351_v18, %v7652_v34 }
 0x514   : > { %v4162_v1 = vpop.f32.mrf.mxu1  ;;  %v4355_v59 = vpop.f32.mrf.mxu0 }
 0x515   : > { %4722 = vst [vmem:[%s7658_s26 + $0x398] sm:$0xff] %v4159_v23  ;;  %4724 = vst [vmem:[%s7658_s26 + $0x3a8] sm:$0xff] %v4352_v17  ;;  %v4163_v54 = vadd.f32 %v4162_v1, %v7642_v14  ;;  %v4356_v48 = vadd.f32 %v4355_v59, %v7645_v38 }
 0x516   : > { %v4164_v24 = vpop.f32.mrf.mxu1  ;;  %v4357_v13 = vpop.f32.mrf.mxu0 }
 0x517   : > { %4727 = vst [vmem:[%s7658_s26 + $0x3c0] sm:$0xff] %v4163_v54  ;;  %4729 = vst [vmem:[%s7658_s26 + $0x3d0] sm:$0xff] %v4356_v48  ;;  %v4165_v45 = vadd.f32 %v4164_v24, %v7649_v3  ;;  %v4358_v20 = vadd.f32 %v4357_v13, %v7652_v34 }
 0x518   : > { %v4166_v26 = vpop.f32.mrf.mxu1  ;;  %v4359_v4 = vpop.f32.mrf.mxu0 }
 0x519   : > { %4728 = vst [vmem:[%s7658_s26 + $0x3c8] sm:$0xff] %v4165_v45  ;;  %4730 = vst [vmem:[%s7658_s26 + $0x3d8] sm:$0xff] %v4358_v20  ;;  %v4167_v22 = vadd.f32 %v4166_v26, %v7642_v14  ;;  %v4360_v40 = vadd.f32 %v4359_v4, %v7645_v38 }
 0x51a   : > { %v4168_v28 = vpop.f32.mrf.mxu1  ;;  %v4361_v55 = vpop.f32.mrf.mxu0 }
 0x51b   : > { %4733 = vst [vmem:[%s7658_s26 + $0x3f0] sm:$0xff] %v4167_v22  ;;  %4735 = vst [vmem:[%s7658_s26 + $0x400] sm:$0xff] %v4360_v40  ;;  %v4169_v30 = vadd.f32 %v4168_v28, %v7649_v3  ;;  %v4362_v61 = vadd.f32 %v4361_v55, %v7652_v34 }
 0x51c   : > { %v4172_v42 = vpop.f32.mrf.mxu1  ;;  %v4365_v0 = vpop.f32.mrf.mxu0 }
 0x51d   : > { %4734 = vst [vmem:[%s7658_s26 + $0x3f8] sm:$0xff] %v4169_v30  ;;  %4736 = vst [vmem:[%s7658_s26 + $0x408] sm:$0xff] %v4362_v61  ;;  %v4173_v43 = vadd.f32 %v4172_v42, %v7642_v14  ;;  %v4366_v8 = vadd.f32 %v4365_v0, %v7645_v38 }
 0x51e   : > { %v4174_v7 = vpop.f32.mrf.mxu1  ;;  %v4367_v15 = vpop.f32.mrf.mxu0 }
 0x51f   : > { %4739 = vst [vmem:[%s7658_s26 + $0x420] sm:$0xff] %v4173_v43  ;;  %4741 = vst [vmem:[%s7658_s26 + $0x430] sm:$0xff] %v4366_v8  ;;  %v4175_v47 = vadd.f32 %v4174_v7, %v7649_v3  ;;  %v4368_v29 = vadd.f32 %v4367_v15, %v7652_v34 }
 0x520   : > { %v4176_v2 = vpop.f32.mrf.mxu1  ;;  %v4369_v41 = vpop.f32.mrf.mxu0 }
 0x521   : > { %4740 = vst [vmem:[%s7658_s26 + $0x428] sm:$0xff] %v4175_v47  ;;  %4742 = vst [vmem:[%s7658_s26 + $0x438] sm:$0xff] %v4368_v29  ;;  %v4177_v62 = vadd.f32 %v4176_v2, %v7642_v14  ;;  %v4370_v60 = vadd.f32 %v4369_v41, %v7645_v38  ;;  %v3536_v2 = vsub.s32 4, %v8284_v57 }
 0x522   : > { %v4178_v25 = vpop.f32.mrf.mxu1  ;;  %v4371_v39 = vpop.f32.mrf.mxu0 }
 0x523   : > { %4745 = vst [vmem:[%s7658_s26 + $0x450] sm:$0xff] %v4177_v62  ;;  %4747 = vst [vmem:[%s7658_s26 + $0x460] sm:$0xff] %v4370_v60  ;;  %v4179_v49 = vadd.f32 %v4178_v25, %v7649_v3  ;;  %v4372_v35 = vadd.f32 %v4371_v39, %v7652_v34  ;;  %v3540_v39 = vsub.s32 5, %v8284_v57 }
 0x524   : > { %v4182_v51 = vpop.f32.mrf.mxu1  ;;  %v4375_v37 = vpop.f32.mrf.mxu0 }
 0x525   : > { %4746 = vst [vmem:[%s7658_s26 + $0x458] sm:$0xff] %v4179_v49  ;;  %4748 = vst [vmem:[%s7658_s26 + $0x468] sm:$0xff] %v4372_v35  ;;  %v4183_v50 = vadd.f32 %v4182_v51, %v7642_v14  ;;  %v4376_v33 = vadd.f32 %v4375_v37, %v7645_v38 }
 0x526   : > { %v4184_v5 = vpop.f32.mrf.mxu1  ;;  %v4377_v21 = vpop.f32.mrf.mxu0 }
 0x527   : > { %4751 = vst [vmem:[%s7658_s26 + $0x480] sm:$0xff] %v4183_v50  ;;  %4753 = vst [vmem:[%s7658_s26 + $0x490] sm:$0xff] %v4376_v33  ;;  %v4185_v9 = vadd.f32 %v4184_v5, %v7649_v3  ;;  %v4378_v52 = vadd.f32 %v4377_v21, %v7652_v34  ;;  %v7924_v5 = vrot.slane %v7636_v27, %v3536_v2 }
 0x528   : > { %v4186_v6 = vpop.f32.mrf.mxu1  ;;  %v4379_v63 = vpop.f32.mrf.mxu0 }
 0x529   : > { %4752 = vst [vmem:[%s7658_s26 + $0x488] sm:$0xff] %v4185_v9  ;;  %4754 = vst [vmem:[%s7658_s26 + $0x498] sm:$0xff] %v4378_v52  ;;  %v4187_v12 = vadd.f32 %v4186_v6, %v7642_v14  ;;  %v4380_v16 = vadd.f32 %v4379_v63, %v7645_v38  ;;  %v7931_v6 = vrot.slane %v7636_v27, %v3540_v39 }
 0x52a   : > { %v4188_v11 = vpop.f32.mrf.mxu1  ;;  %v4381_v36 = vpop.f32.mrf.mxu0 }
 0x52b   : > { %4757 = vst [vmem:[%s7658_s26 + $0x4b0] sm:$0xff] %v4187_v12  ;;  %4759 = vst [vmem:[%s7658_s26 + $0x4c0] sm:$0xff] %v4380_v16  ;;  %v4189_v19 = vadd.f32 %v4188_v11, %v7649_v3  ;;  %v4382_v53 = vadd.f32 %v4381_v36, %v7652_v34 }
 0x52c   : > { %v4192_v10 = vpop.f32.mrf.mxu1  ;;  %v4385_v44 = vpop.f32.mrf.mxu0 }
 0x52d   : > { %4758 = vst [vmem:[%s7658_s26 + $0x4b8] sm:$0xff] %v4189_v19  ;;  %4760 = vst [vmem:[%s7658_s26 + $0x4c8] sm:$0xff] %v4382_v53  ;;  %v4193_v58 = vadd.f32 %v4192_v10, %v7642_v14  ;;  %v4386_v56 = vadd.f32 %v4385_v44, %v7645_v38 }
 0x52e   : > { %v4194_v31 = vpop.f32.mrf.mxu1  ;;  %v4387_v46 = vpop.f32.mrf.mxu0 }
 0x52f   : > { %4763 = vst [vmem:[%s7658_s26 + $0x4e0] sm:$0xff] %v4193_v58  ;;  %4765 = vst [vmem:[%s7658_s26 + $0x4f0] sm:$0xff] %v4386_v56  ;;  %v4195_v32 = vadd.f32 %v4194_v31, %v7649_v3  ;;  %v4388_v18 = vadd.f32 %v4387_v46, %v7652_v34 }
 0x530   : > { %v4196_v23 = vpop.f32.mrf.mxu1  ;;  %v4389_v17 = vpop.f32.mrf.mxu0 }
 0x531   : > { %4764 = vst [vmem:[%s7658_s26 + $0x4e8] sm:$0xff] %v4195_v32  ;;  %4766 = vst [vmem:[%s7658_s26 + $0x4f8] sm:$0xff] %v4388_v18  ;;  %v4197_v1 = vadd.f32 %v4196_v23, %v7642_v14  ;;  %v4390_v59 = vadd.f32 %v4389_v17, %v7645_v38 }
 0x532   : > { %v4198_v54 = vpop.f32.mrf.mxu1  ;;  %v4391_v48 = vpop.f32.mrf.mxu0 }
 0x533   : > { %4769 = vst [vmem:[%s7658_s26 + $0x510] sm:$0xff] %v4197_v1  ;;  %4771 = vst [vmem:[%s7658_s26 + $0x520] sm:$0xff] %v4390_v59  ;;  %v4199_v24 = vadd.f32 %v4198_v54, %v7649_v3  ;;  %v4392_v13 = vadd.f32 %v4391_v48, %v7652_v34 }
 0x534   : > { %v4202_v45 = vpop.f32.mrf.mxu1  ;;  %v4395_v20 = vpop.f32.mrf.mxu0 }
 0x535   : > { %4770 = vst [vmem:[%s7658_s26 + $0x518] sm:$0xff] %v4199_v24  ;;  %4772 = vst [vmem:[%s7658_s26 + $0x528] sm:$0xff] %v4392_v13  ;;  %v4203_v26 = vadd.f32 %v4202_v45, %v7642_v14  ;;  %v4396_v4 = vadd.f32 %v4395_v20, %v7645_v38 }
 0x536   : > { %v4204_v22 = vpop.f32.mrf.mxu1  ;;  %v4397_v40 = vpop.f32.mrf.mxu0 }
 0x537   : > { %4775 = vst [vmem:[%s7658_s26 + $0x540] sm:$0xff] %v4203_v26  ;;  %4777 = vst [vmem:[%s7658_s26 + $0x550] sm:$0xff] %v4396_v4  ;;  %v4205_v28 = vadd.f32 %v4204_v22, %v7649_v3  ;;  %v4398_v55 = vadd.f32 %v4397_v40, %v7652_v34 }
 0x538   : > { %v4206_v30 = vpop.f32.mrf.mxu1  ;;  %v4399_v61 = vpop.f32.mrf.mxu0 }
 0x539   : > { %4776 = vst [vmem:[%s7658_s26 + $0x548] sm:$0xff] %v4205_v28  ;;  %4778 = vst [vmem:[%s7658_s26 + $0x558] sm:$0xff] %v4398_v55  ;;  %v4207_v42 = vadd.f32 %v4206_v30, %v7642_v14  ;;  %v4400_v0 = vadd.f32 %v4399_v61, %v7645_v38 }
 0x53a   : > { %v4208_v43 = vpop.f32.mrf.mxu1  ;;  %v4401_v8 = vpop.f32.mrf.mxu0 }
 0x53b   : > { %4781 = vst [vmem:[%s7658_s26 + $0x570] sm:$0xff] %v4207_v42  ;;  %4783 = vst [vmem:[%s7658_s26 + $0x580] sm:$0xff] %v4400_v0  ;;  %v4209_v7 = vadd.f32 %v4208_v43, %v7649_v3  ;;  %v4402_v15 = vadd.f32 %v4401_v8, %v7652_v34 }
 0x53c   : > { %v4212_v47 = vpop.f32.mrf.mxu1  ;;  %v4405_v29 = vpop.f32.mrf.mxu0 }
 0x53d   : > { %4782 = vst [vmem:[%s7658_s26 + $0x578] sm:$0xff] %v4209_v7  ;;  %4784 = vst [vmem:[%s7658_s26 + $0x588] sm:$0xff] %v4402_v15  ;;  %v4213_v41 = vadd.f32 %v4212_v47, %v7642_v14  ;;  %v4406_v62 = vadd.f32 %v4405_v29, %v7645_v38 }
 0x53e   : > { %v4214_v60 = vpop.f32.mrf.mxu1  ;;  %v4407_v25 = vpop.f32.mrf.mxu0 }
 0x53f   : > { %4787 = vst [vmem:[%s7658_s26 + $0x5a0] sm:$0xff] %v4213_v41  ;;  %4789 = vst [vmem:[%s7658_s26 + $0x5b0] sm:$0xff] %v4406_v62  ;;  %v4215_v49 = vadd.f32 %v4214_v60, %v7649_v3  ;;  %v4408_v35 = vadd.f32 %v4407_v25, %v7652_v34 }
 0x540   : > { %v4216_v51 = vpop.f32.mrf.mxu1  ;;  %v4409_v37 = vpop.f32.mrf.mxu0 }
 0x541   : > { %4788 = vst [vmem:[%s7658_s26 + $0x5a8] sm:$0xff] %v4215_v49  ;;  %4790 = vst [vmem:[%s7658_s26 + $0x5b8] sm:$0xff] %v4408_v35  ;;  %v4217_v50 = vadd.f32 %v4216_v51, %v7642_v14  ;;  %v4410_v33 = vadd.f32 %v4409_v37, %v7645_v38 }
 0x542   : > { %v4218_v57 = vpop.f32.mrf.mxu1  ;;  %v4411_v21 = vpop.f32.mrf.mxu0 }
 0x543   : > { %4793 = vst [vmem:[%s7658_s26 + $0x5d0] sm:$0xff] %v4217_v50  ;;  %4795 = vst [vmem:[%s7658_s26 + $0x5e0] sm:$0xff] %v4410_v33  ;;  %v4219_v9 = vadd.f32 %v4218_v57, %v7649_v3  ;;  %v4412_v52 = vadd.f32 %v4411_v21, %v7652_v34 }
 0x544   : > { %v4448_v14 = vpop.f32.mrf.mxu1 }
 0x545   : > { %4794 = vst [vmem:[%s7658_s26 + $0x5d8] sm:$0xff] %v4219_v9  ;;  %4796 = vst [vmem:[%s7658_s26 + $0x5e8] sm:$0xff] %v4412_v52  ;;  %v4449_v38 = vadd.f32 %v4448_v14, %v7924_v5 }
 0x546   : > { %v4450_v63 = vpop.f32.mrf.mxu1 }
 0x547   : > { %4611 = vst [vmem:[%s7658_s26 + $0x20] sm:$0xff] %v4449_v38  ;;  %v4451_v12 = vadd.f32 %v4450_v63, %v7931_v6 }
 0x548   : > { %v4452_v16 = vpop.f32.mrf.mxu1 }
 0x549   : > { %4612 = vst [vmem:[%s7658_s26 + $0x28] sm:$0xff] %v4451_v12  ;;  %v4453_v3 = vadd.f32 %v4452_v16, %v7924_v5 }
 0x54a   : > { %v4454_v34 = vpop.f32.mrf.mxu1 }
 0x54b   : > { %4617 = vst [vmem:[%s7658_s26 + $0x50] sm:$0xff] %v4453_v3  ;;  %v4455_v27 = vadd.f32 %v4454_v34, %v7931_v6 }
 0x54c   : > { %v4458_v11 = vpop.f32.mrf.mxu1 }
 0x54d   : > { %4618 = vst [vmem:[%s7658_s26 + $0x58] sm:$0xff] %v4455_v27  ;;  %v4459_v36 = vadd.f32 %v4458_v11, %v7924_v5 }
 0x54e   : > { %v4460_v19 = vpop.f32.mrf.mxu1 }
 0x54f   : > { %4623 = vst [vmem:[%s7658_s26 + $0x80] sm:$0xff] %v4459_v36  ;;  %v4461_v53 = vadd.f32 %v4460_v19, %v7931_v6 }
 0x550   : > { %v4462_v10 = vpop.f32.mrf.mxu1 }
 0x551   : > { %4624 = vst [vmem:[%s7658_s26 + $0x88] sm:$0xff] %v4461_v53  ;;  %v4463_v44 = vadd.f32 %v4462_v10, %v7924_v5 }
 0x552   : > { %v4464_v58 = vpop.f32.mrf.mxu1 }
 0x553   : > { %4629 = vst [vmem:[%s7658_s26 + $0xb0] sm:$0xff] %v4463_v44  ;;  %v4465_v56 = vadd.f32 %v4464_v58, %v7931_v6 }
 0x554   : > { %v4468_v31 = vpop.f32.mrf.mxu1 }
 0x555   : > { %4630 = vst [vmem:[%s7658_s26 + $0xb8] sm:$0xff] %v4465_v56  ;;  %v4469_v46 = vadd.f32 %v4468_v31, %v7924_v5 }
 0x556   : > { %v4470_v32 = vpop.f32.mrf.mxu1 }
 0x557   : > { %4635 = vst [vmem:[%s7658_s26 + $0xe0] sm:$0xff] %v4469_v46  ;;  %v4471_v18 = vadd.f32 %v4470_v32, %v7931_v6 }
 0x558   : > { %v4472_v23 = vpop.f32.mrf.mxu1 }
 0x559   : > { %4636 = vst [vmem:[%s7658_s26 + $0xe8] sm:$0xff] %v4471_v18  ;;  %v4473_v17 = vadd.f32 %v4472_v23, %v7924_v5 }
 0x55a   : > { %v4474_v1 = vpop.f32.mrf.mxu1 }
 0x55b   : > { %4641 = vst [vmem:[%s7658_s26 + $0x110] sm:$0xff] %v4473_v17  ;;  %v4475_v59 = vadd.f32 %v4474_v1, %v7931_v6 }
 0x55c   : > { %v4478_v54 = vpop.f32.mrf.mxu1 }
 0x55d   : > { %4642 = vst [vmem:[%s7658_s26 + $0x118] sm:$0xff] %v4475_v59  ;;  %v4479_v48 = vadd.f32 %v4478_v54, %v7924_v5 }
 0x55e   : > { %v4480_v24 = vpop.f32.mrf.mxu1 }
 0x55f   : > { %4647 = vst [vmem:[%s7658_s26 + $0x140] sm:$0xff] %v4479_v48  ;;  %v4481_v13 = vadd.f32 %v4480_v24, %v7931_v6 }
 0x560   : > { %v4482_v45 = vpop.f32.mrf.mxu1 }
 0x561   : > { %4648 = vst [vmem:[%s7658_s26 + $0x148] sm:$0xff] %v4481_v13  ;;  %v4483_v20 = vadd.f32 %v4482_v45, %v7924_v5 }
 0x562   : > { %v4484_v26 = vpop.f32.mrf.mxu1 }
 0x563   : > { %4653 = vst [vmem:[%s7658_s26 + $0x170] sm:$0xff] %v4483_v20  ;;  %v4485_v4 = vadd.f32 %v4484_v26, %v7931_v6 }
 0x564   : > { %v4488_v22 = vpop.f32.mrf.mxu1 }
 0x565   : > { %4654 = vst [vmem:[%s7658_s26 + $0x178] sm:$0xff] %v4485_v4  ;;  %v4489_v40 = vadd.f32 %v4488_v22, %v7924_v5 }
 0x566   : > { %v4490_v28 = vpop.f32.mrf.mxu1 }
 0x567   : > { %4659 = vst [vmem:[%s7658_s26 + $0x1a0] sm:$0xff] %v4489_v40  ;;  %v4491_v55 = vadd.f32 %v4490_v28, %v7931_v6 }
 0x568   : > { %v4492_v30 = vpop.f32.mrf.mxu1 }
 0x569   : > { %4660 = vst [vmem:[%s7658_s26 + $0x1a8] sm:$0xff] %v4491_v55  ;;  %v4493_v61 = vadd.f32 %v4492_v30, %v7924_v5 }
 0x56a   : > { %v4494_v42 = vpop.f32.mrf.mxu1 }
 0x56b   : > { %4665 = vst [vmem:[%s7658_s26 + $0x1d0] sm:$0xff] %v4493_v61  ;;  %v4495_v0 = vadd.f32 %v4494_v42, %v7931_v6 }
 0x56c   : > { %v4498_v43 = vpop.f32.mrf.mxu1 }
 0x56d   : > { %4666 = vst [vmem:[%s7658_s26 + $0x1d8] sm:$0xff] %v4495_v0  ;;  %v4499_v8 = vadd.f32 %v4498_v43, %v7924_v5 }
 0x56e   : > { %v4500_v7 = vpop.f32.mrf.mxu1 }
 0x56f   : > { %4671 = vst [vmem:[%s7658_s26 + $0x200] sm:$0xff] %v4499_v8  ;;  %v4501_v15 = vadd.f32 %v4500_v7, %v7931_v6 }
 0x570   : > { %v4502_v47 = vpop.f32.mrf.mxu1 }
 0x571   : > { %4672 = vst [vmem:[%s7658_s26 + $0x208] sm:$0xff] %v4501_v15  ;;  %v4503_v29 = vadd.f32 %v4502_v47, %v7924_v5 }
 0x572   : > { %v4504_v2 = vpop.f32.mrf.mxu1 }
 0x573   : > { %4677 = vst [vmem:[%s7658_s26 + $0x230] sm:$0xff] %v4503_v29  ;;  %v4505_v41 = vadd.f32 %v4504_v2, %v7931_v6 }
 0x574   : > { %v4508_v62 = vpop.f32.mrf.mxu1 }
 0x575   : > { %4678 = vst [vmem:[%s7658_s26 + $0x238] sm:$0xff] %v4505_v41  ;;  %v4509_v60 = vadd.f32 %v4508_v62, %v7924_v5 }
 0x576   : > { %v4510_v25 = vpop.f32.mrf.mxu1 }
 0x577   : > { %4683 = vst [vmem:[%s7658_s26 + $0x260] sm:$0xff] %v4509_v60  ;;  %v4511_v39 = vadd.f32 %v4510_v25, %v7931_v6 }
 0x578   : > { %v4512_v49 = vpop.f32.mrf.mxu1 }
 0x579   : > { %4684 = vst [vmem:[%s7658_s26 + $0x268] sm:$0xff] %v4511_v39  ;;  %v4513_v35 = vadd.f32 %v4512_v49, %v7924_v5 }
 0x57a   : > { %v4514_v51 = vpop.f32.mrf.mxu1 }
 0x57b   : > { %4689 = vst [vmem:[%s7658_s26 + $0x290] sm:$0xff] %v4513_v35  ;;  %v4515_v37 = vadd.f32 %v4514_v51, %v7931_v6 }
 0x57c   : > { %v4518_v50 = vpop.f32.mrf.mxu1 }
 0x57d   : > { %4690 = vst [vmem:[%s7658_s26 + $0x298] sm:$0xff] %v4515_v37  ;;  %v4519_v33 = vadd.f32 %v4518_v50, %v7924_v5 }
 0x57e   : > { %v4520_v57 = vpop.f32.mrf.mxu1 }
 0x57f   : > { %4695 = vst [vmem:[%s7658_s26 + $0x2c0] sm:$0xff] %v4519_v33  ;;  %v4521_v21 = vadd.f32 %v4520_v57, %v7931_v6 }
 0x580   : > { %v4522_v9 = vpop.f32.mrf.mxu1 }
 0x581   : > { %4696 = vst [vmem:[%s7658_s26 + $0x2c8] sm:$0xff] %v4521_v21  ;;  %v4523_v52 = vadd.f32 %v4522_v9, %v7924_v5 }
 0x582   : > { %v4524_v14 = vpop.f32.mrf.mxu1 }
 0x583   : > { %4701 = vst [vmem:[%s7658_s26 + $0x2f0] sm:$0xff] %v4523_v52  ;;  %v4525_v38 = vadd.f32 %v4524_v14, %v7931_v6 }
 0x584   : > { %v4528_v63 = vpop.f32.mrf.mxu1 }
 0x585   : > { %4702 = vst [vmem:[%s7658_s26 + $0x2f8] sm:$0xff] %v4525_v38  ;;  %v4529_v12 = vadd.f32 %v4528_v63, %v7924_v5 }
 0x586   : > { %v4530_v16 = vpop.f32.mrf.mxu1 }
 0x587   : > { %4707 = vst [vmem:[%s7658_s26 + $0x320] sm:$0xff] %v4529_v12  ;;  %v4531_v3 = vadd.f32 %v4530_v16, %v7931_v6 }
 0x588   : > { %v4532_v34 = vpop.f32.mrf.mxu1 }
 0x589   : > { %4708 = vst [vmem:[%s7658_s26 + $0x328] sm:$0xff] %v4531_v3  ;;  %v4533_v27 = vadd.f32 %v4532_v34, %v7924_v5 }
 0x58a   : > { %v4534_v11 = vpop.f32.mrf.mxu1 }
 0x58b   : > { %4713 = vst [vmem:[%s7658_s26 + $0x350] sm:$0xff] %v4533_v27  ;;  %v4535_v36 = vadd.f32 %v4534_v11, %v7931_v6 }
 0x58c   : > { %v4538_v19 = vpop.f32.mrf.mxu1 }
 0x58d   : > { %4714 = vst [vmem:[%s7658_s26 + $0x358] sm:$0xff] %v4535_v36  ;;  %v4539_v53 = vadd.f32 %v4538_v19, %v7924_v5 }
 0x58e   : > { %v4540_v10 = vpop.f32.mrf.mxu1 }
 0x58f   : > { %4719 = vst [vmem:[%s7658_s26 + $0x380] sm:$0xff] %v4539_v53  ;;  %v4541_v44 = vadd.f32 %v4540_v10, %v7931_v6 }
 0x590   : > { %v4542_v58 = vpop.f32.mrf.mxu1 }
 0x591   : > { %4720 = vst [vmem:[%s7658_s26 + $0x388] sm:$0xff] %v4541_v44  ;;  %v4543_v56 = vadd.f32 %v4542_v58, %v7924_v5 }
 0x592   : > { %v4544_v31 = vpop.f32.mrf.mxu1 }
 0x593   : > { %4725 = vst [vmem:[%s7658_s26 + $0x3b0] sm:$0xff] %v4543_v56  ;;  %v4545_v46 = vadd.f32 %v4544_v31, %v7931_v6 }
 0x594   : > { %v4548_v32 = vpop.f32.mrf.mxu1 }
 0x595   : > { %4726 = vst [vmem:[%s7658_s26 + $0x3b8] sm:$0xff] %v4545_v46  ;;  %v4549_v18 = vadd.f32 %v4548_v32, %v7924_v5 }
 0x596   : > { %v4550_v23 = vpop.f32.mrf.mxu1 }
 0x597   : > { %4731 = vst [vmem:[%s7658_s26 + $0x3e0] sm:$0xff] %v4549_v18  ;;  %v4551_v17 = vadd.f32 %v4550_v23, %v7931_v6 }
 0x598   : > { %v4552_v1 = vpop.f32.mrf.mxu1 }
 0x599   : > { %4732 = vst [vmem:[%s7658_s26 + $0x3e8] sm:$0xff] %v4551_v17  ;;  %v4553_v59 = vadd.f32 %v4552_v1, %v7924_v5 }
 0x59a   : > { %v4554_v54 = vpop.f32.mrf.mxu1 }
 0x59b   : > { %4737 = vst [vmem:[%s7658_s26 + $0x410] sm:$0xff] %v4553_v59  ;;  %v4555_v48 = vadd.f32 %v4554_v54, %v7931_v6 }
 0x59c   : > { %v4558_v24 = vpop.f32.mrf.mxu1 }
 0x59d   : > { %4738 = vst [vmem:[%s7658_s26 + $0x418] sm:$0xff] %v4555_v48  ;;  %v4559_v13 = vadd.f32 %v4558_v24, %v7924_v5 }
 0x59e   : > { %v4560_v45 = vpop.f32.mrf.mxu1 }
 0x59f   : > { %4743 = vst [vmem:[%s7658_s26 + $0x440] sm:$0xff] %v4559_v13  ;;  %v4561_v20 = vadd.f32 %v4560_v45, %v7931_v6 }
 0x5a0   : > { %v4562_v26 = vpop.f32.mrf.mxu1 }
 0x5a1   : > { %4744 = vst [vmem:[%s7658_s26 + $0x448] sm:$0xff] %v4561_v20  ;;  %v4563_v4 = vadd.f32 %v4562_v26, %v7924_v5 }
 0x5a2   : > { %v4564_v22 = vpop.f32.mrf.mxu1 }
 0x5a3   : > { %4749 = vst [vmem:[%s7658_s26 + $0x470] sm:$0xff] %v4563_v4  ;;  %v4565_v40 = vadd.f32 %v4564_v22, %v7931_v6 }
 0x5a4   : > { %v4568_v28 = vpop.f32.mrf.mxu1 }
 0x5a5   : > { %4750 = vst [vmem:[%s7658_s26 + $0x478] sm:$0xff] %v4565_v40  ;;  %v4569_v55 = vadd.f32 %v4568_v28, %v7924_v5 }
 0x5a6   : > { %v4570_v30 = vpop.f32.mrf.mxu1 }
 0x5a7   : > { %4755 = vst [vmem:[%s7658_s26 + $0x4a0] sm:$0xff] %v4569_v55  ;;  %v4571_v61 = vadd.f32 %v4570_v30, %v7931_v6 }
 0x5a8   : > { %v4572_v42 = vpop.f32.mrf.mxu1 }
 0x5a9   : > { %4756 = vst [vmem:[%s7658_s26 + $0x4a8] sm:$0xff] %v4571_v61  ;;  %v4573_v0 = vadd.f32 %v4572_v42, %v7924_v5 }
 0x5aa   : > { %v4574_v43 = vpop.f32.mrf.mxu1 }
 0x5ab   : > { %4761 = vst [vmem:[%s7658_s26 + $0x4d0] sm:$0xff] %v4573_v0  ;;  %v4575_v8 = vadd.f32 %v4574_v43, %v7931_v6 }
 0x5ac   : > { %v4578_v7 = vpop.f32.mrf.mxu1 }
 0x5ad   : > { %4762 = vst [vmem:[%s7658_s26 + $0x4d8] sm:$0xff] %v4575_v8  ;;  %v4579_v15 = vadd.f32 %v4578_v7, %v7924_v5 }
 0x5ae   : > { %v4580_v47 = vpop.f32.mrf.mxu1 }
 0x5af   : > { %4767 = vst [vmem:[%s7658_s26 + $0x500] sm:$0xff] %v4579_v15  ;;  %v4581_v29 = vadd.f32 %v4580_v47, %v7931_v6 }
 0x5b0   : > { %v4582_v2 = vpop.f32.mrf.mxu1 }
 0x5b1   : > { %4768 = vst [vmem:[%s7658_s26 + $0x508] sm:$0xff] %v4581_v29  ;;  %v4583_v41 = vadd.f32 %v4582_v2, %v7924_v5 }
 0x5b2   : > { %v4584_v62 = vpop.f32.mrf.mxu1 }
 0x5b3   : > { %4773 = vst [vmem:[%s7658_s26 + $0x530] sm:$0xff] %v4583_v41  ;;  %v4585_v60 = vadd.f32 %v4584_v62, %v7931_v6 }
 0x5b4   : > { %v4588_v25 = vpop.f32.mrf.mxu1 }
 0x5b5   : > { %4774 = vst [vmem:[%s7658_s26 + $0x538] sm:$0xff] %v4585_v60  ;;  %v4589_v39 = vadd.f32 %v4588_v25, %v7924_v5 }
 0x5b6   : > { %v4590_v49 = vpop.f32.mrf.mxu1 }
 0x5b7   : > { %4779 = vst [vmem:[%s7658_s26 + $0x560] sm:$0xff] %v4589_v39  ;;  %v4591_v35 = vadd.f32 %v4590_v49, %v7931_v6 }
 0x5b8   : > { %v4592_v51 = vpop.f32.mrf.mxu1 }
 0x5b9   : > { %4780 = vst [vmem:[%s7658_s26 + $0x568] sm:$0xff] %v4591_v35  ;;  %v4593_v37 = vadd.f32 %v4592_v51, %v7924_v5 }
 0x5ba   : > { %v4594_v50 = vpop.f32.mrf.mxu1 }
 0x5bb   : > { %4785 = vst [vmem:[%s7658_s26 + $0x590] sm:$0xff] %v4593_v37  ;;  %v4595_v33 = vadd.f32 %v4594_v50, %v7931_v6 }
 0x5bc   : > { %v4598_v57 = vpop.f32.mrf.mxu1 }
 0x5bd   : > { %4786 = vst [vmem:[%s7658_s26 + $0x598] sm:$0xff] %v4595_v33  ;;  %v4599_v21 = vadd.f32 %v4598_v57, %v7924_v5 }
 0x5be   : > { %v4600_v9 = vpop.f32.mrf.mxu1 }
 0x5bf   : > { %4791 = vst [vmem:[%s7658_s26 + $0x5c0] sm:$0xff] %v4599_v21  ;;  %v4601_v52 = vadd.f32 %v4600_v9, %v7931_v6 }
 0x5c0   : > { %v4602_v14 = vpop.f32.mrf.mxu1 }
 0x5c1   : > { %4792 = vst [vmem:[%s7658_s26 + $0x5c8] sm:$0xff] %v4601_v52  ;;  %v4603_v38 = vadd.f32 %v4602_v14, %v7924_v5 }
 0x5c2   : > { %v4604_v63 = vpop.f32.mrf.mxu1 }
 0x5c3   : > { %4797 = vst [vmem:[%s7658_s26 + $0x5f0] sm:$0xff] %v4603_v38  ;;  %v4605_v12 = vadd.f32 %v4604_v63, %v7931_v6 }
 0x5c5   : > { %4798 = vst [vmem:[%s7658_s26 + $0x5f8] sm:$0xff] %v4605_v12 }
 0x5c6   : > { %6323 = shalt.err (!%p6320_p6)
}
 0x5c7   : > { %s6324_s17 = scalar_lea.hbm %s8065_s5, 24576  ;;  %s6328_s0 = scalar_lea.hbm %s8123_s10, 49152 }
 0x5c8   : > { %p6325_p4 = scmp.ne.s32.totalorder %s8065_s5, %s6324_s17  ;;  %p6329_p8 = scmp.lt.s32.totalorder %s8065_s5, %s8123_s10 }
 0x5c9   : > { %p6330_p10 = scmp.lt.s32.totalorder %s6328_s0, %s6324_s17 }
 0x5ca   : > { %p6326_p0 = pnand %p6325_p4, %p8285_p5 }
 0x5cb   : > { %p6331_p12 = por %p6330_p10, %p6329_p8 }
 0x5cc   : > { %p6327_p3 = pneg %p6326_p0 }
 0x5ce   : > { %p6332_p2 = pnand %p6331_p12, %p6327_p3 }
 0x5d0   : > { %6335 = shalt.err (!%p6332_p2)
}
 0x5d1   : > { %s6417_s12 = smov 768   ;;  %s6418_s28 = smov 48  }
 0x5d2   : > { %5414 = dma.vmem_to_hbm [thread:$0]  (%p8285_p5), %s8067_s29, 24576, %s8065_s5, %s4800_s19, %s6417_s12, %s6417_s12, %s6418_s28  }
 0x5d3 PF: > { %s4829_s26 = sand.u32 1, %s6386_s13   ;;  %p8286_p13 = scmp.ne.s32.totalorder %s8156_s30, 0 }
 0x5d4   : > { %p8287_p7 = scmp.ge.s32.totalorder %s6398_s16, 2  ;;  %s4830_s24 = scalar_lea.sflag [#allocation4], %s4829_s26 }
 0x5d6   : > { %p5449_p9 = pnand %p8287_p7, %p8286_p13 }
 0x5d8   : > { %p5450_p11 = pneg %p5449_p9 }
 0x5da   : > { %6381 = dma.done.wait (%p5450_p11), %s4830_s24, 24576  }
 0x5db   : > { %6383 = vsyncadd (%p5450_p11), %s4830_s24, 4294942720  ;;  %p30_p1 = scmp.ge.s32.totalorder %s6596_s23, 4   ;;  %s8288_s13 = smov %s6390_s14 }
 0x5dc   : > { %s8289_s14 = smov %s6394_s15  ;;  %s8290_s15 = smov %s6607_s25 }
 0x5dd   : > { %s8291_s16 = smov %s6596_s23  ;;  %32 = sbr.rel (!%p30_p1) target bundleno = 20 (0x14), region = 150 }
 0x5e2   :  { %4835 = vsyncpa [#allocation3], 1 }
 0x5e3   :  { %4837 = vsyncpa [#allocation3 + $0x1], 1 }
 0x5e4   :  { %4838 = vsyncpa [#allocation6], 1 }
 0x5e5   :  { %4840 = vsyncpa [#allocation6 + $0x1], 1 }
 0x5e6   :  { %4841 = vsyncpa [#allocation9], 1 }
 0x5e7   :  { %4842 = vsyncpa [#allocation12], 1 }
 0x5e8   :  { %4843 = vsyncpa [#allocation15], 1 }
 0x5e9   :  { %4844 = vsyncpa [#allocation18], 1 }
 0x5ea   :  { %4845 = vsyncpa [#allocation4], 1 }
 0x5eb   :  { %4847 = vsyncpa [#allocation4 + $0x1], 1 }

</bundles_post_ra>
